<compile_context>
chip_gen: v5e
topology: v5e:2x2
jax: 0.10.0
libtpu: 0.0.40
codegen_flags: <defaults>
</compile_context>

<pallas_src>
import jax
import jax.numpy as jnp
from jax import lax
from jax.experimental import pallas as pl
from jax.experimental.pallas import tpu as pltpu

# ----------------------------- configuration (PyTorch defaults) ----------------
IMAGE_SIZE = 28
PATCH_SIZE = 7
IN_CHANNELS = 1
NUM_CLASSES = 10
EMBED_DIM = 64
DEPTH = 6
NUM_HEADS = 8
MLP_RATIO = 4.0
HIDDEN = int(EMBED_DIM * MLP_RATIO)               # 256
NUM_PATCHES = (IMAGE_SIZE // PATCH_SIZE) ** 2     # 16
SEQ = NUM_PATCHES + 1                             # 17 (cls token + patches)
SEQ_PAD = 24                                      # padded to a multiple of 8
HEAD_DIM = EMBED_DIM // NUM_HEADS                 # 8
PATCH_DIM = IN_CHANNELS * PATCH_SIZE * PATCH_SIZE # 49
PATCH_DIM_PAD = 64                                # lane-aligned K for patch embed
LN_EPS = 1e-5
ATTN_SCALE = 1.0 / float(HEAD_DIM) ** 0.5
NEG_BIG = -1e30                                   # additive mask for padded keys
MAX_BATCH_BLOCK = 8                               # images per grid step

_VMEM = pl.BlockSpec(memory_space=pltpu.MemorySpace.VMEM)


# ----------------------------- in-kernel helpers --------------------------------
def _layernorm(x, w, b):
    # x: (M, D); w, b: (1, D). Biased variance, eps=1e-5 (PyTorch LayerNorm).
    mu = jnp.mean(x, axis=-1, keepdims=True)
    var = jnp.mean((x - mu) ** 2, axis=-1, keepdims=True)
    return (x - mu) * lax.rsqrt(var + LN_EPS) * w + b


# ----------------------------- fused forward kernel ------------------------------
def vit_fused_kernel(patches_ref, add_ref, wp_ref,
                     wqkv_ref, bqkv_ref, wo_ref, bo_ref,
                     ln1w_ref, ln1b_ref, w1_ref, b1_ref, w2_ref, b2_ref,
                     ln2w_ref, ln2b_ref,
                     hlnw_ref, hlnb_ref, hw_ref, hb_ref,
                     out_ref):
    BB, S, PK = patches_ref.shape                  # batch block, padded seq, patch dim
    D = EMBED_DIM
    H = NUM_HEADS
    HD = HEAD_DIM
    M = BB * S
    BH = BB * H

    # ---- patch embedding + cls token + positional embedding --------------------
    # patches row 0 (cls slot), rows SEQ.. and pixel cols PATCH_DIM.. are zero;
    # add_ref carries cls+pos[0] on row 0, patch_bias+pos[1:SEQ] on patch rows,
    # zeros on the padded rows -> one matmul + one add builds the sequence.
    p2 = patches_ref[...].reshape(M, PK).astype(jnp.bfloat16)
    x = jnp.dot(p2, wp_ref[...], preferred_element_type=jnp.float32)        # (M, D)
    x = (x.reshape(BB, S, D) + add_ref[...]).reshape(M, D)

    # additive key-padding mask, hoisted out of the layer loop
    col = lax.broadcasted_iota(jnp.int32, (S, S), 1)
    neg = jnp.where(col < SEQ, 0.0, NEG_BIG).astype(jnp.float32)             # (S, S)
    neg3 = jnp.broadcast_to(neg.reshape(1, S, S), (BH, S, S))

    # ---- transformer encoder (post-norm, ReLU MLP, dropout = identity) ---------
    def layer(l, x):
        wqkv = wqkv_ref[l]
        bqkv = bqkv_ref[l]
        wo = wo_ref[l]
        bo = bo_ref[l]
        ln1w = ln1w_ref[l]
        ln1b = ln1b_ref[l]
        w1 = w1_ref[l]
        b1 = b1_ref[l]
        w2 = w2_ref[l]
        b2 = b2_ref[l]
        ln2w = ln2w_ref[l]
        ln2b = ln2b_ref[l]

        # --- QKV projection (attention scale pre-folded into Q weights/bias) ----
        qkv = jnp.dot(x.astype(jnp.bfloat16), wqkv,
                      preferred_element_type=jnp.float32) + bqkv            # (M, 3D)
        qkv3 = qkv.astype(jnp.bfloat16).reshape(BB, S, 3 * D)

        # --- multi-head attention, heads stacked along the batch axis -----------
        q_all = jnp.concatenate(
            [qkv3[:, :, h * HD:(h + 1) * HD] for h in range(H)], axis=0)     # (BH,S,HD)
        k_all = jnp.concatenate(
            [qkv3[:, :, D + h * HD:D + (h + 1) * HD] for h in range(H)], axis=0)
        v_all = jnp.concatenate(
            [qkv3[:, :, 2 * D + h * HD:2 * D + (h + 1) * HD] for h in range(H)],
            axis=0)

        s = jnp.einsum('bqd,bkd->bqk', q_all, k_all,
                       preferred_element_type=jnp.float32) + neg3            # (BH,S,S)
        s = s - jnp.max(s, axis=-1, keepdims=True)
        p = jnp.exp(s)
        p = p * pl.reciprocal(jnp.sum(p, axis=-1, keepdims=True), approx=True)

        ctx_all = jnp.einsum('bqk,bkd->bqd', p.astype(jnp.bfloat16), v_all,
                             preferred_element_type=jnp.float32)             # (BH,S,HD)
        # reassemble heads on the lane dim -> one (M,64)x(64,64) Wo matmul
        ctx = jnp.concatenate(
            [ctx_all[h * BB:(h + 1) * BB] for h in range(H)], axis=-1)       # (BB,S,D)
        proj = jnp.dot(ctx.reshape(M, D).astype(jnp.bfloat16), wo,
                       preferred_element_type=jnp.float32) + bo

        x = _layernorm(x + proj, ln1w, ln1b)       # post-norm, dropout = identity

        # --- feed forward (ReLU) -------------------------------------------------
        h1 = jnp.maximum(
            jnp.dot(x.astype(jnp.bfloat16), w1,
                    preferred_element_type=jnp.float32) + b1, 0.0)
        ff = jnp.dot(h1.astype(jnp.bfloat16), w2,
                     preferred_element_type=jnp.float32) + b2
        x = _layernorm(x + ff, ln2w, ln2b)
        return x

    x = lax.fori_loop(0, DEPTH, layer, x)

    # ---- classification head on the cls token ----------------------------------
    cls = x.reshape(BB, S, D)[:, 0:1, :].reshape(BB, D)
    cls = _layernorm(cls, hlnw_ref[...], hlnb_ref[...])
    logits = (jnp.dot(cls, hw_ref[...], preferred_element_type=jnp.float32)
              + hb_ref[...])                                                 # (BB, C)
    out_ref[...] = logits.reshape(BB, 1, NUM_CLASSES)


# ----------------------------- wrapper -------------------------------------------
def vit_forward(x, params):
    B = x.shape[0]
    BB = B if B <= MAX_BATCH_BLOCK else MAX_BATCH_BLOCK   # fixed-size batch block
    nb = -(-B // BB)                                       # cdiv
    Bp = nb * BB                                           # padded batch

    # ---- patch extraction (pure layout glue), padded to (Bp, SEQ_PAD, 64) ------
    _, C, Himg, Wimg = x.shape
    nh, nw = Himg // PATCH_SIZE, Wimg // PATCH_SIZE
    p = x.reshape(B, C, nh, PATCH_SIZE, nw, PATCH_SIZE)
    p = p.transpose(0, 2, 4, 1, 3, 5).reshape(B, NUM_PATCHES, PATCH_DIM)
    # row 0 reserved for the cls token; rows SEQ.. and pixel cols 49.. are zero.
    patches = jnp.pad(p, ((0, Bp - B),
                          (1, SEQ_PAD - 1 - NUM_PATCHES),
                          (0, PATCH_DIM_PAD - PATCH_DIM)))

    in_specs = ([pl.BlockSpec((BB, SEQ_PAD, PATCH_DIM_PAD), lambda b: (b, 0, 0))]
                + [_VMEM] * 18)
    out_specs = pl.BlockSpec((BB, 1, NUM_CLASSES), lambda b: (b, 0, 0))

    out = pl.pallas_call(
        vit_fused_kernel,
        out_shape=jax.ShapeDtypeStruct((Bp, 1, NUM_CLASSES), jnp.float32),
        grid=(nb,),
        in_specs=in_specs,
        out_specs=out_specs,
        compiler_params=pltpu.CompilerParams(dimension_semantics=("parallel",)),
    )(patches,
      params["add_table"], params["patch_w"],
      params["wqkv"], params["bqkv"], params["wo"], params["bo"],
      params["ln1w"], params["ln1b"], params["w1"], params["b1"],
      params["w2"], params["b2"], params["ln2w"], params["ln2b"],
      params["head_lnw"], params["head_lnb"], params["head_w"], params["head_b"])
    return out.reshape(Bp, NUM_CLASSES)[:B]


# ----------------------------- deterministic parameter init ----------------------
def trunc_normal(key, shape, std=0.02):
    return std * jax.random.truncated_normal(key, -2.0, 2.0, shape, jnp.float32)


def init_params(key):
    # Weights are generated directly in (in, out) layout (trunc_normal is i.i.d.,
    # so this is statistically identical to PyTorch's (out, in) init + transpose).
    ks = jax.random.split(key, 16)
    params = {}

    patch_w = jnp.zeros((PATCH_DIM_PAD, EMBED_DIM), jnp.float32)
    patch_w = patch_w.at[:PATCH_DIM].set(trunc_normal(ks[0], (PATCH_DIM, EMBED_DIM)))
    patch_b = jnp.zeros((EMBED_DIM,), jnp.float32)
    cls_token = trunc_normal(ks[1], (EMBED_DIM,))
    pos_embed = trunc_normal(ks[2], (SEQ, EMBED_DIM))

    # additive table folding cls token, positional embedding and the patch
    # projection bias into one (SEQ_PAD, D) array (padded rows stay zero).
    add_table = jnp.zeros((SEQ_PAD, EMBED_DIM), jnp.float32)
    add_table = add_table.at[0].set(cls_token + pos_embed[0])
    add_table = add_table.at[1:SEQ].set(patch_b[None, :] + pos_embed[1:])

    params["patch_w"] = patch_w.astype(jnp.bfloat16)
    params["add_table"] = add_table

    # transformer layers, stacked along a leading DEPTH axis (VMEM-resident).
    wqkv = trunc_normal(ks[3], (DEPTH, EMBED_DIM, 3 * EMBED_DIM))
    bqkv = jnp.zeros((DEPTH, 1, 3 * EMBED_DIM), jnp.float32)
    # fold the attention scale into the Q projection (columns 0..D-1).
    wqkv = wqkv.at[:, :, :EMBED_DIM].multiply(ATTN_SCALE)
    bqkv = bqkv.at[:, :, :EMBED_DIM].multiply(ATTN_SCALE)

    params["wqkv"] = wqkv.astype(jnp.bfloat16)
    params["bqkv"] = bqkv
    params["wo"] = trunc_normal(ks[4], (DEPTH, EMBED_DIM, EMBED_DIM)).astype(jnp.bfloat16)
    params["bo"] = jnp.zeros((DEPTH, 1, EMBED_DIM), jnp.float32)
    params["ln1w"] = jnp.ones((DEPTH, 1, EMBED_DIM), jnp.float32)
    params["ln1b"] = jnp.zeros((DEPTH, 1, EMBED_DIM), jnp.float32)
    params["w1"] = trunc_normal(ks[5], (DEPTH, EMBED_DIM, HIDDEN)).astype(jnp.bfloat16)
    params["b1"] = jnp.zeros((DEPTH, 1, HIDDEN), jnp.float32)
    params["w2"] = trunc_normal(ks[6], (DEPTH, HIDDEN, EMBED_DIM)).astype(jnp.bfloat16)
    params["b2"] = jnp.zeros((DEPTH, 1, EMBED_DIM), jnp.float32)
    params["ln2w"] = jnp.ones((DEPTH, 1, EMBED_DIM), jnp.float32)
    params["ln2b"] = jnp.zeros((DEPTH, 1, EMBED_DIM), jnp.float32)

    # mlp_head = LayerNorm(D) + Linear(D, num_classes) (kept in f32; tiny).
    params["head_lnw"] = jnp.ones((1, EMBED_DIM), jnp.float32)
    params["head_lnb"] = jnp.zeros((1, EMBED_DIM), jnp.float32)
    params["head_w"] = trunc_normal(ks[7], (EMBED_DIM, NUM_CLASSES))
    params["head_b"] = jnp.zeros((1, NUM_CLASSES), jnp.float32)
    return params


# TODO(synk): dropout layers are identity here (eval-mode semantics); training-mode
# stochastic dropout is not implemented.

if __name__ == "__main__":
    key = jax.random.PRNGKey(0)
    k_params, k_x = jax.random.split(key)
    params = init_params(k_params)
    x = jax.random.normal(k_x, (2, IN_CHANNELS, IMAGE_SIZE, IMAGE_SIZE), jnp.float32)

    fwd = jax.jit(lambda inp: vit_forward(inp, params))
    logits = fwd(x)
    jax.block_until_ready(logits)
    assert logits.shape == (2, NUM_CLASSES)
    assert bool(jnp.all(jnp.isfinite(logits)))
    print("KERNEL_OK")
</pallas_src>

<mosaic_0001>
module attributes {stable_mosaic.version = 11 : i64} {
  func.func @vit_fused_kernel(%arg0: i32, %arg1: memref<2x24x64xf32, #tpu.memory_space<vmem>>, %arg2: memref<24x64xf32, #tpu.memory_space<vmem>>, %arg3: memref<64x64xbf16, #tpu.memory_space<vmem>>, %arg4: memref<6x64x192xbf16, #tpu.memory_space<vmem>>, %arg5: memref<6x1x192xf32, #tpu.memory_space<vmem>>, %arg6: memref<6x64x64xbf16, #tpu.memory_space<vmem>>, %arg7: memref<6x1x64xf32, #tpu.memory_space<vmem>>, %arg8: memref<6x1x64xf32, #tpu.memory_space<vmem>>, %arg9: memref<6x1x64xf32, #tpu.memory_space<vmem>>, %arg10: memref<6x64x256xbf16, #tpu.memory_space<vmem>>, %arg11: memref<6x1x256xf32, #tpu.memory_space<vmem>>, %arg12: memref<6x256x64xbf16, #tpu.memory_space<vmem>>, %arg13: memref<6x1x64xf32, #tpu.memory_space<vmem>>, %arg14: memref<6x1x64xf32, #tpu.memory_space<vmem>>, %arg15: memref<6x1x64xf32, #tpu.memory_space<vmem>>, %arg16: memref<1x64xf32, #tpu.memory_space<vmem>>, %arg17: memref<1x64xf32, #tpu.memory_space<vmem>>, %arg18: memref<64x10xf32, #tpu.memory_space<vmem>>, %arg19: memref<1x10xf32, #tpu.memory_space<vmem>>, %arg20: memref<2x1x10xf32, #tpu.memory_space<vmem>>) attributes {dimension_semantics = [#tpu.dimension_semantics<parallel>], iteration_bounds = array<i64: 1>, scalar_prefetch = 0 : i64, scratch_operands = 0 : i64, tpu.core_type = #tpu.core_type<tc>, window_params = [{transform_indices = @transform_0, window_bounds = array<i64: 2, 24, 64>}, {pipeline_mode = #tpu.pipeline_mode<synchronous>, transform_indices = @transform_1, window_bounds = array<i64: 24, 64>}, {pipeline_mode = #tpu.pipeline_mode<synchronous>, transform_indices = @transform_2, window_bounds = array<i64: 64, 64>}, {pipeline_mode = #tpu.pipeline_mode<synchronous>, transform_indices = @transform_3, window_bounds = array<i64: 6, 64, 192>}, {pipeline_mode = #tpu.pipeline_mode<synchronous>, transform_indices = @transform_4, window_bounds = array<i64: 6, 1, 192>}, {pipeline_mode = #tpu.pipeline_mode<synchronous>, transform_indices = @transform_5, window_bounds = array<i64: 6, 64, 64>}, {pipeline_mode = #tpu.pipeline_mode<synchronous>, transform_indices = @transform_6, window_bounds = array<i64: 6, 1, 64>}, {pipeline_mode = #tpu.pipeline_mode<synchronous>, transform_indices = @transform_7, window_bounds = array<i64: 6, 1, 64>}, {pipeline_mode = #tpu.pipeline_mode<synchronous>, transform_indices = @transform_8, window_bounds = array<i64: 6, 1, 64>}, {pipeline_mode = #tpu.pipeline_mode<synchronous>, transform_indices = @transform_9, window_bounds = array<i64: 6, 64, 256>}, {pipeline_mode = #tpu.pipeline_mode<synchronous>, transform_indices = @transform_10, window_bounds = array<i64: 6, 1, 256>}, {pipeline_mode = #tpu.pipeline_mode<synchronous>, transform_indices = @transform_11, window_bounds = array<i64: 6, 256, 64>}, {pipeline_mode = #tpu.pipeline_mode<synchronous>, transform_indices = @transform_12, window_bounds = array<i64: 6, 1, 64>}, {pipeline_mode = #tpu.pipeline_mode<synchronous>, transform_indices = @transform_13, window_bounds = array<i64: 6, 1, 64>}, {pipeline_mode = #tpu.pipeline_mode<synchronous>, transform_indices = @transform_14, window_bounds = array<i64: 6, 1, 64>}, {pipeline_mode = #tpu.pipeline_mode<synchronous>, transform_indices = @transform_15, window_bounds = array<i64: 1, 64>}, {pipeline_mode = #tpu.pipeline_mode<synchronous>, transform_indices = @transform_16, window_bounds = array<i64: 1, 64>}, {pipeline_mode = #tpu.pipeline_mode<synchronous>, transform_indices = @transform_17, window_bounds = array<i64: 64, 10>}, {pipeline_mode = #tpu.pipeline_mode<synchronous>, transform_indices = @transform_18, window_bounds = array<i64: 1, 10>}, {transform_indices = @transform_19, window_bounds = array<i64: 2, 1, 10>}]} {
    %c0 = arith.constant 0 : index
    %c0_0 = arith.constant 0 : index
    %c0_1 = arith.constant 0 : index
    %0 = vector.load %arg1[%c0, %c0_0, %c0_1] : memref<2x24x64xf32, #tpu.memory_space<vmem>>, vector<2x24x64xf32>
    %1 = vector.shape_cast %0 : vector<2x24x64xf32> to vector<48x64xf32>
    %2 = arith.truncf %1 : vector<48x64xf32> to vector<48x64xbf16>
    %c0_2 = arith.constant 0 : index
    %c0_3 = arith.constant 0 : index
    %3 = vector.load %arg3[%c0_2, %c0_3] : memref<64x64xbf16, #tpu.memory_space<vmem>>, vector<64x64xbf16>
    %cst = arith.constant dense<0.000000e+00> : vector<48x64xf32>
    %4 = tpu.matmul %2, %3, %cst {dimension_numbers = #tpu.dot_dimension_numbers<[1], [0], [0], [1], [0, 0, 1, 1], [], []>} : vector<48x64xbf16>, vector<64x64xbf16>, vector<48x64xf32> -> vector<48x64xf32>
    %5 = vector.shape_cast %4 : vector<48x64xf32> to vector<2x24x64xf32>
    %c0_4 = arith.constant 0 : index
    %c0_5 = arith.constant 0 : index
    %6 = vector.load %arg2[%c0_4, %c0_5] : memref<24x64xf32, #tpu.memory_space<vmem>>, vector<24x64xf32>
    %7 = vector.shape_cast %6 : vector<24x64xf32> to vector<1x24x64xf32>
    %8 = vector.broadcast %7 : vector<1x24x64xf32> to vector<2x24x64xf32>
    %9 = arith.addf %5, %8 : vector<2x24x64xf32>
    %10 = vector.shape_cast %9 : vector<2x24x64xf32> to vector<48x64xf32>
    %11 = tpu.iota {dimensions = array<i32: 1>} : vector<24x24xi32>
    %c17_i32 = arith.constant 17 : i32
    %12 = vector.broadcast %c17_i32 : i32 to vector<24x24xi32>
    %13 = arith.cmpi slt, %11, %12 : vector<24x24xi32>
    %cst_6 = arith.constant 0.000000e+00 : f32
    %cst_7 = arith.constant -1.000000e+30 : f32
    %14 = vector.broadcast %cst_6 : f32 to vector<24x24xf32>
    %15 = vector.broadcast %cst_7 : f32 to vector<24x24xf32>
    %16 = arith.select %13, %14, %15 : vector<24x24xi1>, vector<24x24xf32>
    %17 = vector.shape_cast %16 : vector<24x24xf32> to vector<1x24x24xf32>
    %18 = vector.shape_cast %17 : vector<1x24x24xf32> to vector<1x24x24xf32>
    %19 = vector.broadcast %18 : vector<1x24x24xf32> to vector<16x24x24xf32>
    %c0_i32 = arith.constant 0 : i32
    %c6_i32 = arith.constant 6 : i32
    %20 = arith.addi %c0_i32, %c6_i32 : i32
    %c1_i32 = arith.constant 1 : i32
    %21 = scf.for %arg21 = %c0_i32 to %20 step %c1_i32 iter_args(%arg22 = %10) -> (vector<48x64xf32>)  : i32 {
      %56 = arith.index_cast %arg21 : i32 to index
      %c0_26 = arith.constant 0 : index
      %c0_27 = arith.constant 0 : index
      %57 = vector.load %arg4[%56, %c0_26, %c0_27] : memref<6x64x192xbf16, #tpu.memory_space<vmem>>, vector<1x64x192xbf16>
      %58 = vector.shape_cast %57 : vector<1x64x192xbf16> to vector<64x192xbf16>
      %59 = arith.index_cast %arg21 : i32 to index
      %c0_28 = arith.constant 0 : index
      %c0_29 = arith.constant 0 : index
      %60 = vector.load %arg5[%59, %c0_28, %c0_29] : memref<6x1x192xf32, #tpu.memory_space<vmem>>, vector<1x1x192xf32>
      %61 = vector.shape_cast %60 : vector<1x1x192xf32> to vector<1x192xf32>
      %62 = arith.index_cast %arg21 : i32 to index
      %c0_30 = arith.constant 0 : index
      %c0_31 = arith.constant 0 : index
      %63 = vector.load %arg6[%62, %c0_30, %c0_31] : memref<6x64x64xbf16, #tpu.memory_space<vmem>>, vector<1x64x64xbf16>
      %64 = vector.shape_cast %63 : vector<1x64x64xbf16> to vector<64x64xbf16>
      %65 = arith.index_cast %arg21 : i32 to index
      %c0_32 = arith.constant 0 : index
      %c0_33 = arith.constant 0 : index
      %66 = vector.load %arg7[%65, %c0_32, %c0_33] : memref<6x1x64xf32, #tpu.memory_space<vmem>>, vector<1x1x64xf32>
      %67 = vector.shape_cast %66 : vector<1x1x64xf32> to vector<1x64xf32>
      %68 = arith.index_cast %arg21 : i32 to index
      %c0_34 = arith.constant 0 : index
      %c0_35 = arith.constant 0 : index
      %69 = vector.load %arg8[%68, %c0_34, %c0_35] : memref<6x1x64xf32, #tpu.memory_space<vmem>>, vector<1x1x64xf32>
      %70 = vector.shape_cast %69 : vector<1x1x64xf32> to vector<1x64xf32>
      %71 = arith.index_cast %arg21 : i32 to index
      %c0_36 = arith.constant 0 : index
      %c0_37 = arith.constant 0 : index
      %72 = vector.load %arg9[%71, %c0_36, %c0_37] : memref<6x1x64xf32, #tpu.memory_space<vmem>>, vector<1x1x64xf32>
      %73 = vector.shape_cast %72 : vector<1x1x64xf32> to vector<1x64xf32>
      %74 = arith.index_cast %arg21 : i32 to index
      %c0_38 = arith.constant 0 : index
      %c0_39 = arith.constant 0 : index
      %75 = vector.load %arg10[%74, %c0_38, %c0_39] : memref<6x64x256xbf16, #tpu.memory_space<vmem>>, vector<1x64x256xbf16>
      %76 = vector.shape_cast %75 : vector<1x64x256xbf16> to vector<64x256xbf16>
      %77 = arith.index_cast %arg21 : i32 to index
      %c0_40 = arith.constant 0 : index
      %c0_41 = arith.constant 0 : index
      %78 = vector.load %arg11[%77, %c0_40, %c0_41] : memref<6x1x256xf32, #tpu.memory_space<vmem>>, vector<1x1x256xf32>
      %79 = vector.shape_cast %78 : vector<1x1x256xf32> to vector<1x256xf32>
      %80 = arith.index_cast %arg21 : i32 to index
      %c0_42 = arith.constant 0 : index
      %c0_43 = arith.constant 0 : index
      %81 = vector.load %arg12[%80, %c0_42, %c0_43] : memref<6x256x64xbf16, #tpu.memory_space<vmem>>, vector<1x256x64xbf16>
      %82 = vector.shape_cast %81 : vector<1x256x64xbf16> to vector<256x64xbf16>
      %83 = arith.index_cast %arg21 : i32 to index
      %c0_44 = arith.constant 0 : index
      %c0_45 = arith.constant 0 : index
      %84 = vector.load %arg13[%83, %c0_44, %c0_45] : memref<6x1x64xf32, #tpu.memory_space<vmem>>, vector<1x1x64xf32>
      %85 = vector.shape_cast %84 : vector<1x1x64xf32> to vector<1x64xf32>
      %86 = arith.index_cast %arg21 : i32 to index
      %c0_46 = arith.constant 0 : index
      %c0_47 = arith.constant 0 : index
      %87 = vector.load %arg14[%86, %c0_46, %c0_47] : memref<6x1x64xf32, #tpu.memory_space<vmem>>, vector<1x1x64xf32>
      %88 = vector.shape_cast %87 : vector<1x1x64xf32> to vector<1x64xf32>
      %89 = arith.index_cast %arg21 : i32 to index
      %c0_48 = arith.constant 0 : index
      %c0_49 = arith.constant 0 : index
      %90 = vector.load %arg15[%89, %c0_48, %c0_49] : memref<6x1x64xf32, #tpu.memory_space<vmem>>, vector<1x1x64xf32>
      %91 = vector.shape_cast %90 : vector<1x1x64xf32> to vector<1x64xf32>
      %92 = arith.truncf %arg22 : vector<48x64xf32> to vector<48x64xbf16>
      %cst_50 = arith.constant dense<0.000000e+00> : vector<48x192xf32>
      %93 = tpu.matmul %92, %58, %cst_50 {dimension_numbers = #tpu.dot_dimension_numbers<[1], [0], [0], [1], [0, 0, 1, 1], [], []>} : vector<48x64xbf16>, vector<64x192xbf16>, vector<48x192xf32> -> vector<48x192xf32>
      %94 = vector.broadcast %61 : vector<1x192xf32> to vector<48x192xf32>
      %95 = arith.addf %93, %94 : vector<48x192xf32>
      %96 = arith.truncf %95 : vector<48x192xf32> to vector<48x192xbf16>
      %97 = vector.shape_cast %96 : vector<48x192xbf16> to vector<2x24x192xbf16>
      %98 = vector.extract_strided_slice %97 {offsets = [0, 0, 0], sizes = [2, 24, 8], strides = [1, 1, 1]} : vector<2x24x192xbf16> to vector<2x24x8xbf16>
      %99 = vector.extract_strided_slice %97 {offsets = [0, 0, 8], sizes = [2, 24, 8], strides = [1, 1, 1]} : vector<2x24x192xbf16> to vector<2x24x8xbf16>
      %100 = vector.extract_strided_slice %97 {offsets = [0, 0, 16], sizes = [2, 24, 8], strides = [1, 1, 1]} : vector<2x24x192xbf16> to vector<2x24x8xbf16>
      %101 = vector.extract_strided_slice %97 {offsets = [0, 0, 24], sizes = [2, 24, 8], strides = [1, 1, 1]} : vector<2x24x192xbf16> to vector<2x24x8xbf16>
      %102 = vector.extract_strided_slice %97 {offsets = [0, 0, 32], sizes = [2, 24, 8], strides = [1, 1, 1]} : vector<2x24x192xbf16> to vector<2x24x8xbf16>
      %103 = vector.extract_strided_slice %97 {offsets = [0, 0, 40], sizes = [2, 24, 8], strides = [1, 1, 1]} : vector<2x24x192xbf16> to vector<2x24x8xbf16>
      %104 = vector.extract_strided_slice %97 {offsets = [0, 0, 48], sizes = [2, 24, 8], strides = [1, 1, 1]} : vector<2x24x192xbf16> to vector<2x24x8xbf16>
      %105 = vector.extract_strided_slice %97 {offsets = [0, 0, 56], sizes = [2, 24, 8], strides = [1, 1, 1]} : vector<2x24x192xbf16> to vector<2x24x8xbf16>
      %106 = tpu.concatenate %98, %99, %100, %101, %102, %103, %104, %105 in 0 : vector<2x24x8xbf16>, vector<2x24x8xbf16>, vector<2x24x8xbf16>, vector<2x24x8xbf16>, vector<2x24x8xbf16>, vector<2x24x8xbf16>, vector<2x24x8xbf16>, vector<2x24x8xbf16> -> vector<16x24x8xbf16>
      %107 = vector.extract_strided_slice %97 {offsets = [0, 0, 64], sizes = [2, 24, 8], strides = [1, 1, 1]} : vector<2x24x192xbf16> to vector<2x24x8xbf16>
      %108 = vector.extract_strided_slice %97 {offsets = [0, 0, 72], sizes = [2, 24, 8], strides = [1, 1, 1]} : vector<2x24x192xbf16> to vector<2x24x8xbf16>
      %109 = vector.extract_strided_slice %97 {offsets = [0, 0, 80], sizes = [2, 24, 8], strides = [1, 1, 1]} : vector<2x24x192xbf16> to vector<2x24x8xbf16>
      %110 = vector.extract_strided_slice %97 {offsets = [0, 0, 88], sizes = [2, 24, 8], strides = [1, 1, 1]} : vector<2x24x192xbf16> to vector<2x24x8xbf16>
      %111 = vector.extract_strided_slice %97 {offsets = [0, 0, 96], sizes = [2, 24, 8], strides = [1, 1, 1]} : vector<2x24x192xbf16> to vector<2x24x8xbf16>
      %112 = vector.extract_strided_slice %97 {offsets = [0, 0, 104], sizes = [2, 24, 8], strides = [1, 1, 1]} : vector<2x24x192xbf16> to vector<2x24x8xbf16>
      %113 = vector.extract_strided_slice %97 {offsets = [0, 0, 112], sizes = [2, 24, 8], strides = [1, 1, 1]} : vector<2x24x192xbf16> to vector<2x24x8xbf16>
      %114 = vector.extract_strided_slice %97 {offsets = [0, 0, 120], sizes = [2, 24, 8], strides = [1, 1, 1]} : vector<2x24x192xbf16> to vector<2x24x8xbf16>
      %115 = tpu.concatenate %107, %108, %109, %110, %111, %112, %113, %114 in 0 : vector<2x24x8xbf16>, vector<2x24x8xbf16>, vector<2x24x8xbf16>, vector<2x24x8xbf16>, vector<2x24x8xbf16>, vector<2x24x8xbf16>, vector<2x24x8xbf16>, vector<2x24x8xbf16> -> vector<16x24x8xbf16>
      %116 = vector.extract_strided_slice %97 {offsets = [0, 0, 128], sizes = [2, 24, 8], strides = [1, 1, 1]} : vector<2x24x192xbf16> to vector<2x24x8xbf16>
      %117 = vector.extract_strided_slice %97 {offsets = [0, 0, 136], sizes = [2, 24, 8], strides = [1, 1, 1]} : vector<2x24x192xbf16> to vector<2x24x8xbf16>
      %118 = vector.extract_strided_slice %97 {offsets = [0, 0, 144], sizes = [2, 24, 8], strides = [1, 1, 1]} : vector<2x24x192xbf16> to vector<2x24x8xbf16>
      %119 = vector.extract_strided_slice %97 {offsets = [0, 0, 152], sizes = [2, 24, 8], strides = [1, 1, 1]} : vector<2x24x192xbf16> to vector<2x24x8xbf16>
      %120 = vector.extract_strided_slice %97 {offsets = [0, 0, 160], sizes = [2, 24, 8], strides = [1, 1, 1]} : vector<2x24x192xbf16> to vector<2x24x8xbf16>
      %121 = vector.extract_strided_slice %97 {offsets = [0, 0, 168], sizes = [2, 24, 8], strides = [1, 1, 1]} : vector<2x24x192xbf16> to vector<2x24x8xbf16>
      %122 = vector.extract_strided_slice %97 {offsets = [0, 0, 176], sizes = [2, 24, 8], strides = [1, 1, 1]} : vector<2x24x192xbf16> to vector<2x24x8xbf16>
      %123 = vector.extract_strided_slice %97 {offsets = [0, 0, 184], sizes = [2, 24, 8], strides = [1, 1, 1]} : vector<2x24x192xbf16> to vector<2x24x8xbf16>
      %124 = tpu.concatenate %116, %117, %118, %119, %120, %121, %122, %123 in 0 : vector<2x24x8xbf16>, vector<2x24x8xbf16>, vector<2x24x8xbf16>, vector<2x24x8xbf16>, vector<2x24x8xbf16>, vector<2x24x8xbf16>, vector<2x24x8xbf16>, vector<2x24x8xbf16> -> vector<16x24x8xbf16>
      "tpu.trace_start"() <{level = 10 : i32, message = "bqd,bkd->bqk"}> : () -> ()
      %cst_51 = arith.constant dense<0.000000e+00> : vector<16x24x24xf32>
      %125 = tpu.matmul %106, %115, %cst_51 {dimension_numbers = #tpu.dot_dimension_numbers<[2], [2], [1], [1], [0, 0, 0, 1, 1, 1], [0], [0]>} : vector<16x24x8xbf16>, vector<16x24x8xbf16>, vector<16x24x24xf32> -> vector<16x24x24xf32>
      "tpu.trace_stop"() : () -> ()
      %126 = arith.addf %125, %19 : vector<16x24x24xf32>
      %cst_52 = arith.constant dense<0xFF800000> : vector<16x24xf32>
      %127 = vector.multi_reduction <maximumf>, %126, %cst_52 [2] : vector<16x24x24xf32> to vector<16x24xf32>
      %128 = vector.shape_cast %127 : vector<16x24xf32> to vector<16x24x1xf32>
      %129 = vector.broadcast %128 : vector<16x24x1xf32> to vector<16x24x24xf32>
      %130 = arith.subf %126, %129 : vector<16x24x24xf32>
      %131 = math.exp %130 : vector<16x24x24xf32>
      %cst_53 = arith.constant dense<0.000000e+00> : vector<16x24xf32>
      %132 = vector.multi_reduction <add>, %131, %cst_53 [2] : vector<16x24x24xf32> to vector<16x24xf32>
      %133 = vector.shape_cast %132 : vector<16x24xf32> to vector<16x24x1xf32>
      %134 = tpu.reciprocal %133 {approx = true} : vector<16x24x1xf32> -> vector<16x24x1xf32>
      %135 = vector.broadcast %134 : vector<16x24x1xf32> to vector<16x24x24xf32>
      %136 = arith.mulf %131, %135 : vector<16x24x24xf32>
      %137 = arith.truncf %136 : vector<16x24x24xf32> to vector<16x24x24xbf16>
      "tpu.trace_start"() <{level = 10 : i32, message = "bqk,bkd->bqd"}> : () -> ()
      %cst_54 = arith.constant dense<0.000000e+00> : vector<16x24x8xf32>
      %138 = tpu.matmul %137, %124, %cst_54 {dimension_numbers = #tpu.dot_dimension_numbers<[2], [1], [1], [2], [0, 0, 0, 1, 1, 2], [0], [0]>} : vector<16x24x24xbf16>, vector<16x24x8xbf16>, vector<16x24x8xf32> -> vector<16x24x8xf32>
      "tpu.trace_stop"() : () -> ()
      %139 = vector.extract_strided_slice %138 {offsets = [0, 0, 0], sizes = [2, 24, 8], strides = [1, 1, 1]} : vector<16x24x8xf32> to vector<2x24x8xf32>
      %140 = vector.extract_strided_slice %138 {offsets = [2, 0, 0], sizes = [2, 24, 8], strides = [1, 1, 1]} : vector<16x24x8xf32> to vector<2x24x8xf32>
      %141 = vector.extract_strided_slice %138 {offsets = [4, 0, 0], sizes = [2, 24, 8], strides = [1, 1, 1]} : vector<16x24x8xf32> to vector<2x24x8xf32>
      %142 = vector.extract_strided_slice %138 {offsets = [6, 0, 0], sizes = [2, 24, 8], strides = [1, 1, 1]} : vector<16x24x8xf32> to vector<2x24x8xf32>
      %143 = vector.extract_strided_slice %138 {offsets = [8, 0, 0], sizes = [2, 24, 8], strides = [1, 1, 1]} : vector<16x24x8xf32> to vector<2x24x8xf32>
      %144 = vector.extract_strided_slice %138 {offsets = [10, 0, 0], sizes = [2, 24, 8], strides = [1, 1, 1]} : vector<16x24x8xf32> to vector<2x24x8xf32>
      %145 = vector.extract_strided_slice %138 {offsets = [12, 0, 0], sizes = [2, 24, 8], strides = [1, 1, 1]} : vector<16x24x8xf32> to vector<2x24x8xf32>
      %146 = vector.extract_strided_slice %138 {offsets = [14, 0, 0], sizes = [2, 24, 8], strides = [1, 1, 1]} : vector<16x24x8xf32> to vector<2x24x8xf32>
      %147 = tpu.concatenate %139, %140, %141, %142, %143, %144, %145, %146 in 2 : vector<2x24x8xf32>, vector<2x24x8xf32>, vector<2x24x8xf32>, vector<2x24x8xf32>, vector<2x24x8xf32>, vector<2x24x8xf32>, vector<2x24x8xf32>, vector<2x24x8xf32> -> vector<2x24x64xf32>
      %148 = vector.shape_cast %147 : vector<2x24x64xf32> to vector<48x64xf32>
      %149 = arith.truncf %148 : vector<48x64xf32> to vector<48x64xbf16>
      %cst_55 = arith.constant dense<0.000000e+00> : vector<48x64xf32>
      %150 = tpu.matmul %149, %64, %cst_55 {dimension_numbers = #tpu.dot_dimension_numbers<[1], [0], [0], [1], [0, 0, 1, 1], [], []>} : vector<48x64xbf16>, vector<64x64xbf16>, vector<48x64xf32> -> vector<48x64xf32>
      %151 = vector.broadcast %67 : vector<1x64xf32> to vector<48x64xf32>
      %152 = arith.addf %150, %151 : vector<48x64xf32>
      %153 = arith.addf %arg22, %152 : vector<48x64xf32>
      %cst_56 = arith.constant dense<0.000000e+00> : vector<48xf32>
      %154 = vector.multi_reduction <add>, %153, %cst_56 [1] : vector<48x64xf32> to vector<48xf32>
      %155 = vector.shape_cast %154 : vector<48xf32> to vector<48x1xf32>
      %cst_57 = arith.constant 6.400000e+01 : f32
      %156 = vector.broadcast %cst_57 : f32 to vector<48x1xf32>
      %157 = arith.divf %155, %156 : vector<48x1xf32>
      %158 = vector.broadcast %157 : vector<48x1xf32> to vector<48x64xf32>
      %159 = arith.subf %153, %158 : vector<48x64xf32>
      %160 = arith.mulf %159, %159 : vector<48x64xf32>
      %cst_58 = arith.constant dense<0.000000e+00> : vector<48xf32>
      %161 = vector.multi_reduction <add>, %160, %cst_58 [1] : vector<48x64xf32> to vector<48xf32>
      %162 = vector.shape_cast %161 : vector<48xf32> to vector<48x1xf32>
      %cst_59 = arith.constant 6.400000e+01 : f32
      %163 = vector.broadcast %cst_59 : f32 to vector<48x1xf32>
      %164 = arith.divf %162, %163 : vector<48x1xf32>
      %165 = vector.broadcast %157 : vector<48x1xf32> to vector<48x64xf32>
      %166 = arith.subf %153, %165 : vector<48x64xf32>
      %cst_60 = arith.constant 9.99999974E-6 : f32
      %167 = vector.broadcast %cst_60 : f32 to vector<48x1xf32>
      %168 = arith.addf %164, %167 : vector<48x1xf32>
      %169 = math.rsqrt %168 : vector<48x1xf32>
      %170 = vector.broadcast %169 : vector<48x1xf32> to vector<48x64xf32>
      %171 = arith.mulf %166, %170 : vector<48x64xf32>
      %172 = vector.broadcast %70 : vector<1x64xf32> to vector<48x64xf32>
      %173 = arith.mulf %171, %172 : vector<48x64xf32>
      %174 = vector.broadcast %73 : vector<1x64xf32> to vector<48x64xf32>
      %175 = arith.addf %173, %174 : vector<48x64xf32>
      %176 = arith.truncf %175 : vector<48x64xf32> to vector<48x64xbf16>
      %cst_61 = arith.constant dense<0.000000e+00> : vector<48x256xf32>
      %177 = tpu.matmul %176, %76, %cst_61 {dimension_numbers = #tpu.dot_dimension_numbers<[1], [0], [0], [1], [0, 0, 1, 1], [], []>} : vector<48x64xbf16>, vector<64x256xbf16>, vector<48x256xf32> -> vector<48x256xf32>
      %178 = vector.broadcast %79 : vector<1x256xf32> to vector<48x256xf32>
      %179 = arith.addf %177, %178 : vector<48x256xf32>
      %cst_62 = arith.constant 0.000000e+00 : f32
      %180 = vector.broadcast %cst_62 : f32 to vector<48x256xf32>
      %181 = arith.maximumf %179, %180 : vector<48x256xf32>
      %182 = arith.truncf %181 : vector<48x256xf32> to vector<48x256xbf16>
      %cst_63 = arith.constant dense<0.000000e+00> : vector<48x64xf32>
      %183 = tpu.matmul %182, %82, %cst_63 {dimension_numbers = #tpu.dot_dimension_numbers<[1], [0], [0], [1], [0, 0, 1, 1], [], []>} : vector<48x256xbf16>, vector<256x64xbf16>, vector<48x64xf32> -> vector<48x64xf32>
      %184 = vector.broadcast %85 : vector<1x64xf32> to vector<48x64xf32>
      %185 = arith.addf %183, %184 : vector<48x64xf32>
      %186 = arith.addf %175, %185 : vector<48x64xf32>
      %cst_64 = arith.constant dense<0.000000e+00> : vector<48xf32>
      %187 = vector.multi_reduction <add>, %186, %cst_64 [1] : vector<48x64xf32> to vector<48xf32>
      %188 = vector.shape_cast %187 : vector<48xf32> to vector<48x1xf32>
      %cst_65 = arith.constant 6.400000e+01 : f32
      %189 = vector.broadcast %cst_65 : f32 to vector<48x1xf32>
      %190 = arith.divf %188, %189 : vector<48x1xf32>
      %191 = vector.broadcast %190 : vector<48x1xf32> to vector<48x64xf32>
      %192 = arith.subf %186, %191 : vector<48x64xf32>
      %193 = arith.mulf %192, %192 : vector<48x64xf32>
      %cst_66 = arith.constant dense<0.000000e+00> : vector<48xf32>
      %194 = vector.multi_reduction <add>, %193, %cst_66 [1] : vector<48x64xf32> to vector<48xf32>
      %195 = vector.shape_cast %194 : vector<48xf32> to vector<48x1xf32>
      %cst_67 = arith.constant 6.400000e+01 : f32
      %196 = vector.broadcast %cst_67 : f32 to vector<48x1xf32>
      %197 = arith.divf %195, %196 : vector<48x1xf32>
      %198 = vector.broadcast %190 : vector<48x1xf32> to vector<48x64xf32>
      %199 = arith.subf %186, %198 : vector<48x64xf32>
      %cst_68 = arith.constant 9.99999974E-6 : f32
      %200 = vector.broadcast %cst_68 : f32 to vector<48x1xf32>
      %201 = arith.addf %197, %200 : vector<48x1xf32>
      %202 = math.rsqrt %201 : vector<48x1xf32>
      %203 = vector.broadcast %202 : vector<48x1xf32> to vector<48x64xf32>
      %204 = arith.mulf %199, %203 : vector<48x64xf32>
      %205 = vector.broadcast %88 : vector<1x64xf32> to vector<48x64xf32>
      %206 = arith.mulf %204, %205 : vector<48x64xf32>
      %207 = vector.broadcast %91 : vector<1x64xf32> to vector<48x64xf32>
      %208 = arith.addf %206, %207 : vector<48x64xf32>
      scf.yield %208 : vector<48x64xf32>
    }
    %c6_i32_8 = arith.constant 6 : i32
    %22 = vector.shape_cast %21 : vector<48x64xf32> to vector<2x24x64xf32>
    %23 = vector.extract_strided_slice %22 {offsets = [0, 0, 0], sizes = [2, 1, 64], strides = [1, 1, 1]} : vector<2x24x64xf32> to vector<2x1x64xf32>
    %24 = vector.shape_cast %23 : vector<2x1x64xf32> to vector<2x64xf32>
    %c0_9 = arith.constant 0 : index
    %c0_10 = arith.constant 0 : index
    %25 = vector.load %arg16[%c0_9, %c0_10] : memref<1x64xf32, #tpu.memory_space<vmem>>, vector<1x64xf32>
    %c0_11 = arith.constant 0 : index
    %c0_12 = arith.constant 0 : index
    %26 = vector.load %arg17[%c0_11, %c0_12] : memref<1x64xf32, #tpu.memory_space<vmem>>, vector<1x64xf32>
    %cst_13 = arith.constant dense<0.000000e+00> : vector<2xf32>
    %27 = vector.multi_reduction <add>, %24, %cst_13 [1] : vector<2x64xf32> to vector<2xf32>
    %28 = vector.shape_cast %27 : vector<2xf32> to vector<2x1xf32>
    %cst_14 = arith.constant 6.400000e+01 : f32
    %29 = vector.broadcast %cst_14 : f32 to vector<2x1xf32>
    %30 = arith.divf %28, %29 : vector<2x1xf32>
    %31 = vector.broadcast %30 : vector<2x1xf32> to vector<2x64xf32>
    %32 = arith.subf %24, %31 : vector<2x64xf32>
    %33 = arith.mulf %32, %32 : vector<2x64xf32>
    %cst_15 = arith.constant dense<0.000000e+00> : vector<2xf32>
    %34 = vector.multi_reduction <add>, %33, %cst_15 [1] : vector<2x64xf32> to vector<2xf32>
    %35 = vector.shape_cast %34 : vector<2xf32> to vector<2x1xf32>
    %cst_16 = arith.constant 6.400000e+01 : f32
    %36 = vector.broadcast %cst_16 : f32 to vector<2x1xf32>
    %37 = arith.divf %35, %36 : vector<2x1xf32>
    %38 = vector.broadcast %30 : vector<2x1xf32> to vector<2x64xf32>
    %39 = arith.subf %24, %38 : vector<2x64xf32>
    %cst_17 = arith.constant 9.99999974E-6 : f32
    %40 = vector.broadcast %cst_17 : f32 to vector<2x1xf32>
    %41 = arith.addf %37, %40 : vector<2x1xf32>
    %42 = math.rsqrt %41 : vector<2x1xf32>
    %43 = vector.broadcast %42 : vector<2x1xf32> to vector<2x64xf32>
    %44 = arith.mulf %39, %43 : vector<2x64xf32>
    %45 = vector.broadcast %25 : vector<1x64xf32> to vector<2x64xf32>
    %46 = arith.mulf %44, %45 : vector<2x64xf32>
    %47 = vector.broadcast %26 : vector<1x64xf32> to vector<2x64xf32>
    %48 = arith.addf %46, %47 : vector<2x64xf32>
    %c0_18 = arith.constant 0 : index
    %c0_19 = arith.constant 0 : index
    %49 = vector.load %arg18[%c0_18, %c0_19] : memref<64x10xf32, #tpu.memory_space<vmem>>, vector<64x10xf32>
    %cst_20 = arith.constant dense<0.000000e+00> : vector<2x10xf32>
    %50 = tpu.matmul %48, %49, %cst_20 {dimension_numbers = #tpu.dot_dimension_numbers<[1], [0], [0], [1], [0, 0, 1, 1], [], []>} : vector<2x64xf32>, vector<64x10xf32>, vector<2x10xf32> -> vector<2x10xf32>
    %c0_21 = arith.constant 0 : index
    %c0_22 = arith.constant 0 : index
    %51 = vector.load %arg19[%c0_21, %c0_22] : memref<1x10xf32, #tpu.memory_space<vmem>>, vector<1x10xf32>
    %52 = vector.broadcast %51 : vector<1x10xf32> to vector<2x10xf32>
    %53 = arith.addf %50, %52 : vector<2x10xf32>
    %54 = vector.shape_cast %53 : vector<2x10xf32> to vector<2x1x10xf32>
    %c0_23 = arith.constant 0 : index
    %c0_24 = arith.constant 0 : index
    %c0_25 = arith.constant 0 : index
    %55 = vector.load %arg20[%c0_23, %c0_24, %c0_25] : memref<2x1x10xf32, #tpu.memory_space<vmem>>, vector<2x1x10xf32>
    tpu.vector_store %arg20[%c0_23, %c0_24, %c0_25], %54 {strides = array<i32>} : memref<2x1x10xf32, #tpu.memory_space<vmem>>, vector<2x1x10xf32>,
    return
  }
  func.func @transform_0(%arg0: i32) -> (i32, i32, i32) {
    %c0_i32 = arith.constant 0 : i32
    %c0_i32_0 = arith.constant 0 : i32
    %c0_i32_1 = arith.constant 0 : i32
    return %arg0, %c0_i32, %c0_i32_0 : i32, i32, i32
  }
  func.func @transform_1(%arg0: i32) -> (i32, i32) {
    %c0_i32 = arith.constant 0 : i32
    %c0_i32_0 = arith.constant 0 : i32
    %c0_i32_1 = arith.constant 0 : i32
    return %c0_i32, %c0_i32_0 : i32, i32
  }
  func.func @transform_2(%arg0: i32) -> (i32, i32) {
    %c0_i32 = arith.constant 0 : i32
    %c0_i32_0 = arith.constant 0 : i32
    %c0_i32_1 = arith.constant 0 : i32
    return %c0_i32, %c0_i32_0 : i32, i32
  }
  func.func @transform_3(%arg0: i32) -> (i32, i32, i32) {
    %c0_i32 = arith.constant 0 : i32
    %c0_i32_0 = arith.constant 0 : i32
    %c0_i32_1 = arith.constant 0 : i32
    %c0_i32_2 = arith.constant 0 : i32
    return %c0_i32, %c0_i32_0, %c0_i32_1 : i32, i32, i32
  }
  func.func @transform_4(%arg0: i32) -> (i32, i32, i32) {
    %c0_i32 = arith.constant 0 : i32
    %c0_i32_0 = arith.constant 0 : i32
    %c0_i32_1 = arith.constant 0 : i32
    %c0_i32_2 = arith.constant 0 : i32
    return %c0_i32, %c0_i32_0, %c0_i32_1 : i32, i32, i32
  }
  func.func @transform_5(%arg0: i32) -> (i32, i32, i32) {
    %c0_i32 = arith.constant 0 : i32
    %c0_i32_0 = arith.constant 0 : i32
    %c0_i32_1 = arith.constant 0 : i32
    %c0_i32_2 = arith.constant 0 : i32
    return %c0_i32, %c0_i32_0, %c0_i32_1 : i32, i32, i32
  }
  func.func @transform_6(%arg0: i32) -> (i32, i32, i32) {
    %c0_i32 = arith.constant 0 : i32
    %c0_i32_0 = arith.constant 0 : i32
    %c0_i32_1 = arith.constant 0 : i32
    %c0_i32_2 = arith.constant 0 : i32
    return %c0_i32, %c0_i32_0, %c0_i32_1 : i32, i32, i32
  }
  func.func @transform_7(%arg0: i32) -> (i32, i32, i32) {
    %c0_i32 = arith.constant 0 : i32
    %c0_i32_0 = arith.constant 0 : i32
    %c0_i32_1 = arith.constant 0 : i32
    %c0_i32_2 = arith.constant 0 : i32
    return %c0_i32, %c0_i32_0, %c0_i32_1 : i32, i32, i32
  }
  func.func @transform_8(%arg0: i32) -> (i32, i32, i32) {
    %c0_i32 = arith.constant 0 : i32
    %c0_i32_0 = arith.constant 0 : i32
    %c0_i32_1 = arith.constant 0 : i32
    %c0_i32_2 = arith.constant 0 : i32
    return %c0_i32, %c0_i32_0, %c0_i32_1 : i32, i32, i32
  }
  func.func @transform_9(%arg0: i32) -> (i32, i32, i32) {
    %c0_i32 = arith.constant 0 : i32
    %c0_i32_0 = arith.constant 0 : i32
    %c0_i32_1 = arith.constant 0 : i32
    %c0_i32_2 = arith.constant 0 : i32
    return %c0_i32, %c0_i32_0, %c0_i32_1 : i32, i32, i32
  }
  func.func @transform_10(%arg0: i32) -> (i32, i32, i32) {
    %c0_i32 = arith.constant 0 : i32
    %c0_i32_0 = arith.constant 0 : i32
    %c0_i32_1 = arith.constant 0 : i32
    %c0_i32_2 = arith.constant 0 : i32
    return %c0_i32, %c0_i32_0, %c0_i32_1 : i32, i32, i32
  }
  func.func @transform_11(%arg0: i32) -> (i32, i32, i32) {
    %c0_i32 = arith.constant 0 : i32
    %c0_i32_0 = arith.constant 0 : i32
    %c0_i32_1 = arith.constant 0 : i32
    %c0_i32_2 = arith.constant 0 : i32
    return %c0_i32, %c0_i32_0, %c0_i32_1 : i32, i32, i32
  }
  func.func @transform_12(%arg0: i32) -> (i32, i32, i32) {
    %c0_i32 = arith.constant 0 : i32
    %c0_i32_0 = arith.constant 0 : i32
    %c0_i32_1 = arith.constant 0 : i32
    %c0_i32_2 = arith.constant 0 : i32
    return %c0_i32, %c0_i32_0, %c0_i32_1 : i32, i32, i32
  }
  func.func @transform_13(%arg0: i32) -> (i32, i32, i32) {
    %c0_i32 = arith.constant 0 : i32
    %c0_i32_0 = arith.constant 0 : i32
    %c0_i32_1 = arith.constant 0 : i32
    %c0_i32_2 = arith.constant 0 : i32
    return %c0_i32, %c0_i32_0, %c0_i32_1 : i32, i32, i32
  }
  func.func @transform_14(%arg0: i32) -> (i32, i32, i32) {
    %c0_i32 = arith.constant 0 : i32
    %c0_i32_0 = arith.constant 0 : i32
    %c0_i32_1 = arith.constant 0 : i32
    %c0_i32_2 = arith.constant 0 : i32
    return %c0_i32, %c0_i32_0, %c0_i32_1 : i32, i32, i32
  }
  func.func @transform_15(%arg0: i32) -> (i32, i32) {
    %c0_i32 = arith.constant 0 : i32
    %c0_i32_0 = arith.constant 0 : i32
    %c0_i32_1 = arith.constant 0 : i32
    return %c0_i32, %c0_i32_0 : i32, i32
  }
  func.func @transform_16(%arg0: i32) -> (i32, i32) {
    %c0_i32 = arith.constant 0 : i32
    %c0_i32_0 = arith.constant 0 : i32
    %c0_i32_1 = arith.constant 0 : i32
    return %c0_i32, %c0_i32_0 : i32, i32
  }
  func.func @transform_17(%arg0: i32) -> (i32, i32) {
    %c0_i32 = arith.constant 0 : i32
    %c0_i32_0 = arith.constant 0 : i32
    %c0_i32_1 = arith.constant 0 : i32
    return %c0_i32, %c0_i32_0 : i32, i32
  }
  func.func @transform_18(%arg0: i32) -> (i32, i32) {
    %c0_i32 = arith.constant 0 : i32
    %c0_i32_0 = arith.constant 0 : i32
    %c0_i32_1 = arith.constant 0 : i32
    return %c0_i32, %c0_i32_0 : i32, i32
  }
  func.func @transform_19(%arg0: i32) -> (i32, i32, i32) {
    %c0_i32 = arith.constant 0 : i32
    %c0_i32_0 = arith.constant 0 : i32
    %c0_i32_1 = arith.constant 0 : i32
    return %arg0, %c0_i32, %c0_i32_0 : i32, i32, i32
  }
}

</mosaic_0001>

<bundles_post_ra>
// kernel: _lambda_.1
= control target key start
LH: loop header
LB: loop body
LE: loop exit
PB: predicated region body
PF: predicated region fallthrough
CT: control target
= control target key end

     0   :  { %s6200_s0 = inlined_call_operand.vmem [shape: f32[2,24,64], index: 0, kind: input, shape index: {}]   ;;  %s6201_s1 = inlined_call_operand.vmem [shape: f32[24,64], index: 1, kind: input, shape index: {}]   ;;  %s6202_s2 = inlined_call_operand.vmem [shape: bf16[64,64], index: 2, kind: input, shape index: {}]   ;;  %s6203_s3 = inlined_call_operand.vmem [shape: bf16[6,64,192], index: 3, kind: input, shape index: {}]   ;;  %s6204_s4 = inlined_call_operand.vmem [shape: f32[6,1,192], index: 4, kind: input, shape index: {}]   ;;  %s6205_s5 = inlined_call_operand.hbm [shape: bf16[6,64,64], index: 5, kind: input, shape index: {}]   ;;  %s6206_s6 = inlined_call_operand.vmem [shape: f32[6,1,64], index: 6, kind: input, shape index: {}, may-alias: {6,8,12,14}]   ;;  %s6207_s7 = inlined_call_operand.vmem [shape: f32[6,1,64], index: 7, kind: input, shape index: {}, may-alias: {7,13}]   ;;  %s6208_s8 = inlined_call_operand.vmem [shape: f32[6,1,64], index: 8, kind: input, shape index: {}, may-alias: {6,8,12,14}]   ;;  %s6209_s9 = inlined_call_operand.hbm [shape: bf16[6,64,256], index: 9, kind: input, shape index: {}]   ;;  %s6210_s10 = inlined_call_operand.vmem [shape: f32[6,1,256], index: 10, kind: input, shape index: {}]   ;;  %s6211_s11 = inlined_call_operand.vmem [shape: bf16[6,256,64], index: 11, kind: input, shape index: {}]   ;;  %s6212_s12 = inlined_call_operand.vmem [shape: f32[6,1,64], index: 12, kind: input, shape index: {}, may-alias: {6,8,12,14}]   ;;  %s6213_s13 = inlined_call_operand.vmem [shape: f32[6,1,64], index: 13, kind: input, shape index: {}, may-alias: {7,13}]   ;;  %s6214_s14 = inlined_call_operand.vmem [shape: f32[6,1,64], index: 14, kind: input, shape index: {}, may-alias: {6,8,12,14}]   ;;  %s6215_s15 = inlined_call_operand.vmem [shape: f32[1,64], index: 15, kind: input, shape index: {}]   ;;  %s6216_s16 = inlined_call_operand.vmem [shape: f32[1,64], index: 16, kind: input, shape index: {}]   ;;  %s6217_s17 = inlined_call_operand.vmem [shape: f32[64,10], index: 17, kind: input, shape index: {}]   ;;  %s6218_s18 = inlined_call_operand.vmem [shape: f32[1,10], index: 18, kind: input, shape index: {}]   ;;  %s6219_s19 = inlined_call_operand.hbm [shape: f32[2,1,10], index: 19, kind: output, shape index: {}]  }
   0x1   :  { %6253 = sst [smem:[#allocation42_spill]] %s6200_s0 }
   0x2   :  { %6254 = sst [smem:[#allocation43_spill]] %s6201_s1 }
   0x3   :  { %6255 = sst [smem:[#allocation44_spill]] %s6202_s2 }
   0x4   :  { %6256 = sst [smem:[#allocation45_spill]] %s6203_s3 }
   0x5   :  { %24 = vsyncpa [#allocation3], 0 }
   0x6   :  { %25 = vsyncpa [#allocation6], 0 }
   0x7   :  { %26 = vsyncpa [#allocation4], 0  ;;  %s41_s20 = sshll.u32 %s6205_s5, 4  ;;  %s4281_s21 = smov [#allocation2]   ;;  %s42_s20 = int_to_ptr.hbm [resolvable:$true] %s41_s20 }
   0x8   :  { %s43_s1 = sshll.u32 %s4281_s21, 4  ;;  %s60_s23 = sshll.u32 %s6209_s9, 4  ;;  %s44_s1 = int_to_ptr.vmem [resolvable:$true] %s43_s1  ;;  %s61_s23 = int_to_ptr.hbm [resolvable:$true] %s60_s23 }
   0x9   :  { %s4282_s24 = smov 64   ;;  %s4283_s25 = smov 4  }
   0xa   :  { %49 = dma.hbm_to_vmem [thread:$0]  %s42_s20, 3072, %s44_s1, [#allocation3], %s4282_s24, %s4282_s24, %s4283_s25  }
   0xb   :  { %s4284_s3 = smov [#allocation5]   ;;  %s4285_s27 = smov 128  }
   0xc   :  { %s62_s26 = sshll.u32 %s4284_s3, 4  ;;  %s4286_s28 = smov 8   ;;  %s63_s26 = int_to_ptr.vmem [resolvable:$true] %s62_s26 }
   0xd   :  { %68 = dma.hbm_to_vmem [thread:$0]  %s61_s23, 6144, %s63_s26, [#allocation6], %s4285_s27, %s4285_s27, %s4286_s28  }
   0xe   :  { %4247 = dma.done.wait [#allocation3], 3072  }
   0xf   :  { %4248 = vsyncadd [#allocation3], 4294964224 }
  0x10   :  { %4249 = dma.done.wait [#allocation6], 6144  }
  0x11   :  { %4250 = vsyncadd [#allocation6], 4294961152  ;;  %s6257_s0 = sld [smem:[#allocation44_spill]]  ;;  %vm137_vm0 = vcmask 523264   ;;  %v180_v13 = vlaneseq  ;;  %v4287_v15 = vmov -1e+30  }
  0x12   :  { %s6258_s24 = sld [smem:[#allocation42_spill]]  ;;  %s4469_s25 = smov 0  }
  0x13   :  { %v181_v14 = vand.u32 127, %v180_v13  ;;  %s6259_s1 = sld [smem:[#allocation43_spill]] }
  0x15   :  { %vm182_vm1 = vcmp.lt.s32.totalorder %v181_v14, 17 }
  0x16   :  { %v4446_v16 = vsel %vm182_vm1, 0.0, %v4287_v15 }
  0x17   :  { %v3678_v0 = vld [vmem:[%s6257_s0 + $0x18] sm:$0xff]  ;;  %v3677_v1 = vld [vmem:[%s6257_s0 + $0x10] sm:$0xff]  ;;  %v3676_v2 = vld [vmem:[%s6257_s0 + $0x8] sm:$0xff] }
  0x18   :  { %151 = vmatpush.bf16.msra.mxu0 %v3678_v0  ;;  %3719 = vmatpush.bf16.msra.mxu1 %v3678_v0  ;;  %v3675_v3 = vld [vmem:[%s6257_s0] sm:$0xff]  ;;  %v97_v5 = vld [vmem:[%s6258_s24 + $0x8] sm:$0xff]  ;;  %v98_v6 = vld [vmem:[%s6258_s24 + $0x10] sm:$0xff] }
  0x19   :  { %3720 = vmatpush.bf16.msra.mxu2 %v3678_v0  ;;  %v96_v4 = vld [vmem:[%s6258_s24] sm:$0xff]  ;;  %v99_v7 = vld [vmem:[%s6258_s24 + $0x18] sm:$0xff]  ;;  %v101_v9 = vld [vmem:[%s6258_s24 + $0x28] sm:$0xff] }
  0x1a   :  { %v100_v8 = vld [vmem:[%s6258_s24 + $0x20] sm:$0xff]  ;;  %v102_v10 = vpack.c.bf16 %v97_v5, %v96_v4  ;;  %v103_v11 = vpack.c.bf16 %v99_v7, %v98_v6  ;;  %v173_v18 = vld [vmem:[%s6259_s1 + $0x10] sm:$0xff]  ;;  %v172_v23 = vld [vmem:[%s6259_s1 + $0x8] sm:$0xff] }
  0x1b   :  { %v104_v12 = vpack.c.bf16 %v101_v9, %v100_v8  ;;  %v171_v17 = vld [vmem:[%s6259_s1] sm:$0xff] }
  0x1c   :  { %152 = vmatpush.bf16.msra.mxu0 %v3677_v1  ;;  %3721 = vmatpush.bf16.msra.mxu1 %v3677_v1 }
  0x1d   :  { %3722 = vmatpush.bf16.msra.mxu2 %v3677_v1 }
  0x20   :  { %153 = vmatpush.bf16.msra.mxu0 %v3676_v2  ;;  %3723 = vmatpush.bf16.msra.mxu1 %v3676_v2 }
  0x21   :  { %3724 = vmatpush.bf16.msra.mxu2 %v3676_v2 }
  0x24   :  { %154 = vmatpush.bf16.msra.mxu0 %v3675_v3  ;;  %3725 = vmatpush.bf16.msra.mxu1 %v3675_v3 }
  0x25   :  { %3726 = vmatpush.bf16.msra.mxu2 %v3675_v3 }
  0x27   :  { %3440 = vmatmul.msk.bf16.vlgmr.msra.gmra.mxu0 %vm137_vm0, %v102_v10  ;;  %3441 = vmatmul.msk.bf16.vlgmr.msra.gmra.mxu1 %vm137_vm0, %v103_v11 }
  0x28   :  { %3442 = vmatmul.msk.bf16.vlgmr.msra.gmra.mxu2 %vm137_vm0, %v104_v12 }
  0xa4   :  { %v156_v19 = vpop.f32.mrf.mxu0  ;;  %v161_v20 = vpop.f32.mrf.mxu1 }
  0xa5   :  { %v174_v21 = vadd.f32 %v171_v17, %v156_v19   ;;  %v176_v22 = vadd.f32 %v173_v18, %v161_v20  }
  0xab   :  { %v166_v24 = vpop.f32.mrf.mxu2 }
  0xac   :  { %v178_v25 = vadd.f32 %v172_v23, %v166_v24   ;;  %v158_v26 = vpop.f32.mrf.mxu0  ;;  %v163_v27 = vpop.f32.mrf.mxu1 }
  0xad   :  { %v175_v28 = vadd.f32 %v172_v23, %v158_v26   ;;  %v177_v29 = vadd.f32 %v171_v17, %v163_v27  }
  0xb3   :  { %v168_v30 = vpop.f32.mrf.mxu2 }
  0xb4   :  { %v179_v31 = vadd.f32 %v173_v18, %v168_v30  }
  0xb5 LB: > { %6260 = vst [vmem:[#allocation11_spill] sm:$0xff] %v4255_v31  ;;  %s3679_s3 = sshll.u32 %s4279_s25, 6  ;;  %s6266_s28 = sld [smem:[#allocation45_spill]]  ;;  %v281_v49 = vpack.c.bf16 %v4263_v29, %v4267_v22  ;;  %v280_v50 = vpack.c.bf16 %v4271_v28, %v4275_v21  ;;  %v282_v58 = vpack.c.bf16 %v4255_v31, %v4259_v25  ;;  %vm538_vm2 = vcmask 64512   ;;  %s4279_s25 = sphi %s4469_s25, %s189_s25   ;;  %v4275_v21 = vphi %v174_v21, %v6325_v21   ;;  %v4271_v28 = vphi %v175_v28, %v6121_v28   ;;  %v4267_v22 = vphi %v176_v22, %v3251_v22   ;;  %v4263_v29 = vphi %v177_v29, %v6324_v29   ;;  %v4259_v25 = vphi %v178_v25, %v3253_v25   ;;  %v4255_v31 = vphi %v179_v31, %v3254_v31  }
  0xb6   : > { %6261 = vst [vmem:[#allocation12_spill] sm:$0xff] %v4259_v25  ;;  %s3445_s29 = sshll.u32 %s4279_s25, 1  ;;  %s4288_s20 = smov 104   ;;  %vm1751_vm3 = vcmask 1043456   ;;  %vm1154_vm4 = vcmask 195584   ;;  %vm2562_vm5 = vcmask 130048  }
  0xb7   : > { %6262 = vst [vmem:[#allocation13_spill] sm:$0xff] %v4263_v29  ;;  %s208_s30 = scalar_lea.vmem %s6204_s4, %s3445_s29  ;;  %s4289_s21 = smov 120   ;;  %vm2575_vm6 = vcmask 261120   ;;  %vm2582_vm7 = vcmask 326656   ;;  %vm2589_vm8 = vcmask 392192   ;;  %vm2596_vm9 = vcmask 457728  }
  0xb8   : > { %6263 = vst [vmem:[#allocation14_spill] sm:$0xff] %v4267_v22  ;;  %v209_v63 = vld [vmem:[%s208_s30] sm:$0x3]  ;;  %s4290_s1 = smov 96   ;;  %s4291_s22 = smov 112  }
  0xb9   : > { %6264 = vst [vmem:[#allocation15_spill] sm:$0xff] %v4271_v28  ;;  %v284_v1 = vperm.slane %v209_v63, 0  ;;  %v285_v2 = vperm.slane %v209_v63, 1  ;;  %s4292_s2 = smov 88   ;;  %s4293_s23 = smov 64  }
  0xba   : > { %6265 = vst [vmem:[#allocation16_spill] sm:$0xff] %v4275_v21  ;;  %s4294_s24 = smov 72   ;;  %s4295_s26 = smov 80  }
  0xbb   : > { %s4498_s5 = scalar_lea.vmem %s6266_s28, %s3679_s3  ;;  %s4296_s27 = smov 16  }
  0xbc   : > { %v3477_v32 = vld [vmem:[%s4498_s5 + $0x30] sm:$0xf]  ;;  %v3687_v33 = vld [vmem:[%s4498_s5 + $0x34] sm:$0xf0]  ;;  %v3469_v34 = vld [vmem:[%s4498_s5 + $0x20] sm:$0xf] }
  0xbd   : > { %v3478_v35 = vor.u32 %v3687_v33, %v3477_v32  ;;  %v3685_v36 = vld [vmem:[%s4498_s5 + $0x24] sm:$0xf0]  ;;  %v3461_v38 = vld [vmem:[%s4498_s5 + $0x10] sm:$0xf]  ;;  %v3683_v39 = vld [vmem:[%s4498_s5 + $0x14] sm:$0xf0] }
  0xbe   : > { %v3470_v37 = vor.u32 %v3685_v36, %v3469_v34  ;;  %v3462_v40 = vor.u32 %v3683_v39, %v3461_v38  ;;  %v3453_v41 = vld [vmem:[%s4498_s5] sm:$0xf]  ;;  %v3681_v42 = vld [vmem:[%s4498_s5 + $0x4] sm:$0xf0]  ;;  %v3686_v43 = vld [vmem:[%s4498_s5 + $0x34] sm:$0xf] }
  0xbf   : > { %3727 = vmatpush.bf16.msra.mxu1 %v3478_v35  ;;  %341 = vmatpush.bf16.msra.mxu0 %v3478_v35  ;;  %v3479_v44 = vld [vmem:[%s4498_s5 + $0x38] sm:$0xf0]  ;;  %v3454_v45 = vor.u32 %v3681_v42, %v3453_v41  ;;  %v3684_v47 = vld [vmem:[%s4498_s5 + $0x24] sm:$0xf]  ;;  %v3471_v48 = vld [vmem:[%s4498_s5 + $0x28] sm:$0xf0] }
  0xc0   : > { %v3482_v46 = vor.u32 %v3686_v43, %v3479_v44  ;;  %v3474_v51 = vor.u32 %v3684_v47, %v3471_v48  ;;  %v3682_v52 = vld [vmem:[%s4498_s5 + $0x14] sm:$0xf]  ;;  %v3463_v53 = vld [vmem:[%s4498_s5 + $0x18] sm:$0xf0]  ;;  %v3680_v55 = vld [vmem:[%s4498_s5 + $0x4] sm:$0xf] }
  0xc1   : > { %v3466_v54 = vor.u32 %v3682_v52, %v3463_v53  ;;  %v3455_v56 = vld [vmem:[%s4498_s5 + $0x8] sm:$0xf0]  ;;  %s4297_s28 = smov 8   ;;  %s4298_s5 = smov 32  }
  0xc2   : > { %v3458_v57 = vor.u32 %v3680_v55, %v3455_v56  ;;  %s4299_s0 = smov 24   ;;  %s4300_s9 = smov 40  }
  0xc3   : > { %3728 = vmatpush.bf16.msra.mxu1 %v3470_v37  ;;  %342 = vmatpush.bf16.msra.mxu0 %v3470_v37  ;;  %s4301_s30 = smov 56  }
  0xc7   : > { %3729 = vmatpush.bf16.msra.mxu1 %v3462_v40  ;;  %343 = vmatpush.bf16.msra.mxu0 %v3462_v40 }
  0xcb   : > { %3730 = vmatpush.bf16.msra.mxu1 %v3454_v45  ;;  %344 = vmatpush.bf16.msra.mxu0 %v3454_v45 }
  0xce   : > { %3484 = vmatmul.msk.bf16.vlgmr.msra.gmra.mxu1 %vm137_vm0, %v281_v49  ;;  %3483 = vmatmul.msk.bf16.vlgmr.msra.gmra.mxu0 %vm137_vm0, %v280_v50 }
  0xcf   : > { %365 = vmatpush.bf16.msrb.mxu1 %v3482_v46 }
  0xd3   : > { %366 = vmatpush.bf16.msrb.mxu1 %v3474_v51 }
  0xd7   : > { %367 = vmatpush.bf16.msrb.mxu1 %v3466_v54 }
  0xdb   : > { %368 = vmatpush.bf16.msrb.mxu1 %v3458_v57 }
  0xde   : > { %3485 = vmatmul.msk.bf16.gmra.mxu1 %vm137_vm0, %v282_v58 }
  0xee   : > { %3486 = vmatmul.msk.bf16.vlgmr.msrb.gmra.mxu1 %vm137_vm0, %v280_v50 }
  0xfe   : > { %3487 = vmatmul.msk.bf16.gmra.mxu1 %vm137_vm0, %v281_v49 }
 0x10e   : > { %3488 = vmatmul.msk.bf16.gmra.mxu1 %vm137_vm0, %v282_v58 }
 0x14b   : > { %v351_v59 = vpop.f32.mrf.mxu1  ;;  %v346_v0 = vpop.f32.mrf.mxu0 }
 0x14c   : > { %v347_v3 = vadd.f32 %v346_v0, %v284_v1  ;;  %v352_v18 = vadd.f32 %v351_v59, %v284_v1 }
 0x153   : > { %v353_v60 = vpop.f32.mrf.mxu1  ;;  %v348_v7 = vpop.f32.mrf.mxu0 }
 0x154   : > { %v349_v9 = vadd.f32 %v348_v7, %v284_v1  ;;  %v354_v27 = vadd.f32 %v353_v60, %v284_v1 }
 0x15b   : > { %v356_v61 = vpop.f32.mrf.mxu1 }
 0x15c   : > { %v357_v37 = vadd.f32 %v356_v61, %v284_v1 }
 0x163   : > { %v358_v62 = vpop.f32.mrf.mxu1 }
 0x164   : > { %v359_v30 = vadd.f32 %v358_v62, %v284_v1 }
 0x16b   : > { %v370_v4 = vpop.f32.mrf.mxu1 }
 0x16c   : > { %v371_v5 = vadd.f32 %v370_v4, %v285_v2 }
 0x16e   : > { %v4534_v6 = vpack.c.bf16 %v371_v5, %v347_v3 }
 0x170   : > { %421 = vrot.lane.b32.xlu1 %v4534_v6, %s4288_s20  ;;  %397 = vrot.lane.b32.xlu0 %v4534_v6, %s4289_s21  ;;  %v529_v17 = vunpack.c.l.b16 %v4534_v6 }
 0x173   : > { %v372_v8 = vpop.f32.mrf.mxu1 }
 0x174   : > { %v373_v10 = vadd.f32 %v372_v8, %v285_v2 }
 0x176   : > { %v4540_v11 = vpack.c.bf16 %v373_v10, %v349_v9 }
 0x178   : > { %423 = vrot.lane.b32.xlu2 %v4540_v11, %s4288_s20  ;;  %433 = vrot.lane.b32.xlu1 %v4534_v6, %s4290_s1  ;;  %v530_v13 = vunpack.c.l.b16 %v4540_v11 }
 0x179   : > { %409 = vrot.lane.b32.xlu0 %v4534_v6, %s4291_s22 }
 0x17a   : > { %v4556_v19 = vpack.c.b16 %v530_v13, %v529_v17 }
 0x17b   : > { %v375_v12 = vpop.f32.mrf.mxu1 }
 0x17c   : > { %v376_v14 = vadd.f32 %v375_v12, %v285_v2 }
 0x17e   : > { %v4558_v20 = vpack.c.bf16 %v376_v14, %v352_v18 }
 0x180   : > { %435 = vrot.lane.b32.xlu2 %v4540_v11, %s4290_s1  ;;  %399 = vrot.lane.b32.xlu1 %v4540_v11, %s4289_s21  ;;  %v531_v36 = vunpack.c.l.b16 %v4558_v20 }
 0x181   : > { %445 = vrot.lane.b32.xlu0 %v4534_v6, %s4292_s2 }
 0x182   : > { %v4585_v39 = vpack.c.b16 %v531_v36, %v531_v36 }
 0x183   : > { %v377_v15 = vpop.f32.mrf.mxu1 }
 0x184   : > { %v378_v24 = vadd.f32 %v377_v15, %v285_v2 }
 0x186   : > { %v4572_v33 = vpack.c.bf16 %v378_v24, %v354_v27 }
 0x188   : > { %411 = vrot.lane.b32.xlu1 %v4540_v11, %s4291_s22  ;;  %534 = vrot.lane.b32.xlu2 %v4556_v19, %s4293_s23  ;;  %v569_v43 = vunpack.c.l.b16 %v4572_v33 }
 0x189   : > { %401 = vrot.lane.b32.xlu0 %v4558_v20, %s4289_s21 }
 0x18b   : > { %v380_v23 = vpop.f32.mrf.mxu1 }
 0x18c   : > { %v381_v35 = vadd.f32 %v380_v23, %v285_v2 }
 0x18e   : > { %v4583_v38 = vpack.c.bf16 %v381_v35, %v357_v37 }
 0x190   : > { %447 = vrot.lane.b32.xlu1 %v4540_v11, %s4292_s2  ;;  %425 = vrot.lane.b32.xlu2 %v4558_v20, %s4288_s20  ;;  %v570_v42 = vunpack.c.l.b16 %v4583_v38 }
 0x191   : > { %413 = vrot.lane.b32.xlu0 %v4558_v20, %s4291_s22 }
 0x192   : > { %v4616_v44 = vpack.c.b16 %v570_v42, %v569_v43 }
 0x193   : > { %v382_v26 = vpop.f32.mrf.mxu1 }
 0x194   : > { %v383_v32 = vadd.f32 %v382_v26, %v285_v2 }
 0x196   : > { %v4574_v34 = vpack.c.bf16 %v383_v32, %v359_v30 }
 0x198   : > { %437 = vrot.lane.b32.xlu1 %v4558_v20, %s4290_s1  ;;  %415 = vrot.lane.b32.xlu2 %v4572_v33, %s4291_s22  ;;  %v571_v40 = vunpack.c.l.b16 %v4574_v34 }
 0x199   : > { %449 = vrot.lane.b32.xlu0 %v4558_v20, %s4292_s2 }
 0x19a   : > { %v4606_v41 = vpack.c.b16 %v571_v40, %v571_v40 }
 0x1a0   : > { %536 = vrot.lane.b32.xlu1 %v4585_v39, %s4293_s23  ;;  %429 = vrot.lane.b32.xlu2 %v4583_v38, %s4288_s20 }
 0x1a1   : > { %403 = vrot.lane.b32.xlu0 %v4572_v33, %s4289_s21 }
 0x1a8   : > { %427 = vrot.lane.b32.xlu1 %v4572_v33, %s4288_s20  ;;  %453 = vrot.lane.b32.xlu2 %v4583_v38, %s4292_s2 }
 0x1a9   : > { %417 = vrot.lane.b32.xlu0 %v4583_v38, %s4291_s22 }
 0x1b0   : > { %407 = vrot.lane.b32.xlu2 %v4574_v34, %s4289_s21  ;;  %405 = vrot.lane.b32.xlu1 %v4583_v38, %s4289_s21  ;;  %s3688_s21 = sshll.u32 %s4279_s25, 5 }
 0x1b1   : > { %431 = vrot.lane.b32.xlu0 %v4574_v34, %s4288_s20  ;;  %s4302_s20 = smov 48  }
 0x1b8   : > { %455 = vrot.lane.b32.xlu2 %v4574_v34, %s4292_s2  ;;  %451 = vrot.lane.b32.xlu1 %v4572_v33, %s4292_s2  ;;  %s3702_s2 = sshll.u32 %s4279_s25, 7 }
 0x1b9   : > { %576 = vrot.lane.b32.xlu0 %v4606_v41, %s4293_s23 }
 0x1c0   : > { %439 = vrot.lane.b32.xlu2 %v4572_v33, %s4290_s1  ;;  %574 = vrot.lane.b32.xlu1 %v4616_v44, %s4293_s23 }
 0x1c1   : > { %473 = vrot.lane.b32.xlu0 %v4558_v20, %s4294_s24 }
 0x1c8   : > { %419 = vrot.lane.b32.xlu1 %v4574_v34, %s4291_s22 }
 0x1c9   : > { %469 = vrot.lane.b32.xlu0 %v4534_v6, %s4294_s24 }
 0x1d0   : > { %443 = vrot.lane.b32.xlu1 %v4574_v34, %s4290_s1 }
 0x1d2   : > { %v4632_v45 = vpop.permute.xlu2 %423 }
 0x1d3   : > { %v765_v48 = vunpack.c.l.b16 %v4632_v45 }
 0x1d8   : > { %471 = vrot.lane.b32.xlu1 %v4540_v11, %s4294_s24 }
 0x1da   : > { %v4646_v51 = vpop.permute.xlu2 %435 }
 0x1db   : > { %v843_v25 = vunpack.c.l.b16 %v4646_v51 }
 0x1e0   : > { %461 = vrot.lane.b32.xlu1 %v4558_v20, %s4295_s26 }
 0x1e2   : > { %v4636_v46 = vpop.permute.xlu1 %421  ;;  %v4638_v47 = vpop.permute.xlu0 %397 }
 0x1e3   : > { %v764_v49 = vunpack.c.l.b16 %v4636_v46  ;;  %v608_v55 = vunpack.c.l.b16 %v4638_v47  ;;  %v535_v58 = vpop.permute.xlu2 %534 }
 0x1e4   : > { %v546_v37 = vsel %vm538_vm2, %v535_v58, 0 }
 0x1e5   : > { %v4642_v50 = vpack.c.b16 %v765_v48, %v764_v49 }
 0x1e7   : > { %769 = vrot.lane.b32.xlu0 %v4642_v50, %s4293_s23 }
 0x1ea   : > { %v4648_v52 = vpop.permute.xlu1 %433 }
 0x1eb   : > { %v4650_v53 = vpop.permute.xlu0 %409  ;;  %v4671_v2 = vpop.permute.xlu2 %425 }
 0x1ec   : > { %v686_v61 = vunpack.c.l.b16 %v4650_v53  ;;  %v766_v4 = vunpack.c.l.b16 %v4671_v2 }
 0x1ee   : > { %v4685_v9 = vpack.c.b16 %v766_v4, %v766_v4 }
 0x1f2   : > { %v4652_v54 = vpop.permute.xlu1 %399 }
 0x1f3   : > { %v609_v56 = vunpack.c.l.b16 %v4652_v54  ;;  %v4656_v57 = vpop.permute.xlu0 %445  ;;  %v4699_v17 = vpop.permute.xlu2 %415 }
 0x1f4   : > { %6267 = vst [vmem:[#allocation17_spill] sm:$0xff] %v4656_v57  ;;  %v920_v15 = vunpack.c.l.b16 %v4656_v57 }
 0x1f5   : > { %v4658_v59 = vpack.c.b16 %v609_v56, %v608_v55 }
 0x1f7   : > { %613 = vrot.lane.b32.xlu2 %v4658_v59, %s4293_s23 }
 0x1fa   : > { %v4662_v60 = vpop.permute.xlu1 %411 }
 0x1fb   : > { %v687_v62 = vunpack.c.l.b16 %v4662_v60  ;;  %v4666_v63 = vpop.permute.xlu0 %401  ;;  %v4715_v32 = vpop.permute.xlu2 %429 }
 0x1fc   : > { %v610_v0 = vunpack.c.l.b16 %v4666_v63 }
 0x1fd   : > { %v4669_v1 = vpack.c.b16 %v687_v62, %v686_v61 }
 0x1fe   : > { %v4673_v3 = vpack.c.b16 %v610_v0, %v610_v0  ;;  %v804_v0 = vunpack.c.l.b16 %v4715_v32 }
 0x1ff   : > { %691 = vrot.lane.b32.xlu0 %v4669_v1, %s4293_s23 }
 0x200   : > { %615 = vrot.lane.b32.xlu2 %v4673_v3, %s4293_s23 }
 0x202   : > { %v4680_v5 = vpop.permute.xlu1 %447 }
 0x203   : > { %6268 = vst [vmem:[#allocation18_spill] sm:$0xff] %v4680_v5  ;;  %v4682_v7 = vpop.permute.xlu0 %413  ;;  %v921_v12 = vunpack.c.l.b16 %v4680_v5  ;;  %v4727_v42 = vpop.permute.xlu2 %453 }
 0x204   : > { %v688_v8 = vunpack.c.l.b16 %v4682_v7  ;;  %6270 = vst [vmem:[#allocation20_spill] sm:$0xff] %v4727_v42 }
 0x205   : > { %v4701_v18 = vpack.c.b16 %v921_v12, %v920_v15 }
 0x206   : > { %v4687_v10 = vpack.c.b16 %v688_v8, %v688_v8 }
 0x207   : > { %771 = vrot.lane.b32.xlu0 %v4685_v9, %s4293_s23 }
 0x208   : > { %693 = vrot.lane.b32.xlu1 %v4687_v10, %s4293_s23 }
 0x20a   : > { %v4694_v13 = vpop.permute.xlu1 %437 }
 0x20b   : > { %v4696_v14 = vpop.permute.xlu0 %449  ;;  %v844_v40 = vunpack.c.l.b16 %v4694_v13  ;;  %v4749_v8 = vpop.permute.xlu2 %407 }
 0x20c   : > { %6269 = vst [vmem:[#allocation19_spill] sm:$0xff] %v4696_v14  ;;  %v922_v23 = vunpack.c.l.b16 %v4696_v14  ;;  %v649_v15 = vunpack.c.l.b16 %v4749_v8 }
 0x20d   : > { %v4737_v56 = vpack.c.b16 %v844_v40, %v844_v40 }
 0x20e   : > { %v4711_v30 = vpack.c.b16 %v922_v23, %v922_v23  ;;  %v4764_v40 = vpack.c.b16 %v649_v15, %v649_v15 }
 0x20f   : > { %441 = vrot.lane.b32.xlu0 %v4583_v38, %s4290_s1  ;;  %s212_s1 = scalar_lea.vmem [#allocation2], %s3688_s21 }
 0x210   : > { %925 = vrot.lane.b32.xlu1 %v4701_v18, %s4293_s23 }
 0x212   : > { %v537_v24 = vpop.permute.xlu1 %536 }
 0x213   : > { %v4708_v26 = vpop.permute.xlu0 %403  ;;  %v549_v27 = vsel %vm538_vm2, %v537_v24, 0 }
 0x214   : > { %557 = vmatpush.bf16.xpose.msra.mxu2 %v549_v27  ;;  %v647_v48 = vunpack.c.l.b16 %v4708_v26  ;;  %v960_v27 = vunpack.c.l.b16 %v4727_v42 }
 0x217   : > { %927 = vrot.lane.b32.xlu0 %v4711_v30, %s4293_s23 }
 0x218   : > { %479 = vrot.lane.b32.xlu1 %v4574_v34, %s4294_s24 }
 0x21a   : > { %v4719_v35 = vpop.permute.xlu1 %427 }
 0x21b   : > { %v4721_v36 = vpop.permute.xlu0 %417  ;;  %v803_v61 = vunpack.c.l.b16 %v4719_v35 }
 0x21c   : > { %558 = vmatpush.bf16.xpose.msra.mxu2 %v546_v37 }
 0x21d   : > { %v4752_v12 = vpack.c.b16 %v804_v0, %v803_v61 }
 0x21f   : > { %459 = vrot.lane.b32.xlu0 %v4540_v11, %s4295_s26 }
 0x222   : > { %v4729_v43 = vpop.permute.xlu1 %405 }
 0x223   : > { %v4732_v49 = vpop.permute.xlu0 %431  ;;  %v648_v55 = vunpack.c.l.b16 %v4729_v43  ;;  %3489 = vmatmul.msk.bf16.vlgmr.msra.gmra.mxu2 %vm538_vm2, %v4556_v19 }
 0x224   : > { %v805_v28 = vunpack.c.l.b16 %v4732_v49 }
 0x225   : > { %v4739_v58 = vpack.c.b16 %v648_v55, %v647_v48  ;;  %v4768_v55 = vpop.permute.xlu2 %455 }
 0x226   : > { %6272 = vst [vmem:[#allocation22_spill] sm:$0xff] %v4768_v55  ;;  %v961_v61 = vunpack.c.l.b16 %v4768_v55 }
 0x227   : > { %849 = vrot.lane.b32.xlu0 %v4737_v56, %s4293_s23  ;;  %652 = vrot.lane.b32.xlu2 %v4739_v58, %s4293_s23 }
 0x22a   : > { %v4746_v62 = vpop.permute.xlu1 %451 }
 0x22b   : > { %6271 = vst [vmem:[#allocation21_spill] sm:$0xff] %v4746_v62  ;;  %v577_v4 = vpop.permute.xlu0 %576  ;;  %v959_v23 = vunpack.c.l.b16 %v4746_v62 }
 0x22c   : > { %v588_v19 = vsel %vm538_vm2, %v577_v4, 0  ;;  %v4780_v4 = vpack.c.b16 %v961_v61, %v961_v61  ;;  %v842_v61 = vunpack.c.l.b16 %v4648_v52 }
 0x22d   : > { %596 = vmatpush.bf16.xpose.msra.mxu3 %v588_v19  ;;  %v4766_v48 = vpack.c.b16 %v960_v27, %v959_v23  ;;  %v726_v23 = vunpack.c.l.b16 %v4721_v36 }
 0x22f   : > { %475 = vrot.lane.b32.xlu0 %v4572_v33, %s4294_s24  ;;  %808 = vrot.lane.b32.xlu2 %v4752_v12, %s4293_s23 }
 0x232   : > { %v575_v24 = vpop.permute.xlu1 %574 }
 0x233   : > { %3490 = vmatmul.msk.bf16.gmra.mxu2 %vm538_vm2, %v4585_v39  ;;  %v585_v37 = vsel %vm538_vm2, %v575_v24, 0  ;;  %v4784_v15 = vpop.permute.xlu0 %473 }
 0x234   : > { %6273 = vst [vmem:[#allocation23_spill] sm:$0xff] %v4784_v15 }
 0x235   : > { %597 = vmatpush.bf16.xpose.msra.mxu3 %v585_v37 }
 0x237   : > { %654 = vrot.lane.b32.xlu2 %v4764_v40, %s4293_s23  ;;  %964 = vrot.lane.b32.xlu0 %v4766_v48, %s4293_s23 }
 0x23a   : > { %v4775_v0 = vpop.permute.xlu1 %419 }
 0x23b   : > { %v727_v39 = vunpack.c.l.b16 %v4775_v0  ;;  %v4800_v37 = vpop.permute.xlu0 %469 }
 0x23c   : > { %3491 = vmatmul.msk.bf16.vlgmr.msra.gmra.mxu3 %vm538_vm2, %v4616_v44  ;;  %v725_v44 = vunpack.c.l.b16 %v4699_v17  ;;  %6274 = vst [vmem:[#allocation24_spill] sm:$0xff] %v4800_v37  ;;  %v1076_v29 = vunpack.c.l.b16 %v4800_v37  ;;  %v1078_v37 = vunpack.c.l.b16 %v4784_v15 }
 0x23d   : > { %v4782_v19 = vpack.c.b16 %v727_v39, %v727_v39  ;;  %v4805_v39 = vpop.permute.xlu2 %439 }
 0x23e   : > { %v4796_v27 = vpack.c.b16 %v726_v23, %v725_v44  ;;  %v4814_v44 = vpack.c.b16 %v843_v25, %v842_v61  ;;  %v4828_v25 = vpack.c.b16 %v1078_v37, %v1078_v37 }
 0x23f   : > { %457 = vrot.lane.b32.xlu2 %v4534_v6, %s4295_s26  ;;  %966 = vrot.lane.b32.xlu0 %v4780_v4, %s4293_s23 }
 0x240   : > { %732 = vrot.lane.b32.xlu1 %v4782_v19, %s4293_s23 }
 0x242   : > { %v4793_v24 = vpop.permute.xlu1 %443 }
 0x247   : > { %730 = vrot.lane.b32.xlu2 %v4796_v27, %s4293_s23 }
 0x248   : > { %477 = vrot.lane.b32.xlu1 %v4583_v38, %s4294_s24 }
 0x24a   : > { %v4807_v31 = vpop.permute.xlu1 %471 }
 0x24b   : > { %6275 = vst [vmem:[#allocation25_spill] sm:$0xff] %v4807_v31  ;;  %v1077_v23 = vunpack.c.l.b16 %v4807_v31  ;;  %v4826_v31 = vpack.c.b16 %v805_v28, %v805_v28 }
 0x24c   : > { %3492 = vmatmul.msk.bf16.gmra.mxu3 %vm538_vm2, %v4606_v41 }
 0x24d   : > { %v4816_v22 = vpack.c.b16 %v1077_v23, %v1076_v29 }
 0x24f   : > { %847 = vrot.lane.b32.xlu2 %v4814_v44, %s4293_s23  ;;  %1081 = vrot.lane.b32.xlu0 %v4816_v22, %s4293_s23 }
 0x250   : > { %463 = vrot.lane.b32.xlu1 %v4572_v33, %s4295_s26 }
 0x251   : > { %v614_v21 = vpop.permute.xlu2 %613 }
 0x252   : > { %v624_v61 = vsel %vm538_vm2, %v614_v21, 0  ;;  %v4838_v28 = vpop.permute.xlu1 %461 }
 0x253   : > { %6276 = vst [vmem:[#allocation26_spill] sm:$0xff] %v4838_v28  ;;  %v1000_v37 = vunpack.c.l.b16 %v4838_v28 }
 0x255   : > { %v4845_v15 = vpack.c.b16 %v1000_v37, %v1000_v37  ;;  %v881_v37 = vunpack.c.l.b16 %v4805_v39 }
 0x257   : > { %810 = vrot.lane.b32.xlu2 %v4826_v31, %s4293_s23 }
 0x258   : > { %1083 = vrot.lane.b32.xlu1 %v4828_v25, %s4293_s23 }
 0x259   : > { %v770_v23 = vpop.permute.xlu0 %769 }
 0x25a   : > { %v616_v29 = vpop.permute.xlu2 %615  ;;  %v780_v5 = vsel %vm538_vm2, %v770_v23, 0 }
 0x25b   : > { %v627_v41 = vsel %vm538_vm2, %v616_v29, 0 }
 0x25c   : > { %635 = vmatpush.bf16.xpose.msrb.mxu2 %v627_v41 }
 0x25f   : > { %467 = vrot.lane.b32.xlu2 %v4574_v34, %s4295_s26 }
 0x264   : > { %636 = vmatpush.bf16.xpose.msrb.mxu2 %v624_v61 }
 0x267   : > { %465 = vrot.lane.b32.xlu2 %v4583_v38, %s4295_s26  ;;  %s5991_s26 = scalar_lea.vmem %s6211_s11, %s3702_s2 }
 0x26b   : > { %3493 = vmatmul.msk.bf16.vlgmr.msrb.gmra.mxu2 %vm538_vm2, %v4658_v59 }
 0x26f   : > { %1005 = vrot.lane.b32.xlu2 %v4845_v15, %s4293_s23 }
 0x271   : > { %v692_v29 = vpop.permute.xlu0 %691 }
 0x272   : > { %v702_v57 = vsel %vm538_vm2, %v692_v29, 0 }
 0x279   : > { %v772_v41 = vpop.permute.xlu0 %771 }
 0x27a   : > { %v783_v21 = vsel %vm538_vm2, %v772_v41, 0  ;;  %v694_v61 = vpop.permute.xlu1 %693 }
 0x27b   : > { %3494 = vmatmul.msk.bf16.gmra.mxu2 %vm538_vm2, %v4673_v3  ;;  %v705_v42 = vsel %vm538_vm2, %v694_v61, 0 }
 0x27c   : > { %713 = vmatpush.bf16.xpose.msrb.mxu0 %v705_v42  ;;  %791 = vmatpush.bf16.xpose.msra.mxu2 %v783_v21 }
 0x281   : > { %v4853_v62 = vpop.permute.xlu0 %441  ;;  %v653_v59 = vpop.permute.xlu2 %652 }
 0x282   : > { %v882_v55 = vunpack.c.l.b16 %v4853_v62  ;;  %v926_v29 = vpop.permute.xlu1 %925 }
 0x284   : > { %714 = vmatpush.bf16.xpose.msrb.mxu0 %v702_v57  ;;  %792 = vmatpush.bf16.xpose.msra.mxu2 %v780_v5  ;;  %v4859_v41 = vpack.c.b16 %v882_v55, %v881_v37  ;;  %v936_v55 = vsel %vm538_vm2, %v926_v29, 0 }
 0x286   : > { %886 = vrot.lane.b32.xlu1 %v4859_v41, %s4293_s23 }
 0x289   : > { %v928_v3 = vpop.permute.xlu0 %927  ;;  %v809_v42 = vpop.permute.xlu2 %808 }
 0x28a   : > { %v939_v21 = vsel %vm538_vm2, %v928_v3, 0 }
 0x28b   : > { %3497 = vmatmul.msk.bf16.vlgmr.msrb.gmra.mxu0 %vm538_vm2, %v4669_v1  ;;  %3501 = vmatmul.msk.bf16.vlgmr.msra.gmra.mxu2 %vm538_vm2, %v4642_v50 }
 0x28c   : > { %947 = vmatpush.bf16.xpose.msrb.mxu2 %v939_v21  ;;  %v663_v21 = vsel %vm538_vm2, %v653_v59, 0 }
 0x291   : > { %v4868_v23 = vpop.permute.xlu0 %459  ;;  %v655_v57 = vpop.permute.xlu2 %654 }
 0x292   : > { %6277 = vst [vmem:[#allocation27_spill] sm:$0xff] %v4868_v23  ;;  %v666_v5 = vsel %vm538_vm2, %v655_v57, 0  ;;  %v999_v3 = vunpack.c.l.b16 %v4868_v23 }
 0x293   : > { %674 = vmatpush.bf16.xpose.msrb.mxu3 %v666_v5 }
 0x294   : > { %948 = vmatpush.bf16.xpose.msrb.mxu2 %v936_v55 }
 0x299   : > { %v850_v61 = vpop.permute.xlu0 %849  ;;  %v4872_v37 = vpop.permute.xlu2 %457 }
 0x29a   : > { %6278 = vst [vmem:[#allocation28_spill] sm:$0xff] %v4872_v37  ;;  %v861_v1 = vsel %vm538_vm2, %v850_v61, 0  ;;  %v998_v50 = vunpack.c.l.b16 %v4872_v37  ;;  %v4892_v61 = vpop.permute.xlu1 %479 }
 0x29b   : > { %3498 = vmatmul.msk.bf16.gmra.mxu0 %vm538_vm2, %v4687_v10  ;;  %3502 = vmatmul.msk.bf16.gmra.mxu2 %vm538_vm2, %v4685_v9  ;;  %6280 = vst [vmem:[#allocation30_spill] sm:$0xff] %v4892_v61 }
 0x29c   : > { %675 = vmatpush.bf16.xpose.msrb.mxu3 %v663_v21  ;;  %869 = vmatpush.bf16.xpose.msra.mxu0 %v861_v1  ;;  %v4882_v29 = vpack.c.b16 %v999_v3, %v998_v50 }
 0x29e   : > { %1003 = vrot.lane.b32.xlu0 %v4882_v29, %s4293_s23 }
 0x2a1   : > { %v731_v57 = vpop.permute.xlu2 %730  ;;  %v4888_v5 = vpop.permute.xlu0 %475 }
 0x2a2   : > { %6279 = vst [vmem:[#allocation29_spill] sm:$0xff] %v4888_v5 }
 0x2a3   : > { %3495 = vmatmul.msk.bf16.vlgmr.msrb.gmra.mxu3 %vm538_vm2, %v4739_v58 }
 0x2a6   : > { %v4890_v55 = vpop.f32.mrf.mxu2 }
 0x2a9   : > { %v848_v10 = vpop.permute.xlu2 %847  ;;  %v965_v3 = vpop.permute.xlu0 %964 }
 0x2aa   : > { %v858_v9 = vsel %vm538_vm2, %v848_v10, 0 }
 0x2ab   : > { %3509 = vmatmul.msk.bf16.vlgmr.msrb.gmra.mxu2 %vm538_vm2, %v4701_v18  ;;  %870 = vmatpush.bf16.xpose.msra.mxu0 %v858_v9 }
 0x2ae   : > { %v4897_v59 = vpop.f32.mrf.mxu2 }
 0x2b1   : > { %v811_v1 = vpop.permute.xlu2 %810  ;;  %v967_v18 = vpop.permute.xlu0 %966 }
 0x2b2   : > { %v822_v50 = vsel %vm538_vm2, %v811_v1, 0  ;;  %v733_v58 = vpop.permute.xlu1 %732  ;;  %3505 = vmatmul.msk.bf16.vlgmr.msra.gmra.mxu0 %vm538_vm2, %v4814_v44  ;;  %v1115_v1 = vunpack.c.l.b16 %v4888_v5 }
 0x2b3   : > { %v744_v21 = vsel %vm538_vm2, %v733_v58, 0  ;;  %3496 = vmatmul.msk.bf16.gmra.mxu3 %vm538_vm2, %v4764_v40  ;;  %v741_v40 = vsel %vm538_vm2, %v731_v57, 0  ;;  %v978_v58 = vsel %vm538_vm2, %v967_v18, 0  ;;  %v975_v18 = vsel %vm538_vm2, %v965_v3, 0 }
 0x2b4   : > { %752 = vmatpush.bf16.xpose.msra.mxu1 %v744_v21  ;;  %830 = vmatpush.bf16.xpose.msra.mxu3 %v822_v50  ;;  %v819_v50 = vsel %vm538_vm2, %v809_v42, 0 }
 0x2b6   : > { %v4905_v10 = vpop.f32.mrf.mxu2 }
 0x2b9   : > { %v4907_v9 = vpop.permute.xlu2 %467 }
 0x2ba   : > { %6281 = vst [vmem:[#allocation31_spill] sm:$0xff] %v4907_v9  ;;  %v1039_v23 = vunpack.c.l.b16 %v4907_v9  ;;  %v4910_v37 = vpop.permute.xlu1 %477 }
 0x2bb   : > { %6282 = vst [vmem:[#allocation32_spill] sm:$0xff] %v4910_v37  ;;  %v1116_v44 = vunpack.c.l.b16 %v4910_v37  ;;  %3510 = vmatmul.msk.bf16.gmra.mxu2 %vm538_vm2, %v4711_v30  ;;  %v883_v30 = vunpack.c.l.b16 %v4793_v24 }
 0x2bc   : > { %753 = vmatpush.bf16.xpose.msra.mxu1 %v741_v40  ;;  %831 = vmatpush.bf16.xpose.msra.mxu3 %v819_v50  ;;  %v4919_v21 = vpack.c.b16 %v1039_v23, %v1039_v23 }
 0x2bd   : > { %v4921_v9 = vpack.c.b16 %v1116_v44, %v1115_v1  ;;  %v4943_v1 = vpack.c.b16 %v883_v30, %v883_v30 }
 0x2be   : > { %v567_v14 = vpop.f32.mrf.mxu2  ;;  %1044 = vrot.lane.b32.xlu0 %v4919_v21, %s4293_s23 }
 0x2bf   : > { %v4925_v5 = vpop.f32.mrf.mxu3  ;;  %1120 = vrot.lane.b32.xlu2 %v4921_v9, %s4293_s23 }
 0x2c1   : > { %v4930_v42 = vpop.permute.xlu2 %465 }
 0x2c2   : > { %6283 = vst [vmem:[#allocation33_spill] sm:$0xff] %v4930_v42  ;;  %v1038_v57 = vunpack.c.l.b16 %v4930_v42  ;;  %v4933_v23 = vpop.permute.xlu1 %463  ;;  %3506 = vmatmul.msk.bf16.gmra.mxu0 %vm538_vm2, %v4737_v56  ;;  %v489_v56 = vrot.slane %v4666_v63, 4 }
 0x2c3   : > { %6284 = vst [vmem:[#allocation34_spill] sm:$0xff] %v4933_v23  ;;  %v1037_v14 = vunpack.c.l.b16 %v4933_v23  ;;  %3499 = vmatmul.msk.bf16.vlgmr.msra.gmra.mxu1 %vm538_vm2, %v4796_v27  ;;  %3503 = vmatmul.msk.bf16.vlgmr.msra.gmra.mxu3 %vm538_vm2, %v4752_v12  ;;  %v1117_v27 = vunpack.c.l.b16 %v4892_v61  ;;  %v1082_v61 = vpop.permute.xlu0 %1081 }
 0x2c4   : > { %986 = vmatpush.bf16.xpose.msrb.mxu3 %v978_v58  ;;  %v1824_v30 = vunpack.c.l.b16 %v489_v56 }
 0x2c5   : > { %v4945_v44 = vpack.c.b16 %v1038_v57, %v1037_v14  ;;  %v4957_v57 = vpack.c.b16 %v1117_v27, %v1117_v27  ;;  %v501_v14 = vrot.slane %v4671_v2, 4  ;;  %v1092_v2 = vsel %vm538_vm2, %v1082_v61, 0 }
 0x2c6   : > { %v1826_v63 = vpack.c.b16 %v1824_v30, %v1824_v30  ;;  %v499_v27 = vrot.slane %v4636_v46, 4  ;;  %v4989_v46 = vadd.f32 %v4925_v5, %v4446_v16  ;;  %v5004_v5 = vadd.f32 %v4890_v55, %v4446_v16 }
 0x2c7   : > { %v4947_v40 = vpop.f32.mrf.mxu3  ;;  %888 = vrot.lane.b32.xlu2 %v4943_v1, %s4293_s23  ;;  %1042 = vrot.lane.b32.xlu1 %v4945_v44, %s4293_s23  ;;  %v1988_v23 = vunpack.c.l.b16 %v501_v14  ;;  %v4977_v14 = vadd.f32 %v4905_v10, %v4446_v16 }
 0x2c9   : > { %v1006_v12 = vpop.permute.xlu2 %1005 }
 0x2ca   : > { %v1017_v3 = vsel %vm538_vm2, %v1006_v12, 0  ;;  %v1084_v50 = vpop.permute.xlu1 %1083  ;;  %v487_v12 = vrot.slane %v4638_v47, 4 }
 0x2cb   : > { %v1095_v58 = vsel %vm538_vm2, %v1084_v50, 0  ;;  %1025 = vmatpush.bf16.xpose.msrb.mxu0 %v1017_v3  ;;  %v1990_v3 = vpack.c.b16 %v1988_v23, %v1988_v23 }
 0x2cc   : > { %987 = vmatpush.bf16.xpose.msrb.mxu3 %v975_v18  ;;  %1103 = vmatpush.bf16.xpose.msra.mxu2 %v1095_v58  ;;  %v488_v18 = vrot.slane %v4652_v54, 4  ;;  %v1835_v54 = vsel %vm1751_vm3, %v1826_v63, 0  ;;  %v1822_v56 = vunpack.c.l.b16 %v487_v12  ;;  %v500_v58 = vrot.slane %v4632_v45, 4 }
 0x2cd   : > { %v1161_v45 = vsel %vm1154_vm4, %v4977_v14, -inf  ;;  %v1155_v63 = vsel %vm1154_vm4, %v5004_v5, -inf }
 0x2ce   : > { %v1823_v42 = vunpack.c.l.b16 %v488_v18  ;;  %v1987_v61 = vunpack.c.l.b16 %v500_v58  ;;  %v495_v58 = vrot.slane %v4682_v7, 4 }
 0x2cf   : > { %v604_v37 = vpop.f32.mrf.mxu3  ;;  %1122 = vrot.lane.b32.xlu1 %v4957_v57, %s4293_s23  ;;  %s221_s23 = scalar_lea.vmem %s6206_s6, %s4279_s25 }
 0x2d0   : > { %v1825_v50 = vpack.c.b16 %v1823_v42, %v1822_v56  ;;  %v1164_v42 = vsel %vm1154_vm4, %v4989_v46, -inf }
 0x2d3   : > { %3500 = vmatmul.msk.bf16.gmra.mxu1 %vm538_vm2, %v4782_v19  ;;  %3504 = vmatmul.msk.bf16.gmra.mxu3 %vm538_vm2, %v4826_v31  ;;  %v1986_v19 = vunpack.c.l.b16 %v499_v27  ;;  %v1999_v31 = vsel %vm1751_vm3, %v1990_v3, 0  ;;  %v483_v27 = vrot.slane %v4558_v20, 4 }
 0x2d4   : > { %1104 = vmatpush.bf16.xpose.msra.mxu2 %v1092_v2 }
 0x2d5   : > { %v1989_v30 = vpack.c.b16 %v1987_v61, %v1986_v19  ;;  %v482_v19 = vrot.slane %v4540_v11, 4  ;;  %v481_v61 = vrot.slane %v4534_v6, 4 }
 0x2d7   : > { %v606_v47 = vpop.f32.mrf.mxu3  ;;  %v1740_v7 = vunpack.c.l.b16 %v482_v19 }
 0x2db   : > { %3517 = vmatmul.msk.bf16.vlgmr.msra.gmra.mxu2 %vm538_vm2, %v4816_v22  ;;  %v4985_v22 = vadd.f32 %v4897_v59, %v4446_v16 }
 0x2dc   : > { %1843 = vmatpush.bf16.msrb.mxu2 %v1835_v54  ;;  %v5024_v54 = vadd.f32 %v604_v37, %v4446_v16 }
 0x2de   : > { %v1170_v47 = vsel %vm1154_vm4, %v5024_v54, -inf }
 0x2e0   : > { %1844 = vmatpush.bf16.msrb.mxu2 %v1825_v50  ;;  %v1741_v50 = vunpack.c.l.b16 %v483_v27 }
 0x2e2   : > { %v1743_v37 = vpack.c.b16 %v1741_v50, %v1741_v50 }
 0x2e3   : > { %3511 = vmatmul.msk.bf16.vlgmr.msrb.gmra.mxu3 %vm538_vm2, %v4766_v48  ;;  %v1158_v48 = vsel %vm1154_vm4, %v4985_v22, -inf }
 0x2e4   : > { %2007 = vmatpush.bf16.msra.mxu2 %v1999_v31  ;;  %v1753_v11 = vsel %vm1751_vm3, %v1743_v37, 0 }
 0x2e8   : > { %2008 = vmatpush.bf16.msra.mxu2 %v1989_v30  ;;  %1162 = vmax.xlane.f32.xlu0 %v1161_v45 }
 0x2eb   : > { %3518 = vmatmul.msk.bf16.gmra.mxu2 %vm538_vm2, %v4828_v25 }
 0x2ee   : > { %v638_v10 = vpop.f32.mrf.mxu2 }
 0x2ef   : > { %v4998_v23 = vadd.f32 %v638_v10, %v4446_v16  ;;  %v1906_v10 = vunpack.c.l.b16 %v495_v58 }
 0x2f0   : > { %1159 = vmax.xlane.f32.xlu2 %v1158_v48  ;;  %1165 = vmax.xlane.f32.xlu0 %v1164_v42 }
 0x2f1   : > { %v1173_v18 = vsel %vm1154_vm4, %v4998_v23, -inf }
 0x2f3   : > { %3512 = vmatmul.msk.bf16.gmra.mxu3 %vm538_vm2, %v4780_v4  ;;  %v5017_v4 = vadd.f32 %v4947_v40, %v4446_v16 }
 0x2f5   : > { %v1167_v2 = vsel %vm1154_vm4, %v5017_v4, -inf }
 0x2f6   : > { %v640_v25 = vpop.f32.mrf.mxu2 }
 0x2f7   : > { %v5007_v59 = vadd.f32 %v640_v25, %v4446_v16  ;;  %v1739_v25 = vunpack.c.l.b16 %v481_v61 }
 0x2f8   : > { %1174 = vmax.xlane.f32.xlu2 %v1173_v18  ;;  %v494_v18 = vrot.slane %v4662_v60, 4 }
 0x2f9   : > { %1156 = vmax.xlane.f32.xlu1 %v1155_v63  ;;  %v1176_v12 = vsel %vm1154_vm4, %v5007_v59, -inf  ;;  %v1908_v63 = vpack.c.b16 %v1906_v10, %v1906_v10 }
 0x2fa   : > { %1177 = vmax.xlane.f32.xlu0 %v1176_v12  ;;  %v1742_v12 = vpack.c.b16 %v1740_v7, %v1739_v25  ;;  %v1905_v27 = vunpack.c.l.b16 %v494_v18  ;;  %v486_v25 = vrot.slane %v4574_v34, 4 }
 0x2fb   : > { %v1917_v60 = vsel %vm1751_vm3, %v1908_v63, 0 }
 0x2fe   : > { %v5019_v55 = vpop.f32.mrf.mxu2 }
 0x301   : > { %1168 = vmax.xlane.f32.xlu1 %v1167_v2  ;;  %v493_v2 = vrot.slane %v4650_v53, 4 }
 0x303   : > { %v1904_v58 = vunpack.c.l.b16 %v493_v2 }
 0x305   : > { %v1907_v19 = vpack.c.b16 %v1905_v27, %v1904_v58  ;;  %v485_v27 = vrot.slane %v4583_v38, 4  ;;  %v484_v58 = vrot.slane %v4572_v33, 4 }
 0x306   : > { %v645_v56 = vpop.f32.mrf.mxu2 }
 0x308   : > { %v716_v3 = vpop.f32.mrf.mxu0 }
 0x309   : > { %1171 = vmax.xlane.f32.xlu1 %v1170_v47  ;;  %v5030_v40 = vadd.f32 %v716_v3, %v4446_v16 }
 0x30b   : > { %v1191_v45 = vsel %vm1154_vm4, %v5030_v40, -inf }
 0x30e   : > { %v5034_v31 = vpop.f32.mrf.mxu2 }
 0x310   : > { %v718_v30 = vpop.f32.mrf.mxu0  ;;  %v1004_v20 = vpop.permute.xlu0 %1003 }
 0x311   : > { %v5040_v48 = vadd.f32 %v718_v30, %v4446_v16  ;;  %v1014_v42 = vsel %vm538_vm2, %v1004_v20, 0  ;;  %1192 = vmax.xlane.f32.xlu1 %v1191_v45 }
 0x312   : > { %1026 = vmatpush.bf16.xpose.msrb.mxu0 %v1014_v42 }
 0x313   : > { %v1194_v6 = vsel %vm1154_vm4, %v5040_v48, -inf }
 0x314   : > { %1195 = vmax.xlane.f32.xlu2 %v1194_v6 }
 0x316   : > { %v5048_v56 = vpop.f32.mrf.mxu2 }
 0x318   : > { %v721_v3 = vpop.f32.mrf.mxu0 }
 0x319   : > { %v5051_v47 = vadd.f32 %v721_v3, %v4446_v16  ;;  %v5053_v50 = vpop.permute.xlu2 %1120  ;;  %3513 = vmatmul.msk.bf16.vlgmr.msrb.gmra.mxu0 %vm538_vm2, %v4882_v29  ;;  %v887_v29 = vpop.permute.xlu1 %886 }
 0x31a   : > { %1761 = vmatpush.bf16.msra.mxu0 %v1753_v11  ;;  %v897_v42 = vsel %vm538_vm2, %v887_v29, 0  ;;  %v492_v29 = vrot.slane %v4749_v8, 4  ;;  %v504_v8 = vrot.slane %v4732_v49, 4 }
 0x31b   : > { %v1197_v53 = vsel %vm1154_vm4, %v5051_v47, -inf }
 0x31c   : > { %1198 = vmax.xlane.f32.xlu2 %v1197_v53 }
 0x31e   : > { %1762 = vmatpush.bf16.msra.mxu0 %v1742_v12  ;;  %v5060_v37 = vpop.f32.mrf.mxu2  ;;  %v1783_v12 = vunpack.c.l.b16 %v486_v25 }
 0x320   : > { %v723_v61 = vpop.f32.mrf.mxu0 }
 0x321   : > { %v889_v30 = vpop.permute.xlu2 %888 }
 0x322   : > { %1925 = vmatpush.bf16.msrb.mxu0 %v1917_v60  ;;  %v900_v20 = vsel %vm538_vm2, %v889_v30, 0  ;;  %v1785_v60 = vpack.c.b16 %v1783_v12, %v1783_v12 }
 0x323   : > { %908 = vmatpush.bf16.xpose.msrb.mxu1 %v900_v20 }
 0x324   : > { %v1794_v61 = vsel %vm1751_vm3, %v1785_v60, 0  ;;  %v498_v60 = vrot.slane %v4775_v0, 4 }
 0x326   : > { %1926 = vmatpush.bf16.msrb.mxu0 %v1907_v19  ;;  %v677_v45 = vpop.f32.mrf.mxu3  ;;  %v801_v10 = vpop.f32.mrf.mxu2  ;;  %v1782_v19 = vunpack.c.l.b16 %v485_v27  ;;  %v491_v27 = vrot.slane %v4729_v43, 4  ;;  %v1131_v43 = vsel %vm538_vm2, %v5053_v50, 0  ;;  %v496_v50 = vrot.slane %v4699_v17, 4 }
 0x328   : > { %v1945_v17 = vunpack.c.l.b16 %v496_v50 }
 0x329   : > { %3514 = vmatmul.msk.bf16.gmra.mxu0 %vm538_vm2, %v4845_v15 }
 0x32b   : > { %909 = vmatpush.bf16.xpose.msrb.mxu1 %v897_v42 }
 0x32e   : > { %v5066_v7 = vpop.f32.mrf.mxu3  ;;  %v5068_v11 = vpop.f32.mrf.mxu2 }
 0x32f   : > { %v5070_v6 = vpop.f32.mrf.mxu0 }
 0x330   : > { %v1045_v18 = vpop.permute.xlu0 %1044 }
 0x331   : > { %v1056_v63 = vsel %vm538_vm2, %v1045_v18, 0 }
 0x332   : > { %3507 = vmatmul.msk.bf16.vlgmr.msrb.gmra.mxu1 %vm538_vm2, %v4859_v41  ;;  %v1781_v41 = vunpack.c.l.b16 %v484_v58 }
 0x333   : > { %1064 = vmatpush.bf16.xpose.msra.mxu1 %v1056_v63  ;;  %v1865_v63 = vunpack.c.l.b16 %v492_v29  ;;  %v1947_v29 = vunpack.c.l.b16 %v498_v60 }
 0x334   : > { %v1784_v10 = vpack.c.b16 %v1782_v19, %v1781_v41  ;;  %v5103_v19 = vadd.f32 %v677_v45, %v4446_v16  ;;  %v502_v45 = vrot.slane %v4719_v35, 4 }
 0x336   : > { %v5076_v15 = vpop.f32.mrf.mxu3  ;;  %v5078_v2 = vpop.f32.mrf.mxu2  ;;  %v1182_v49 = vsel %vm1154_vm4, %v5103_v19, -inf }
 0x337   : > { %v874_v3 = vpop.f32.mrf.mxu0 }
 0x339   : > { %v1043_v53 = vpop.permute.xlu1 %1042 }
 0x33a   : > { %v1053_v34 = vsel %vm538_vm2, %v1043_v53, 0 }
 0x33b   : > { %1065 = vmatpush.bf16.xpose.msra.mxu1 %v1053_v34  ;;  %v1867_v34 = vpack.c.b16 %v1865_v63, %v1865_v63 }
 0x33d   : > { %v1876_v0 = vsel %vm1751_vm3, %v1867_v34, 0 }
 0x33e   : > { %v684_v30 = vpop.f32.mrf.mxu3  ;;  %v5084_v20 = vpop.f32.mrf.mxu2 }
 0x33f   : > { %v5087_v38 = vpop.f32.mrf.mxu0  ;;  %v2029_v30 = vunpack.c.l.b16 %v504_v8  ;;  %v503_v8 = vrot.slane %v4715_v32, 4 }
 0x340   : > { %v755_v42 = vpop.f32.mrf.mxu1 }
 0x341   : > { %v5090_v33 = vadd.f32 %v755_v42, %v4446_v16  ;;  %v1123_v25 = vpop.permute.xlu1 %1122 }
 0x342   : > { %v1134_v18 = vsel %vm538_vm2, %v1123_v25, 0  ;;  %3508 = vmatmul.msk.bf16.gmra.mxu1 %vm538_vm2, %v4943_v1  ;;  %v2031_v25 = vpack.c.b16 %v2029_v30, %v2029_v30 }
 0x343   : > { %1802 = vmatpush.bf16.msrb.mxu1 %v1794_v61  ;;  %1142 = vmatpush.bf16.xpose.msra.mxu3 %v1134_v18  ;;  %v1200_v12 = vsel %vm1154_vm4, %v5090_v33, -inf  ;;  %v490_v61 = vrot.slane %v4708_v26, 4  ;;  %v497_v26 = vrot.slane %v4721_v36, 4  ;;  %v1949_v18 = vpack.c.b16 %v1947_v29, %v1947_v29 }
 0x344   : > { %1201 = vmax.xlane.f32.xlu1 %v1200_v12  ;;  %v2040_v36 = vsel %vm1751_vm3, %v2031_v25, 0 }
 0x345   : > { %v1863_v42 = vunpack.c.l.b16 %v490_v61  ;;  %v1946_v34 = vunpack.c.l.b16 %v497_v26  ;;  %v1958_v35 = vsel %vm1751_vm3, %v1949_v18, 0 }
 0x346   : > { %v5100_v58 = vpop.f32.mrf.mxu3  ;;  %v957_v53 = vpop.f32.mrf.mxu2 }
 0x347   : > { %1803 = vmatpush.bf16.msrb.mxu1 %v1784_v10  ;;  %v879_v1 = vpop.f32.mrf.mxu0  ;;  %v1864_v10 = vunpack.c.l.b16 %v491_v27  ;;  %v5120_v27 = vadd.f32 %v874_v3, %v4446_v16  ;;  %v2027_v53 = vunpack.c.l.b16 %v502_v45  ;;  %v1948_v3 = vpack.c.b16 %v1946_v34, %v1945_v17 }
 0x348   : > { %v5106_v41 = vpop.f32.mrf.mxu1  ;;  %v2028_v1 = vunpack.c.l.b16 %v503_v8 }
 0x349   : > { %v1866_v12 = vpack.c.b16 %v1864_v10, %v1863_v42  ;;  %v1230_v32 = vsel %vm1154_vm4, %v5120_v27, -inf }
 0x34a   : > { %v2030_v61 = vpack.c.b16 %v2028_v1, %v2027_v53  ;;  %v5155_v53 = vadd.f32 %v5070_v6, %v4446_v16  ;;  %v5169_v6 = vadd.f32 %v5019_v55, %v4446_v16 }
 0x34b   : > { %1143 = vmatpush.bf16.xpose.msra.mxu3 %v1131_v43 }
 0x34c   : > { %1183 = vmax.xlane.f32.xlu1 %v1182_v49 }
 0x34e   : > { %v5115_v63 = vpop.f32.mrf.mxu3 }
 0x350   : > { %v760_v60 = vpop.f32.mrf.mxu1 }
 0x352   : > { %3515 = vmatmul.msk.bf16.vlgmr.msra.gmra.mxu1 %vm538_vm2, %v4945_v44  ;;  %3519 = vmatmul.msk.bf16.vlgmr.msra.gmra.mxu3 %vm538_vm2, %v4921_v9 }
 0x353   : > { %1884 = vmatpush.bf16.msrb.mxu3 %v1876_v0  ;;  %1966 = vmatpush.bf16.msra.mxu1 %v1958_v35  ;;  %v1227_v35 = vsel %vm1154_vm4, %v5155_v53, -inf }
 0x354   : > { %1231 = vmax.xlane.f32.xlu1 %v1230_v32 }
 0x356   : > { %v5130_v30 = vpop.f32.mrf.mxu3 }
 0x357   : > { %1885 = vmatpush.bf16.msrb.mxu3 %v1866_v12  ;;  %1967 = vmatpush.bf16.msra.mxu1 %v1948_v3  ;;  %v1179_v3 = vsel %vm1154_vm4, %v5169_v6, -inf }
 0x358   : > { %v762_v44 = vpop.f32.mrf.mxu1 }
 0x359   : > { %v5180_v44 = vadd.f32 %v5106_v41, %v4446_v16 }
 0x35b   : > { %2048 = vmatpush.bf16.msra.mxu3 %v2040_v36  ;;  %v1163_v45 = vpop.xlane.xlu0 %1162 }
 0x35e   : > { %v840_v9 = vpop.f32.mrf.mxu3  ;;  %v5132_v10 = vpop.f32.mrf.mxu2 }
 0x35f   : > { %2049 = vmatpush.bf16.msra.mxu3 %v2030_v61  ;;  %v5176_v61 = vadd.f32 %v760_v60, %v4446_v16  ;;  %v1203_v9 = vsel %vm1154_vm4, %v5180_v44, -inf  ;;  %v5192_v60 = vadd.f32 %v5066_v7, %v4446_v16  ;;  %v5205_v7 = vadd.f32 %v5034_v31, %v4446_v16 }
 0x361   : > { %v1206_v55 = vsel %vm1154_vm4, %v5176_v61, -inf }
 0x362   : > { %3516 = vmatmul.msk.bf16.gmra.mxu1 %vm538_vm2, %v4919_v21  ;;  %3520 = vmatmul.msk.bf16.gmra.mxu3 %vm538_vm2, %v4957_v57  ;;  %v1301_v21 = vsub.f32 %v4977_v14, %v1163_v45  ;;  %v1185_v45 = vsel %vm1154_vm4, %v5192_v60, -inf }
 0x363   : > { %v1160_v29 = vpop.xlane.xlu2 %1159 }
 0x364   : > { %v1300_v43 = vsub.f32 %v4985_v22, %v1160_v29  ;;  %v1351_v8 = vmul.f32 1.442695, %v1301_v21  ;;  %v5188_v29 = vadd.f32 %v5048_v56, %v4446_v16 }
 0x366   : > { %v1349_v49 = vmul.f32 1.442695, %v1300_v43  ;;  %v5139_v0 = vpop.f32.mrf.mxu3  ;;  %v5141_v42 = vpop.f32.mrf.mxu2 }
 0x367   : > { %v1166_v43 = vpop.xlane.xlu0 %1165 }
 0x368   : > { %3924 = vpow2.f32 %v1349_v49  ;;  %v1302_v41 = vsub.f32 %v4989_v46, %v1166_v43  ;;  %v1212_v49 = vsel %vm1154_vm4, %v5188_v29, -inf }
 0x36a   : > { %v1353_v56 = vmul.f32 1.442695, %v1302_v41 }
 0x36c   : > { %v1157_v26 = vpop.xlane.xlu1 %1156 }
 0x36d   : > { %v1299_v25 = vsub.f32 %v5004_v5, %v1157_v26  ;;  %v5201_v26 = vadd.f32 %v5076_v15, %v4446_v16 }
 0x36e   : > { %v5144_v18 = vpop.eup %3924  ;;  %v5147_v12 = vpop.f32.mrf.mxu3 }
 0x36f   : > { %v5149_v57 = vpop.f32.mrf.mxu2  ;;  %v1347_v50 = vmul.f32 1.442695, %v1299_v25  ;;  %v1446_v22 = vsel %vm1154_vm4, %v5144_v18, 0.0 }
 0x370   : > { %1447 = vadd.xlane.f32.xlu0 %v1446_v22  ;;  %v1209_v22 = vsel %vm1154_vm4, %v5205_v7, -inf }
 0x371   : > { %3926 = vpow2.f32 %v1347_v50  ;;  %v1188_v50 = vsel %vm1154_vm4, %v5201_v26, -inf }
 0x372   : > { %3928 = vpow2.f32 %v1351_v8  ;;  %v5216_v8 = vadd.f32 %v5087_v38, %v4446_v16 }
 0x373   : > { %3930 = vpow2.f32 %v1353_v56  ;;  %v5251_v56 = vadd.f32 %v5147_v12, %v4446_v16 }
 0x374   : > { %v1169_v25 = vpop.xlane.xlu1 %1168 }
 0x375   : > { %v1303_v46 = vsub.f32 %v5017_v4, %v1169_v25 }
 0x376   : > { %v5157_v5 = vpop.f32.mrf.mxu3 }
 0x377   : > { %v1113_v34 = vpop.f32.mrf.mxu2  ;;  %v5159_v14 = vpop.eup %3926  ;;  %v1355_v15 = vmul.f32 1.442695, %v1303_v46 }
 0x378   : > { %1228 = vmax.xlane.f32.xlu0 %v1227_v35  ;;  %v1443_v36 = vsel %vm1154_vm4, %v5159_v14, 0.0  ;;  %v5165_v17 = vpop.eup %3928  ;;  %v1233_v34 = vsel %vm1154_vm4, %v5216_v8, -inf }
 0x379   : > { %1444 = vadd.xlane.f32.xlu2 %v1443_v36  ;;  %v1449_v32 = vsel %vm1154_vm4, %v5165_v17, 0.0  ;;  %v5218_v31 = vpop.eup %3930  ;;  %3932 = vpow2.f32 %v1355_v15 }
 0x37a   : > { %v1452_v35 = vsel %vm1154_vm4, %v5218_v31, 0.0 }
 0x37e   : > { %v996_v1 = vpop.f32.mrf.mxu3 }
 0x37f   : > { %v5226_v36 = vpop.eup %3932  ;;  %v5230_v1 = vadd.f32 %v5060_v37, %v4446_v16 }
 0x380   : > { %1450 = vadd.xlane.f32.xlu0 %v1449_v32  ;;  %v1455_v32 = vsel %vm1154_vm4, %v5226_v36, 0.0 }
 0x381   : > { %1180 = vmax.xlane.f32.xlu2 %v1179_v3  ;;  %v1215_v3 = vsel %vm1154_vm4, %v5230_v1, -inf }
 0x388   : > { %1207 = vmax.xlane.f32.xlu0 %v1206_v55  ;;  %v5240_v55 = vadd.f32 %v5130_v30, %v4446_v16  ;;  %v5255_v30 = vadd.f32 %v5100_v58, %v4446_v16  ;;  %v5269_v58 = vadd.f32 %v5132_v10, %v4446_v16 }
 0x389   : > { %1204 = vmax.xlane.f32.xlu2 %v1203_v9  ;;  %v1172_v9 = vpop.xlane.xlu1 %1171 }
 0x38a   : > { %v1218_v12 = vsel %vm1154_vm4, %v5255_v30, -inf }
 0x390   : > { %1213 = vmax.xlane.f32.xlu0 %v1212_v49  ;;  %v1224_v49 = vsel %vm1154_vm4, %v5240_v55, -inf }
 0x391   : > { %1186 = vmax.xlane.f32.xlu2 %v1185_v45  ;;  %v1193_v25 = vpop.xlane.xlu1 %1192 }
 0x392   : > { %v1311_v15 = vsub.f32 %v5030_v40, %v1193_v25  ;;  %v5277_v40 = vadd.f32 %v5115_v63, %v4446_v16  ;;  %v5288_v63 = vadd.f32 %v5157_v5, %v4446_v16  ;;  %v5292_v25 = vadd.f32 %v5078_v2, %v4446_v16 }
 0x393   : > { %v5304_v2 = vadd.f32 %v5149_v57, %v4446_v16 }
 0x394   : > { %v1221_v10 = vsel %vm1154_vm4, %v5277_v40, -inf }
 0x395   : > { %6286 = vst [vmem:[#allocation36_spill] sm:$0xff] %v5304_v2 }
 0x396   : > { %v5208_v21 = vpop.f32.mrf.mxu0 }
 0x398   : > { %1189 = vmax.xlane.f32.xlu0 %v1188_v50 }
 0x399   : > { %1210 = vmax.xlane.f32.xlu2 %v1209_v22  ;;  %v1257_v22 = vsel %vm1154_vm4, %v5251_v56, -inf }
 0x39e   : > { %v5220_v4 = vpop.f32.mrf.mxu0 }
 0x3a0   : > { %1234 = vmax.xlane.f32.xlu0 %v1233_v34 }
 0x3a1   : > { %1453 = vadd.xlane.f32.xlu2 %v1452_v35  ;;  %v1371_v35 = vmul.f32 1.442695, %v1311_v15  ;;  %v1248_v15 = vsel %vm1154_vm4, %v5292_v25, -inf }
 0x3a3   : > { %3934 = vpow2.f32 %v1371_v35 }
 0x3a6   : > { %v5232_v38 = vpop.f32.mrf.mxu0 }
 0x3a8   : > { %1456 = vadd.xlane.f32.xlu0 %v1455_v32  ;;  %v5273_v32 = vadd.f32 %v5068_v11, %v4446_v16 }
 0x3a9   : > { %1216 = vmax.xlane.f32.xlu2 %v1215_v3  ;;  %v1175_v3 = vpop.xlane.xlu2 %1174 }
 0x3aa   : > { %v1245_v11 = vsel %vm1154_vm4, %v5273_v32, -inf }
 0x3ae   : > { %v1035_v43 = vpop.f32.mrf.mxu0 }
 0x3af   : > { %v911_v41 = vpop.f32.mrf.mxu1 }
 0x3b0   : > { %v5243_v37 = vadd.f32 %v911_v41, %v4446_v16  ;;  %v1281_v41 = vsel %vm1154_vm4, %v5269_v58, -inf }
 0x3b1   : > { %1225 = vmax.xlane.f32.xlu2 %v1224_v49  ;;  %v1305_v49 = vsub.f32 %v4998_v23, %v1175_v3  ;;  %v5294_v23 = vpop.eup %3934  ;;  %v1287_v3 = vsel %vm1154_vm4, %v5304_v2, -inf }
 0x3b2   : > { %v1236_v45 = vsel %vm1154_vm4, %v5243_v37, -inf  ;;  %6285 = vst [vmem:[#allocation35_spill] sm:$0xff] %v5294_v23  ;;  %v1479_v5 = vsel %vm1154_vm4, %v5294_v23, 0.0 }
 0x3b3   : > { %1237 = vmax.xlane.f32.xlu0 %v1236_v45  ;;  %v1359_v45 = vmul.f32 1.442695, %v1305_v49 }
 0x3b5   : > { %3936 = vpow2.f32 %v1359_v45  ;;  %v5327_v45 = vadd.f32 %v5141_v42, %v4446_v16  ;;  %v5340_v42 = vadd.f32 %v5208_v21, %v4446_v16 }
 0x3b7   : > { %v913_v46 = vpop.f32.mrf.mxu1  ;;  %6288 = vst [vmem:[#allocation38_spill] sm:$0xff] %v5340_v42 }
 0x3b8   : > { %v5258_v50 = vadd.f32 %v913_v46, %v4446_v16 }
 0x3b9   : > { %1258 = vmax.xlane.f32.xlu2 %v1257_v22  ;;  %v1260_v22 = vsel %vm1154_vm4, %v5288_v63, -inf }
 0x3ba   : > { %v1239_v34 = vsel %vm1154_vm4, %v5258_v50, -inf }
 0x3bb   : > { %1240 = vmax.xlane.f32.xlu1 %v1239_v34  ;;  %1219 = vmax.xlane.f32.xlu0 %v1218_v12  ;;  %v5308_v34 = vadd.f32 %v5084_v20, %v4446_v16  ;;  %v5310_v12 = vpop.eup %3936 }
 0x3bc   : > { %6287 = vst [vmem:[#allocation37_spill] sm:$0xff] %v5310_v12  ;;  %v1461_v57 = vsel %vm1154_vm4, %v5310_v12, 0.0 }
 0x3bd   : > { %v1251_v49 = vsel %vm1154_vm4, %v5308_v34, -inf }
 0x3bf   : > { %v916_v43 = vpop.f32.mrf.mxu1 }
 0x3c0   : > { %v5356_v12 = vadd.f32 %v916_v43, %v4446_v16 }
 0x3c1   : > { %1282 = vmax.xlane.f32.xlu2 %v1281_v41  ;;  %v1304_v41 = vsub.f32 %v5024_v54, %v1172_v9  ;;  %v1196_v54 = vpop.xlane.xlu2 %1195 }
 0x3c2   : > { %6290 = vst [vmem:[#allocation40_spill] sm:$0xff] %v5356_v12 }
 0x3c3   : > { %1222 = vmax.xlane.f32.xlu1 %v1221_v10  ;;  %1246 = vmax.xlane.f32.xlu0 %v1245_v11  ;;  %v1357_v20 = vmul.f32 1.442695, %v1304_v41  ;;  %v5323_v11 = vadd.f32 %v5139_v0, %v4446_v16 }
 0x3c5   : > { %3938 = vpow2.f32 %v1357_v20 }
 0x3c7   : > { %v918_v46 = vpop.f32.mrf.mxu1 }
 0x3c8   : > { %v1312_v46 = vsub.f32 %v5040_v48, %v1196_v54  ;;  %v1263_v54 = vsel %vm1154_vm4, %v5340_v42, -inf }
 0x3c9   : > { %1261 = vmax.xlane.f32.xlu2 %v1260_v22  ;;  %v1202_v22 = vpop.xlane.xlu1 %1201  ;;  %v1199_v21 = vpop.xlane.xlu2 %1198 }
 0x3ca   : > { %v1373_v0 = vmul.f32 1.442695, %v1312_v46 }
 0x3cb   : > { %1249 = vmax.xlane.f32.xlu1 %v1248_v15  ;;  %1480 = vadd.xlane.f32.xlu0 %v1479_v5  ;;  %v1254_v15 = vsel %vm1154_vm4, %v5323_v11, -inf  ;;  %v1284_v5 = vsel %vm1154_vm4, %v5327_v45, -inf }
 0x3cc   : > { %3940 = vpow2.f32 %v1373_v0  ;;  %v1313_v0 = vsub.f32 %v5051_v47, %v1199_v21  ;;  %v507_v21 = vrot.slane %v4694_v13, 4 }
 0x3ce   : > { %v1375_v42 = vmul.f32 1.442695, %v1313_v0 }
 0x3cf   : > { %v5312_v35 = vpop.f32.mrf.mxu1 }
 0x3d1   : > { %1288 = vmax.xlane.f32.xlu2 %v1287_v3  ;;  %v1178_v3 = vpop.xlane.xlu0 %1177  ;;  %v5351_v46 = vpop.xlane.xlu1 %1183 }
 0x3d3   : > { %1252 = vmax.xlane.f32.xlu1 %v1251_v49  ;;  %1462 = vadd.xlane.f32.xlu0 %v1461_v57  ;;  %v5342_v49 = vpop.eup %3938  ;;  %v1306_v57 = vsub.f32 %v5007_v59, %v1178_v3 }
 0x3d4   : > { %v1458_v20 = vsel %vm1154_vm4, %v5342_v49, 0.0  ;;  %v5358_v59 = vpop.eup %3940 }
 0x3d5   : > { %v1145_v10 = vpop.f32.mrf.mxu3  ;;  %6291 = vst [vmem:[#allocation41_spill] sm:$0xff] %v5358_v59  ;;  %v1482_v23 = vsel %vm1154_vm4, %v5358_v59, 0.0 }
 0x3d7   : > { %v5329_v9 = vpop.f32.mrf.mxu1 }
 0x3d9   : > { %v1232_v28 = vpop.xlane.xlu1 %1231 }
 0x3db   : > { %1255 = vmax.xlane.f32.xlu1 %v1254_v15  ;;  %1285 = vmax.xlane.f32.xlu0 %v1284_v5  ;;  %v1361_v5 = vmul.f32 1.442695, %v1306_v57 }
 0x3dd   : > { %v5336_v41 = vpop.f32.mrf.mxu3 }
 0x3df   : > { %v5344_v48 = vpop.f32.mrf.mxu1 }
 0x3e0   : > { %6289 = vst [vmem:[#allocation39_spill] sm:$0xff] %v5344_v48 }
 0x3e3   : > { %v1448_v15 = vpop.xlane.xlu0 %1447  ;;  %1459 = vadd.xlane.f32.xlu1 %v1458_v20  ;;  %1264 = vmax.xlane.f32.xlu0 %v1263_v54  ;;  %v1242_v20 = vsel %vm1154_vm4, %v5356_v12, -inf  ;;  %v1324_v12 = vsub.f32 %v5120_v27, %v1232_v28 }
 0x3e4   : > { %3942 = vrcp.f32 %v1448_v15 }
 0x3e5   : > { %v5353_v2 = vpop.f32.mrf.mxu3  ;;  %3944 = vpow2.f32 %v1361_v5  ;;  %v5368_v5 = vadd.f32 %v1145_v10, %v4446_v16  ;;  %v2070_v10 = vunpack.c.l.b16 %v507_v21  ;;  %v1397_v13 = vmul.f32 1.442695, %v1324_v12 }
 0x3e6   : > { %v1308_v12 = vsub.f32 %v5103_v19, %v5351_v46 }
 0x3e7   : > { %v1074_v3 = vpop.f32.mrf.mxu1  ;;  %v2072_v21 = vpack.c.b16 %v2070_v10, %v2070_v10 }
 0x3e8   : > { %v1314_v3 = vsub.f32 %v5090_v33, %v1202_v22  ;;  %v1365_v19 = vmul.f32 1.442695, %v1308_v12 }
 0x3ea   : > { %v3943_v43 = vpop.eup %3942 }
 0x3eb   : > { %v5365_v54 = vpop.xlane.xlu0 %1228  ;;  %1483 = vadd.xlane.f32.xlu1 %v1482_v23  ;;  %1243 = vmax.xlane.f32.xlu0 %v1242_v20  ;;  %v5370_v47 = vpop.eup %3944  ;;  %v1636_v23 = vmul.f32 %v3943_v43, %v5144_v18  ;;  %v1290_v20 = vsel %vm1154_vm4, %v5368_v5, -inf  ;;  %v5384_v18 = vadd.f32 %v5220_v4, %v4446_v16  ;;  %v505_v43 = vrot.slane %v4648_v52, 4 }
 0x3ec   : > { %v1445_v57 = vpop.xlane.xlu2 %1444  ;;  %v1464_v0 = vsel %vm1154_vm4, %v5370_v47, 0.0 }
 0x3ed   : > { %3946 = vrcp.f32 %v1445_v57  ;;  %v1152_v15 = vpop.f32.mrf.mxu3  ;;  %v1684_v48 = vpack.c.bf16 %v1636_v23, %v1636_v23  ;;  %v1266_v4 = vsel %vm1154_vm4, %v5384_v18, -inf }
 0x3ee   : > { %3948 = vpow2.f32 %v1375_v42  ;;  %v1377_v15 = vmul.f32 1.442695, %v1314_v3 }
 0x3f3   : > { %v3947_v57 = vpop.eup %3946  ;;  %v1451_v59 = vpop.xlane.xlu0 %1450  ;;  %1465 = vadd.xlane.f32.xlu1 %v1464_v0  ;;  %1291 = vmax.xlane.f32.xlu0 %v1290_v20  ;;  %v2068_v20 = vunpack.c.l.b16 %v505_v43 }
 0x3f4   : > { %v1635_v33 = vmul.f32 %v3947_v57, %v5159_v14  ;;  %v1181_v28 = vpop.xlane.xlu2 %1180  ;;  %3950 = vrcp.f32 %v1451_v59  ;;  %v5386_v42 = vpop.eup %3948  ;;  %v1735_v14 = vunpack.c.l.b16 %v1684_v48  ;;  %v2081_v48 = vsel %vm1751_vm3, %v2072_v21, 0 }
 0x3f5   : > { %v1307_v27 = vsub.f32 %v5169_v6, %v1181_v28  ;;  %3952 = vpow2.f32 %v1377_v15  ;;  %v506_v6 = vrot.slane %v4646_v51, 4  ;;  %v1485_v0 = vsel %vm1154_vm4, %v5386_v42, 0.0 }
 0x3f6   : > { %v1683_v22 = vpack.c.bf16 %v1635_v33, %v1635_v33  ;;  %3954 = vpow2.f32 %v1397_v13 }
 0x3f7   : > { %v1363_v3 = vmul.f32 1.442695, %v1307_v27  ;;  %v2069_v10 = vunpack.c.l.b16 %v506_v6  ;;  %v5419_v6 = vadd.f32 %v5312_v35, %v4446_v16 }
 0x3f8   : > { %v1734_v59 = vunpack.c.l.b16 %v1683_v22 }
 0x3f9   : > { %3956 = vpow2.f32 %v1363_v3  ;;  %v2071_v22 = vpack.c.b16 %v2069_v10, %v2068_v20 }
 0x3fa   : > { %v1737_v23 = vpack.c.b16 %v1735_v14, %v1734_v59  ;;  %v3951_v52 = vpop.eup %3950  ;;  %3958 = vpow2.f32 %v1365_v19  ;;  %v1272_v19 = vsel %vm1154_vm4, %v5419_v6, -inf }
 0x3fb   : > { %v5396_v57 = vpop.xlane.xlu0 %1207  ;;  %1267 = vmax.xlane.f32.xlu1 %v1266_v4  ;;  %1486 = vadd.xlane.f32.xlu0 %v1485_v0  ;;  %v5400_v46 = vpop.eup %3952  ;;  %v1637_v33 = vmul.f32 %v3951_v52, %v5165_v17  ;;  %v1323_v0 = vsub.f32 %v5155_v53, %v5365_v54 }
 0x3fc   : > { %3521 = vmatmul.msk.bf16.vlgmr.msra.gmra.mxu0 %vm1154_vm4, %v1737_v23  ;;  %v1205_v51 = vpop.xlane.xlu2 %1204  ;;  %v5403_v13 = vpop.eup %3954  ;;  %v1488_v21 = vsel %vm1154_vm4, %v5400_v46, 0.0 }
 0x3fd   : > { %2089 = vmatpush.bf16.msra.mxu0 %v2081_v48  ;;  %v1315_v15 = vsub.f32 %v5180_v44, %v1205_v51  ;;  %v1518_v44 = vsel %vm1154_vm4, %v5403_v13, 0.0  ;;  %v1685_v3 = vpack.c.bf16 %v1637_v33, %v1637_v33  ;;  %v1395_v48 = vmul.f32 1.442695, %v1323_v0 }
 0x3fe   : > { %v5451_v0 = vadd.f32 %v5336_v41, %v4446_v16 }
 0x3ff   : > { %v5406_v28 = vpop.eup %3956  ;;  %v1379_v27 = vmul.f32 1.442695, %v1315_v15  ;;  %v1736_v23 = vunpack.c.l.b16 %v1685_v3 }
 0x400   : > { %v1467_v43 = vsel %vm1154_vm4, %v5406_v28, 0.0  ;;  %v5415_v59 = vpop.eup %3958 }
 0x401   : > { %3960 = vpow2.f32 %v1379_v27  ;;  %2090 = vmatpush.bf16.msra.mxu0 %v2071_v22  ;;  %1468 = vadd.xlane.f32.xlu2 %v1467_v43  ;;  %v1738_v35 = vpack.c.b16 %v1736_v23, %v1736_v23 }
 0x403   : > { %v1214_v12 = vpop.xlane.xlu0 %1213  ;;  %1489 = vadd.xlane.f32.xlu1 %v1488_v21  ;;  %1519 = vadd.xlane.f32.xlu0 %v1518_v44 }
 0x404   : > { %v1187_v17 = vpop.xlane.xlu2 %1186  ;;  %v1318_v15 = vsub.f32 %v5188_v29, %v1214_v12 }
 0x405   : > { %v1309_v14 = vsub.f32 %v5192_v60, %v1187_v17  ;;  %v1470_v60 = vsel %vm1154_vm4, %v5415_v59, 0.0 }
 0x406   : > { %v1385_v22 = vmul.f32 1.442695, %v1318_v15 }
 0x407   : > { %v5421_v4 = vpop.eup %3960  ;;  %v1367_v52 = vmul.f32 1.442695, %v1309_v14 }
 0x408   : > { %v1491_v20 = vsel %vm1154_vm4, %v5421_v4, 0.0 }
 0x409   : > { %3962 = vpow2.f32 %v1367_v52  ;;  %1492 = vadd.xlane.f32.xlu2 %v1491_v20 }
 0x40a   : > { %3964 = vpow2.f32 %v1395_v48  ;;  %v1293_v48 = vsel %vm1154_vm4, %v5451_v0, -inf }
 0x40b   : > { %v1190_v51 = vpop.xlane.xlu0 %1189  ;;  %1471 = vadd.xlane.f32.xlu1 %v1470_v60  ;;  %1273 = vmax.xlane.f32.xlu0 %v1272_v19 }
 0x40c   : > { %3522 = vmatmul.msk.bf16.gmra.mxu0 %vm1154_vm4, %v1738_v35  ;;  %v1211_v53 = vpop.xlane.xlu2 %1210 }
 0x40d   : > { %v1317_v54 = vsub.f32 %v5205_v7, %v1211_v53  ;;  %v1310_v7 = vsub.f32 %v5201_v26, %v1190_v51  ;;  %v510_v26 = vrot.slane %v4793_v24, 4 }
 0x40f   : > { %v5433_v10 = vpop.eup %3962  ;;  %v1383_v33 = vmul.f32 1.442695, %v1317_v54  ;;  %v1369_v17 = vmul.f32 1.442695, %v1310_v7  ;;  %v2111_v51 = vunpack.c.l.b16 %v510_v26  ;;  %v508_v7 = vrot.slane %v4805_v39, 4 }
 0x410   : > { %v1473_v27 = vsel %vm1154_vm4, %v5433_v10, 0.0  ;;  %v5440_v44 = vpop.eup %3964 }
 0x411   : > { %3966 = vpow2.f32 %v1383_v33  ;;  %1474 = vadd.xlane.f32.xlu2 %v1473_v27  ;;  %v1515_v29 = vsel %vm1154_vm4, %v5440_v44, 0.0  ;;  %v2113_v27 = vpack.c.b16 %v2111_v51, %v2111_v51 }
 0x413   : > { %v5438_v43 = vpop.xlane.xlu0 %1234 }
 0x414   : > { %v1454_v21 = vpop.xlane.xlu2 %1453 }
 0x415   : > { %3968 = vrcp.f32 %v1454_v21 }
 0x416   : > { %3970 = vpow2.f32 %v1385_v22 }
 0x417   : > { %v5442_v3 = vpop.eup %3966 }
 0x418   : > { %v1497_v12 = vsel %vm1154_vm4, %v5442_v3, 0.0 }
 0x419   : > { %1516 = vadd.xlane.f32.xlu2 %v1515_v29  ;;  %1498 = vadd.xlane.f32.xlu1 %v1497_v12 }
 0x41b   : > { %v1457_v14 = vpop.xlane.xlu0 %1456  ;;  %v3969_v23 = vpop.eup %3968 }
 0x41c   : > { %3972 = vrcp.f32 %v1457_v14  ;;  %v1217_v52 = vpop.xlane.xlu2 %1216  ;;  %v5453_v20 = vpop.eup %3970  ;;  %v1638_v60 = vmul.f32 %v3969_v23, %v5218_v31  ;;  %v509_v31 = vrot.slane %v4853_v62, 4  ;;  %v2109_v14 = vunpack.c.l.b16 %v508_v7 }
 0x41d   : > { %3974 = vpow2.f32 %v1369_v17  ;;  %v1319_v19 = vsub.f32 %v5230_v1, %v1217_v52  ;;  %v1500_v35 = vsel %vm1154_vm4, %v5453_v20, 0.0 }
 0x41e   : > { %v1686_v53 = vpack.c.bf16 %v1638_v60, %v1638_v60  ;;  %v2110_v17 = vunpack.c.l.b16 %v509_v31 }
 0x41f   : > { %v1387_v15 = vmul.f32 1.442695, %v1319_v19 }
 0x420   : > { %v1776_v22 = vunpack.c.l.b16 %v1686_v53  ;;  %v2112_v26 = vpack.c.b16 %v2110_v17, %v2109_v14 }
 0x421   : > { %1501 = vadd.xlane.f32.xlu2 %v1500_v35  ;;  %1294 = vmax.xlane.f32.xlu1 %v1293_v48  ;;  %3976 = vpow2.f32 %v1387_v15 }
 0x422   : > { %v3973_v41 = vpop.eup %3972 }
 0x423   : > { %v1639_v54 = vmul.f32 %v3973_v41, %v5226_v36  ;;  %v5463_v24 = vpop.eup %3974  ;;  %v2122_v36 = vsel %vm1751_vm3, %v2113_v27, 0 }
 0x424   : > { %v1476_v29 = vsel %vm1154_vm4, %v5463_v24, 0.0 }
 0x425   : > { %v1687_v33 = vpack.c.bf16 %v1639_v54, %v1639_v54  ;;  %v1226_v54 = vpop.xlane.xlu2 %1225 }
 0x426   : > { %v1238_v1 = vpop.xlane.xlu0 %1237 }
 0x427   : > { %v1777_v21 = vunpack.c.l.b16 %v1687_v33  ;;  %v5471_v62 = vpop.eup %3976  ;;  %v1326_v15 = vsub.f32 %v5243_v37, %v1238_v1  ;;  %v1322_v37 = vsub.f32 %v5240_v55, %v1226_v54 }
 0x428   : > { %v1503_v60 = vsel %vm1154_vm4, %v5471_v62, 0.0 }
 0x429   : > { %v1779_v12 = vpack.c.b16 %v1777_v21, %v1776_v22  ;;  %1477 = vadd.xlane.f32.xlu2 %v1476_v29  ;;  %v1401_v27 = vmul.f32 1.442695, %v1326_v15  ;;  %v5487_v22 = vadd.f32 %v5329_v9, %v4446_v16 }
 0x42b   : > { %3523 = vmatmul.msk.bf16.vlgmr.msrb.gmra.mxu1 %vm1154_vm4, %v1779_v12  ;;  %v1316_v12 = vsub.f32 %v5176_v61, %v5396_v57  ;;  %v1275_v9 = vsel %vm1154_vm4, %v5487_v22, -inf  ;;  %v5511_v57 = vadd.f32 %v5232_v38, %v4446_v16 }
 0x42c   : > { %2130 = vmatpush.bf16.msrb.mxu1 %v2122_v36 }
 0x42d   : > { %v1259_v36 = vpop.xlane.xlu2 %1258  ;;  %v1381_v14 = vmul.f32 1.442695, %v1316_v12  ;;  %v1269_v38 = vsel %vm1154_vm4, %v5511_v57, -inf }
 0x42e   : > { %v1220_v23 = vpop.xlane.xlu0 %1219  ;;  %v5473_v52 = vpop.xlane.xlu1 %1240 }
 0x42f   : > { %v1320_v39 = vsub.f32 %v5255_v30, %v1220_v23 }
 0x430   : > { %2131 = vmatpush.bf16.msrb.mxu1 %v2112_v26 }
 0x431   : > { %v1389_v19 = vmul.f32 1.442695, %v1320_v39  ;;  %1504 = vadd.xlane.f32.xlu2 %v1503_v60 }
 0x433   : > { %3978 = vpow2.f32 %v1389_v19 }
 0x436   : > { %v1247_v35 = vpop.xlane.xlu0 %1246  ;;  %v1223_v48 = vpop.xlane.xlu1 %1222 }
 0x437   : > { %v1329_v41 = vsub.f32 %v5273_v32, %v1247_v35  ;;  %v1321_v51 = vsub.f32 %v5277_v40, %v1223_v48  ;;  %v1325_v35 = vsub.f32 %v5216_v8, %v5438_v43 }
 0x439   : > { %v5480_v53 = vpop.eup %3978  ;;  %v1407_v33 = vmul.f32 1.442695, %v1329_v41  ;;  %v1391_v30 = vmul.f32 1.442695, %v1321_v51  ;;  %v1399_v51 = vmul.f32 1.442695, %v1325_v35 }
 0x43a   : > { %v1506_v31 = vsel %vm1154_vm4, %v5480_v53, 0.0 }
 0x43b   : > { %3980 = vpow2.f32 %v1407_v33  ;;  %1507 = vadd.xlane.f32.xlu1 %v1506_v31 }
 0x43c   : > { %3982 = vpow2.f32 %v1391_v30  ;;  %v1333_v30 = vsub.f32 %v5251_v56, %v1259_v36  ;;  %v5541_v56 = vadd.f32 %v5353_v2, %v4446_v16 }
 0x43d   : > { %3984 = vpow2.f32 %v1401_v27 }
 0x43e   : > { %v5489_v32 = vpop.xlane.xlu0 %1480  ;;  %v1250_v40 = vpop.xlane.xlu1 %1249 }
 0x43f   : > { %v1330_v21 = vsub.f32 %v5292_v25, %v1250_v40  ;;  %v1393_v25 = vmul.f32 1.442695, %v1322_v37 }
 0x441   : > { %v5492_v7 = vpop.eup %3980  ;;  %v1409_v1 = vmul.f32 1.442695, %v1330_v21 }
 0x442   : > { %v5495_v29 = vpop.eup %3982  ;;  %v1533_v17 = vsel %vm1154_vm4, %v5492_v7, 0.0 }
 0x443   : > { %3986 = vpow2.f32 %v1409_v1  ;;  %1276 = vmax.xlane.f32.xlu1 %v1275_v9  ;;  %1534 = vadd.xlane.f32.xlu0 %v1533_v17  ;;  %v1509_v55 = vsel %vm1154_vm4, %v5495_v29, 0.0  ;;  %v5507_v61 = vpop.eup %3984 }
 0x444   : > { %1510 = vadd.xlane.f32.xlu2 %v1509_v55  ;;  %3988 = vpow2.f32 %v1393_v25  ;;  %v1524_v48 = vsel %vm1154_vm4, %v5507_v61, 0.0 }
 0x445   : > { %3990 = vpow2.f32 %v1381_v14 }
 0x446   : > { %v5505_v23 = vpop.xlane.xlu0 %1462  ;;  %v1253_v26 = vpop.xlane.xlu1 %1252 }
 0x447   : > { %v1331_v39 = vsub.f32 %v5308_v34, %v1253_v26  ;;  %v1283_v34 = vpop.xlane.xlu2 %1282 }
 0x448   : > { %v1341_v25 = vsub.f32 %v5269_v58, %v1283_v34  ;;  %v6292_v34 = vld [vmem:[#allocation39_spill] sm:$0xff] }
 0x449   : > { %v5514_v60 = vpop.eup %3986  ;;  %v1411_v19 = vmul.f32 1.442695, %v1331_v39 }
 0x44a   : > { %v1536_v41 = vsel %vm1154_vm4, %v5514_v60, 0.0  ;;  %v5524_v33 = vpop.eup %3988 }
 0x44b   : > { %3992 = vpow2.f32 %v1411_v19  ;;  %1525 = vadd.xlane.f32.xlu0 %v1524_v48  ;;  %1537 = vadd.xlane.f32.xlu1 %v1536_v41  ;;  %v5527_v43 = vpop.eup %3990  ;;  %v1512_v21 = vsel %vm1154_vm4, %v5524_v33, 0.0  ;;  %v1431_v19 = vmul.f32 1.442695, %v1341_v25 }
 0x44c   : > { %1270 = vmax.xlane.f32.xlu2 %v1269_v38  ;;  %3994 = vpow2.f32 %v1399_v51  ;;  %v1494_v1 = vsel %vm1154_vm4, %v5527_v43, 0.0  ;;  %v5563_v51 = vadd.f32 %v6292_v34, %v4446_v16 }
 0x44e   : > { %v1286_v54 = vpop.xlane.xlu0 %1285  ;;  %v1256_v15 = vpop.xlane.xlu1 %1255 }
 0x44f   : > { %v1332_v8 = vsub.f32 %v5323_v11, %v1256_v15  ;;  %v1342_v40 = vsub.f32 %v5327_v45, %v1286_v54  ;;  %v1415_v11 = vmul.f32 1.442695, %v1333_v30  ;;  %v1327_v45 = vsub.f32 %v5258_v50, %v5473_v52  ;;  %v1262_v36 = vpop.xlane.xlu2 %1261  ;;  %v6293_v15 = vld [vmem:[#allocation26_spill] sm:$0xff] }
 0x450   : > { %v1334_v2 = vsub.f32 %v5288_v63, %v1262_v36  ;;  %v1296_v50 = vsel %vm1154_vm4, %v5541_v56, -inf }
 0x451   : > { %v5530_v31 = vpop.eup %3992  ;;  %v1413_v27 = vmul.f32 1.442695, %v1332_v8  ;;  %v1433_v12 = vmul.f32 1.442695, %v1342_v40  ;;  %v1403_v26 = vmul.f32 1.442695, %v1327_v45 }
 0x452   : > { %v1539_v37 = vsel %vm1154_vm4, %v5530_v31, 0.0  ;;  %v5545_v55 = vpop.eup %3994  ;;  %v1417_v35 = vmul.f32 1.442695, %v1334_v2  ;;  %v519_v8 = vrot.slane %v6293_v15, 4  ;;  %v6296_v2 = vld [vmem:[#allocation41_spill] sm:$0xff]  ;;  %v6298_v15 = vld [vmem:[#allocation28_spill] sm:$0xff] }
 0x453   : > { %1513 = vadd.xlane.f32.xlu1 %v1512_v21  ;;  %1540 = vadd.xlane.f32.xlu0 %v1539_v37  ;;  %3996 = vpow2.f32 %v1413_v27  ;;  %v1521_v52 = vsel %vm1154_vm4, %v5545_v55, 0.0  ;;  %v6294_v27 = vld [vmem:[#allocation38_spill] sm:$0xff] }
 0x454   : > { %1495 = vadd.xlane.f32.xlu2 %v1494_v1 }
 0x456   : > { %v1265_v9 = vpop.xlane.xlu0 %1264  ;;  %v1460_v17 = vpop.xlane.xlu1 %1459 }
 0x457   : > { %3998 = vrcp.f32 %v1460_v17  ;;  %v1335_v40 = vsub.f32 %v6294_v27, %v1265_v9  ;;  %v2234_v17 = vunpack.c.l.b16 %v519_v8  ;;  %v517_v8 = vrot.slane %v6298_v15, 4 }
 0x458   : > { %4000 = vpow2.f32 %v1415_v11  ;;  %v1278_v11 = vsel %vm1154_vm4, %v5563_v51, -inf }
 0x459   : > { %4002 = vrcp.f32 %v5489_v32  ;;  %v5549_v14 = vpop.eup %3996  ;;  %v1419_v36 = vmul.f32 1.442695, %v1335_v40 }
 0x45a   : > { %4004 = vpow2.f32 %v1433_v12  ;;  %v1542_v39 = vsel %vm1154_vm4, %v5549_v14, 0.0 }
 0x45b   : > { %1297 = vmax.xlane.f32.xlu1 %v1296_v50  ;;  %1543 = vadd.xlane.f32.xlu0 %v1542_v39  ;;  %4006 = vpow2.f32 %v1403_v26 }
 0x45c   : > { %1522 = vadd.xlane.f32.xlu2 %v1521_v52 }
 0x45d   : > { %v3999_v58 = vpop.eup %3998 }
 0x45e   : > { %v5558_v32 = vpop.eup %4000  ;;  %v1640_v63 = vmul.f32 %v3999_v58, %v5342_v49  ;;  %v1244_v48 = vpop.xlane.xlu0 %1243  ;;  %v6295_v49 = vld [vmem:[#allocation35_spill] sm:$0xff] }
 0x45f   : > { %v1484_v41 = vpop.xlane.xlu1 %1483  ;;  %v4003_v38 = vpop.eup %4002  ;;  %v1545_v37 = vsel %vm1154_vm4, %v5558_v32, 0.0 }
 0x460   : > { %4008 = vrcp.f32 %v1484_v41  ;;  %v5565_v54 = vpop.eup %4004  ;;  %v1688_v30 = vpack.c.bf16 %v1640_v63, %v1640_v63  ;;  %v1647_v21 = vmul.f32 %v4003_v38, %v6295_v49  ;;  %v6297_v63 = vld [vmem:[#allocation19_spill] sm:$0xff]  ;;  %v2236_v38 = vpack.c.b16 %v2234_v17, %v2234_v17 }
 0x461   : > { %4010 = vpow2.f32 %v1431_v19  ;;  %v1572_v45 = vsel %vm1154_vm4, %v5565_v54, 0.0  ;;  %v5577_v12 = vpop.eup %4006  ;;  %v513_v41 = vrot.slane %v6297_v63, 4 }
 0x462   : > { %4012 = vrcp.f32 %v5505_v23  ;;  %v1778_v1 = vunpack.c.l.b16 %v1688_v30  ;;  %v1695_v26 = vpack.c.bf16 %v1647_v21, %v1647_v21  ;;  %v6299_v30 = vld [vmem:[#allocation40_spill] sm:$0xff]  ;;  %v6300_v21 = vld [vmem:[#allocation37_spill] sm:$0xff] }
 0x463   : > { %4014 = vpow2.f32 %v1417_v35  ;;  %1546 = vadd.xlane.f32.xlu1 %v1545_v37  ;;  %1573 = vadd.xlane.f32.xlu0 %v1572_v45  ;;  %v1328_v27 = vsub.f32 %v6299_v30, %v1244_v48  ;;  %v1289_v48 = vpop.xlane.xlu2 %1288  ;;  %v6302_v30 = vld [vmem:[#allocation18_spill] sm:$0xff] }
 0x464   : > { %1279 = vmax.xlane.f32.xlu2 %v1278_v11  ;;  %v1780_v23 = vpack.c.b16 %v1778_v1, %v1778_v1  ;;  %v1899_v49 = vunpack.c.l.b16 %v1695_v26  ;;  %v6301_v11 = vld [vmem:[#allocation27_spill] sm:$0xff] }
 0x465   : > { %v518_v45 = vrot.slane %v6301_v11, 4 }
 0x466   : > { %v4009_v9 = vpop.eup %4008  ;;  %v1292_v52 = vpop.xlane.xlu0 %1291  ;;  %3524 = vmatmul.msk.bf16.gmra.mxu1 %vm1154_vm4, %v1780_v23 }
 0x467   : > { %v5579_v25 = vpop.eup %4010  ;;  %v1648_v50 = vmul.f32 %v4009_v9, %v6296_v2  ;;  %v1466_v39 = vpop.xlane.xlu1 %1465  ;;  %v1344_v58 = vsub.f32 %v5368_v5, %v1292_v52  ;;  %v1527_v5 = vsel %vm1154_vm4, %v5577_v12, 0.0  ;;  %v2152_v9 = vunpack.c.l.b16 %v513_v41 }
 0x468   : > { %v4013_v19 = vpop.eup %4012  ;;  %4016 = vrcp.f32 %v1466_v39  ;;  %v1569_v17 = vsel %vm1154_vm4, %v5579_v25, 0.0  ;;  %v2232_v2 = vunpack.c.l.b16 %v517_v8  ;;  %v2233_v15 = vunpack.c.l.b16 %v518_v45 }
 0x469   : > { %v5584_v35 = vpop.eup %4014  ;;  %v1696_v34 = vpack.c.bf16 %v1648_v50, %v1648_v50  ;;  %4018 = vpow2.f32 %v1419_v36  ;;  %v1437_v40 = vmul.f32 1.442695, %v1344_v58  ;;  %v1641_v37 = vmul.f32 %v4013_v19, %v6300_v21 }
 0x46a   : > { %v1548_v23 = vsel %vm1154_vm4, %v5584_v35, 0.0  ;;  %v1405_v50 = vmul.f32 1.442695, %v1328_v27  ;;  %v2245_v58 = vsel %vm1751_vm3, %v2236_v38, 0  ;;  %v2154_v8 = vpack.c.b16 %v2152_v9, %v2152_v9 }
 0x46b   : > { %v1900_v1 = vunpack.c.l.b16 %v1696_v34  ;;  %4020 = vpow2.f32 %v1437_v40  ;;  %1528 = vadd.xlane.f32.xlu1 %v1527_v5  ;;  %1549 = vadd.xlane.f32.xlu0 %v1548_v23  ;;  %v1689_v52 = vpack.c.bf16 %v1641_v37, %v1641_v37  ;;  %v512_v40 = vrot.slane %v6302_v30, 4 }
 0x46c   : > { %1570 = vadd.xlane.f32.xlu2 %v1569_v17 }
 0x46d   : > { %v1902_v36 = vpack.c.b16 %v1900_v1, %v1899_v49  ;;  %v2235_v1 = vpack.c.b16 %v2233_v15, %v2232_v2  ;;  %v1817_v38 = vunpack.c.l.b16 %v1689_v52 }
 0x46e   : > { %v4017_v26 = vpop.eup %4016  ;;  %v1487_v19 = vpop.xlane.xlu0 %1486 }
 0x46f   : > { %v1642_v39 = vmul.f32 %v4017_v26, %v5370_v47  ;;  %3529 = vmatmul.msk.bf16.vlgmr.msrb.gmra.mxu0 %vm1154_vm4, %v1902_v36  ;;  %v1268_v63 = vpop.xlane.xlu1 %1267  ;;  %v5600_v34 = vpop.eup %4018  ;;  %4022 = vrcp.f32 %v1487_v19  ;;  %v6303_v47 = vld [vmem:[#allocation36_spill] sm:$0xff]  ;;  %v2151_v36 = vunpack.c.l.b16 %v512_v40 }
 0x470   : > { %2253 = vmatpush.bf16.msrb.mxu0 %v2245_v58  ;;  %v1336_v41 = vsub.f32 %v5384_v18, %v1268_v63  ;;  %v1343_v21 = vsub.f32 %v6303_v47, %v1289_v48  ;;  %4024 = vpow2.f32 %v1405_v50  ;;  %v1551_v11 = vsel %vm1154_vm4, %v5600_v34, 0.0  ;;  %v6304_v18 = vld [vmem:[#allocation17_spill] sm:$0xff] }
 0x471   : > { %v1690_v27 = vpack.c.bf16 %v1642_v39, %v1642_v39  ;;  %v5604_v49 = vpop.eup %4020  ;;  %v511_v17 = vrot.slane %v6304_v18, 4  ;;  %v2163_v50 = vsel %vm1751_vm3, %v2154_v8, 0 }
 0x472   : > { %v1421_v37 = vmul.f32 1.442695, %v1336_v41  ;;  %v1578_v45 = vsel %vm1154_vm4, %v5604_v49, 0.0  ;;  %v1435_v26 = vmul.f32 1.442695, %v1343_v21 }
 0x473   : > { %v1818_v5 = vunpack.c.l.b16 %v1690_v27  ;;  %1552 = vadd.xlane.f32.xlu1 %v1551_v11  ;;  %1579 = vadd.xlane.f32.xlu0 %v1578_v45  ;;  %v2150_v58 = vunpack.c.l.b16 %v511_v17  ;;  %v6305_v17 = vld [vmem:[#allocation31_spill] sm:$0xff] }
 0x474   : > { %4026 = vpow2.f32 %v1421_v37  ;;  %2254 = vmatpush.bf16.msrb.mxu0 %v2235_v1  ;;  %v1469_v9 = vpop.xlane.xlu2 %1468 }
 0x475   : > { %v1820_v23 = vpack.c.b16 %v1818_v5, %v1817_v38  ;;  %v4023_v48 = vpop.eup %4022  ;;  %4028 = vrcp.f32 %v1469_v9  ;;  %v2153_v30 = vpack.c.b16 %v2151_v36, %v2150_v58 }
 0x476   : > { %v1520_v2 = vpop.xlane.xlu0 %1519  ;;  %v1649_v39 = vmul.f32 %v4023_v48, %v5386_v42  ;;  %v5615_v19 = vpop.eup %4024 }
 0x477   : > { %3525 = vmatmul.msk.bf16.vlgmr.msrb.gmra.mxu2 %vm1154_vm4, %v1820_v23  ;;  %v1490_v52 = vpop.xlane.xlu1 %1489  ;;  %v1530_v40 = vsel %vm1154_vm4, %v5615_v19, 0.0  ;;  %v522_v23 = vrot.slane %v6305_v17, 4 }
 0x478   : > { %2171 = vmatpush.bf16.msrb.mxu2 %v2163_v50  ;;  %4030 = vrcp.f32 %v1490_v52  ;;  %v1697_v63 = vpack.c.bf16 %v1649_v39, %v1649_v39 }
 0x479   : > { %v5619_v41 = vpop.f32.mrf.mxu0  ;;  %4032 = vpow2.f32 %v1435_v26  ;;  %v2275_v52 = vunpack.c.l.b16 %v522_v23 }
 0x47a   : > { %v5617_v15 = vpop.eup %4026  ;;  %v1901_v27 = vunpack.c.l.b16 %v1697_v63 }
 0x47b   : > { %v1554_v8 = vsel %vm1154_vm4, %v5617_v15, 0.0  ;;  %v4029_v42 = vpop.eup %4028  ;;  %1531 = vadd.xlane.f32.xlu1 %v1530_v40 }
 0x47c   : > { %2172 = vmatpush.bf16.msrb.mxu2 %v2153_v30  ;;  %1555 = vadd.xlane.f32.xlu2 %v1554_v8  ;;  %v1493_v47 = vpop.xlane.xlu2 %1492  ;;  %v1903_v21 = vpack.c.b16 %v1901_v27, %v1901_v27  ;;  %v1643_v37 = vmul.f32 %v4029_v42, %v5406_v28  ;;  %v6307_v27 = vld [vmem:[#allocation33_spill] sm:$0xff] }
 0x47d   : > { %4034 = vrcp.f32 %v1493_v47  ;;  %v521_v42 = vrot.slane %v6307_v27, 4  ;;  %v6308_v47 = vld [vmem:[#allocation34_spill] sm:$0xff] }
 0x47e   : > { %v4031_v1 = vpop.eup %4030  ;;  %v1274_v38 = vpop.xlane.xlu0 %1273  ;;  %v1691_v11 = vpack.c.bf16 %v1643_v37, %v1643_v37  ;;  %v2277_v37 = vpack.c.b16 %v2275_v52, %v2275_v52 }
 0x47f   : > { %3530 = vmatmul.msk.bf16.gmra.mxu0 %vm1154_vm4, %v1903_v21  ;;  %v1472_v5 = vpop.xlane.xlu1 %1471  ;;  %v1338_v45 = vsub.f32 %v5419_v6, %v1274_v38  ;;  %v5628_v18 = vpop.eup %4032  ;;  %v1650_v9 = vmul.f32 %v4031_v1, %v5400_v46  ;;  %v6306_v46 = vld [vmem:[#allocation22_spill] sm:$0xff]  ;;  %v520_v21 = vrot.slane %v6308_v47, 4 }
 0x480   : > { %4036 = vrcp.f32 %v1472_v5  ;;  %v1819_v48 = vunpack.c.l.b16 %v1691_v11  ;;  %v1575_v50 = vsel %vm1154_vm4, %v5628_v18, 0.0  ;;  %v516_v8 = vrot.slane %v6306_v46, 4 }
 0x481   : > { %v1425_v36 = vmul.f32 1.442695, %v1338_v45  ;;  %v5632_v26 = vpop.f32.mrf.mxu0  ;;  %v1698_v39 = vpack.c.bf16 %v1650_v9, %v1650_v9  ;;  %v2274_v9 = vunpack.c.l.b16 %v521_v42 }
 0x482   : > { %v1821_v63 = vpack.c.b16 %v1819_v48, %v1819_v48  ;;  %v2273_v48 = vunpack.c.l.b16 %v520_v21 }
 0x483   : > { %v4035_v28 = vpop.eup %4034  ;;  %4038 = vpow2.f32 %v1425_v36  ;;  %v1940_v1 = vunpack.c.l.b16 %v1698_v39  ;;  %v2193_v36 = vunpack.c.l.b16 %v516_v8 }
 0x484   : > { %v1651_v6 = vmul.f32 %v4035_v28, %v5421_v4  ;;  %1576 = vadd.xlane.f32.xlu2 %v1575_v50  ;;  %v1475_v58 = vpop.xlane.xlu2 %1474 }
 0x485   : > { %4040 = vrcp.f32 %v1475_v58  ;;  %v6309_v58 = vld [vmem:[#allocation21_spill] sm:$0xff] }
 0x486   : > { %v4037_v30 = vpop.eup %4036  ;;  %v1699_v40 = vpack.c.bf16 %v1651_v6, %v1651_v6  ;;  %4042 = vrcp.f32 %v1520_v2 }
 0x487   : > { %3526 = vmatmul.msk.bf16.gmra.mxu2 %vm1154_vm4, %v1821_v63  ;;  %v1644_v4 = vmul.f32 %v4037_v30, %v5415_v59  ;;  %v2286_v59 = vsel %vm1751_vm3, %v2277_v37, 0  ;;  %v514_v63 = vrot.slane %v6309_v58, 4  ;;  %v2276_v30 = vpack.c.b16 %v2274_v9, %v2273_v48 }
 0x488   : > { %v1941_v38 = vunpack.c.l.b16 %v1699_v40  ;;  %v2195_v40 = vpack.c.b16 %v2193_v36, %v2193_v36 }
 0x489   : > { %v5642_v5 = vpop.eup %4038  ;;  %v5644_v11 = vpop.f32.mrf.mxu0  ;;  %v1692_v28 = vpack.c.bf16 %v1644_v4, %v1644_v4  ;;  %v2191_v37 = vunpack.c.l.b16 %v514_v63 }
 0x48a   : > { %v1943_v45 = vpack.c.b16 %v1941_v38, %v1940_v1  ;;  %v1560_v17 = vsel %vm1154_vm4, %v5642_v5, 0.0 }
 0x48b   : > { %v4041_v23 = vpop.eup %4040  ;;  %1561 = vadd.xlane.f32.xlu0 %v1560_v17  ;;  %v1858_v8 = vunpack.c.l.b16 %v1692_v28  ;;  %v2204_v17 = vsel %vm1751_vm3, %v2195_v40, 0 }
 0x48c   : > { %v1645_v2 = vmul.f32 %v4041_v23, %v5433_v10  ;;  %v1517_v50 = vpop.xlane.xlu2 %1516  ;;  %v1499_v52 = vpop.xlane.xlu1 %1498  ;;  %3531 = vmatmul.msk.bf16.vlgmr.msra.gmra.mxu1 %vm1154_vm4, %v1943_v45  ;;  %v6310_v10 = vld [vmem:[#allocation20_spill] sm:$0xff] }
 0x48d   : > { %v4043_v39 = vpop.eup %4042  ;;  %4044 = vrcp.f32 %v1517_v50  ;;  %2294 = vmatpush.bf16.msra.mxu1 %v2286_v59  ;;  %v515_v42 = vrot.slane %v6310_v10, 4  ;;  %v6311_v50 = vld [vmem:[#allocation23_spill] sm:$0xff] }
 0x48e   : > { %v1693_v6 = vpack.c.bf16 %v1645_v2, %v1645_v2  ;;  %4046 = vrcp.f32 %v1499_v52  ;;  %v1660_v46 = vmul.f32 %v4043_v39, %v5403_v13  ;;  %v525_v52 = vrot.slane %v6311_v50, 4 }
 0x48f   : > { %v2192_v13 = vunpack.c.l.b16 %v515_v42 }
 0x490   : > { %v1859_v27 = vunpack.c.l.b16 %v1693_v6  ;;  %v1708_v38 = vpack.c.bf16 %v1660_v46, %v1660_v46  ;;  %v2316_v63 = vunpack.c.l.b16 %v525_v52 }
 0x491   : > { %2295 = vmatpush.bf16.msra.mxu1 %v2276_v30  ;;  %v1771_v47 = vpop.f32.mrf.mxu0  ;;  %v2194_v2 = vpack.c.b16 %v2192_v13, %v2191_v37 }
 0x492   : > { %v1861_v21 = vpack.c.b16 %v1859_v27, %v1858_v8  ;;  %v2064_v59 = vunpack.c.l.b16 %v1708_v38  ;;  %v6312_v27 = vld [vmem:[#allocation25_spill] sm:$0xff]  ;;  %v2318_v42 = vpack.c.b16 %v2316_v63, %v2316_v63 }
 0x493   : > { %v4045_v1 = vpop.eup %4044  ;;  %v524_v10 = vrot.slane %v6312_v27, 4 }
 0x494   : > { %v1659_v4 = vmul.f32 %v4045_v1, %v5440_v44  ;;  %v1502_v45 = vpop.xlane.xlu2 %1501  ;;  %3527 = vmatmul.msk.bf16.vlgmr.msrb.gmra.mxu3 %vm1154_vm4, %v1861_v21  ;;  %v1295_v23 = vpop.xlane.xlu1 %1294  ;;  %v6313_v1 = vld [vmem:[#allocation24_spill] sm:$0xff] }
 0x495   : > { %v4047_v9 = vpop.eup %4046  ;;  %4048 = vrcp.f32 %v1502_v45  ;;  %2212 = vmatpush.bf16.msrb.mxu3 %v2204_v17  ;;  %v1345_v48 = vsub.f32 %v5451_v0, %v1295_v23  ;;  %v523_v37 = vrot.slane %v6313_v1, 4  ;;  %v2327_v17 = vsel %vm1751_vm3, %v2318_v42, 0 }
 0x496   : > { %v1707_v36 = vpack.c.bf16 %v1659_v4, %v1659_v4  ;;  %v1653_v44 = vmul.f32 %v4047_v9, %v5442_v3  ;;  %v2315_v4 = vunpack.c.l.b16 %v524_v10 }
 0x497   : > { %v1439_v28 = vmul.f32 1.442695, %v1345_v48  ;;  %v2314_v9 = vunpack.c.l.b16 %v523_v37 }
 0x498   : > { %v2063_v39 = vunpack.c.l.b16 %v1707_v36  ;;  %v1701_v30 = vpack.c.bf16 %v1653_v44, %v1653_v44 }
 0x499   : > { %4050 = vpow2.f32 %v1439_v28  ;;  %2213 = vmatpush.bf16.msrb.mxu3 %v2194_v2  ;;  %v2317_v48 = vpack.c.b16 %v2315_v4, %v2314_v9  ;;  %v6315_v4 = vld [vmem:[#allocation32_spill] sm:$0xff] }
 0x49a   : > { %v2066_v6 = vpack.c.b16 %v2064_v59, %v2063_v39  ;;  %v1981_v47 = vunpack.c.l.b16 %v1701_v30 }
 0x49b   : > { %v4049_v58 = vpop.eup %4048 }
 0x49c   : > { %v1654_v40 = vmul.f32 %v4049_v58, %v5453_v20  ;;  %v1478_v46 = vpop.xlane.xlu2 %1477  ;;  %3537 = vmatmul.msk.bf16.vlgmr.msra.gmra.mxu0 %vm1154_vm4, %v2066_v6 }
 0x49d   : > { %4052 = vrcp.f32 %v1478_v46  ;;  %v6314_v46 = vld [vmem:[#allocation30_spill] sm:$0xff] }
 0x49e   : > { %v1702_v0 = vpack.c.bf16 %v1654_v40, %v1654_v40 }
 0x49f   : > { %v5662_v8 = vpop.eup %4050 }
 0x4a0   : > { %v1982_v3 = vunpack.c.l.b16 %v1702_v0  ;;  %v1581_v21 = vsel %vm1154_vm4, %v5662_v8, 0.0 }
 0x4a1   : > { %1582 = vadd.xlane.f32.xlu1 %v1581_v21 }
 0x4a2   : > { %v1984_v38 = vpack.c.b16 %v1982_v3, %v1981_v47 }
 0x4a3   : > { %v4053_v20 = vpop.eup %4052 }
 0x4a4   : > { %v1505_v45 = vpop.xlane.xlu2 %1504  ;;  %3533 = vmatmul.msk.bf16.vlgmr.msra.gmra.mxu2 %vm1154_vm4, %v1984_v38  ;;  %v1646_v23 = vmul.f32 %v4053_v20, %v5463_v24 }
 0x4a5   : > { %4054 = vrcp.f32 %v1505_v45  ;;  %2335 = vmatpush.bf16.msra.mxu2 %v2327_v17  ;;  %v527_v45 = vrot.slane %v6315_v4, 4 }
 0x4a6   : > { %v1694_v13 = vpack.c.bf16 %v1646_v23, %v1646_v23 }
 0x4a8   : > { %v1860_v36 = vunpack.c.l.b16 %v1694_v13 }
 0x4a9   : > { %2336 = vmatpush.bf16.msra.mxu2 %v2317_v48 }
 0x4aa   : > { %v1862_v28 = vpack.c.b16 %v1860_v36, %v1860_v36 }
 0x4ab   : > { %v4055_v2 = vpop.eup %4054 }
 0x4ac   : > { %v1655_v50 = vmul.f32 %v4055_v2, %v5471_v62  ;;  %3528 = vmatmul.msk.bf16.gmra.mxu3 %vm1154_vm4, %v1862_v28  ;;  %v528_v62 = vrot.slane %v6314_v46, 4  ;;  %v2356_v2 = vunpack.c.l.b16 %v527_v45 }
 0x4ae   : > { %v1703_v52 = vpack.c.bf16 %v1655_v50, %v1655_v50  ;;  %v1508_v59 = vpop.xlane.xlu1 %1507  ;;  %v2357_v47 = vunpack.c.l.b16 %v528_v62 }
 0x4af   : > { %4056 = vrcp.f32 %v1508_v59 }
 0x4b0   : > { %v1983_v39 = vunpack.c.l.b16 %v1703_v52  ;;  %v2359_v23 = vpack.c.b16 %v2357_v47, %v2357_v47 }
 0x4b2   : > { %v1985_v44 = vpack.c.b16 %v1983_v39, %v1983_v39 }
 0x4b4   : > { %3534 = vmatmul.msk.bf16.gmra.mxu2 %vm1154_vm4, %v1985_v44 }
 0x4b5   : > { %v4057_v30 = vpop.eup %4056 }
 0x4b6   : > { %v1535_v24 = vpop.xlane.xlu0 %1534  ;;  %v1277_v6 = vpop.xlane.xlu1 %1276  ;;  %v1656_v0 = vmul.f32 %v4057_v30, %v5480_v53 }
 0x4b7   : > { %v1511_v58 = vpop.xlane.xlu2 %1510  ;;  %v1339_v63 = vsub.f32 %v5487_v22, %v1277_v6 }
 0x4b8   : > { %4058 = vrcp.f32 %v1511_v58  ;;  %v1704_v3 = vpack.c.bf16 %v1656_v0, %v1656_v0 }
 0x4b9   : > { %v1427_v40 = vmul.f32 1.442695, %v1339_v63  ;;  %4060 = vrcp.f32 %v1535_v24  ;;  %v2368_v24 = vsel %vm1751_vm3, %v2359_v23, 0 }
 0x4ba   : > { %v2022_v9 = vunpack.c.l.b16 %v1704_v3 }
 0x4bb   : > { %4062 = vpow2.f32 %v1427_v40 }
 0x4be   : > { %v4059_v27 = vpop.eup %4058  ;;  %v5677_v10 = vpop.xlane.xlu0 %1525 }
 0x4bf   : > { %v1538_v42 = vpop.xlane.xlu1 %1537  ;;  %v1657_v21 = vmul.f32 %v4059_v27, %v5495_v29  ;;  %v1271_v1 = vpop.xlane.xlu2 %1270  ;;  %v6316_v29 = vld [vmem:[#allocation29_spill] sm:$0xff] }
 0x4c0   : > { %v4061_v37 = vpop.eup %4060  ;;  %v1337_v22 = vsub.f32 %v5511_v57, %v1271_v1  ;;  %4064 = vrcp.f32 %v1538_v42  ;;  %v526_v36 = vrot.slane %v6316_v29, 4 }
 0x4c1   : > { %v5681_v38 = vpop.eup %4062  ;;  %v1705_v20 = vpack.c.bf16 %v1657_v21, %v1657_v21  ;;  %v1665_v13 = vmul.f32 %v4061_v37, %v5492_v7 }
 0x4c2   : > { %v1423_v53 = vmul.f32 1.442695, %v1337_v22  ;;  %v1563_v17 = vsel %vm1154_vm4, %v5681_v38, 0.0  ;;  %v2355_v7 = vunpack.c.l.b16 %v526_v36  ;;  %v5699_v22 = vpop.f32.mrf.mxu1 }
 0x4c3   : > { %v2023_v48 = vunpack.c.l.b16 %v1705_v20  ;;  %1564 = vadd.xlane.f32.xlu1 %v1563_v17  ;;  %v1713_v59 = vpack.c.bf16 %v1665_v13, %v1665_v13 }
 0x4c4   : > { %4066 = vpow2.f32 %v1423_v53  ;;  %v2358_v63 = vpack.c.b16 %v2356_v2, %v2355_v7 }
 0x4c5   : > { %v2025_v57 = vpack.c.b16 %v2023_v48, %v2022_v9  ;;  %v2145_v30 = vunpack.c.l.b16 %v1713_v59 }
 0x4c6   : > { %v4065_v28 = vpop.eup %4064  ;;  %v1541_v50 = vpop.xlane.xlu0 %1540 }
 0x4c7   : > { %v1514_v52 = vpop.xlane.xlu1 %1513  ;;  %v1666_v39 = vmul.f32 %v4065_v28, %v5514_v60  ;;  %v1496_v44 = vpop.xlane.xlu2 %1495  ;;  %4068 = vrcp.f32 %v1541_v50  ;;  %3535 = vmatmul.msk.bf16.vlgmr.msra.gmra.mxu3 %vm1154_vm4, %v2025_v57 }
 0x4c8   : > { %4070 = vrcp.f32 %v1496_v44  ;;  %2376 = vmatpush.bf16.msra.mxu3 %v2368_v24 }
 0x4c9   : > { %v1714_v6 = vpack.c.bf16 %v1666_v39, %v1666_v39  ;;  %4072 = vrcp.f32 %v1514_v52 }
 0x4ca   : > { %v5691_v58 = vpop.eup %4066  ;;  %v5712_v39 = vpop.f32.mrf.mxu1 }
 0x4cb   : > { %v2146_v40 = vunpack.c.l.b16 %v1714_v6  ;;  %v1557_v46 = vsel %vm1154_vm4, %v5691_v58, 0.0 }
 0x4cc   : > { %2377 = vmatpush.bf16.msra.mxu3 %v2358_v63  ;;  %1558 = vadd.xlane.f32.xlu2 %v1557_v46 }
 0x4cd   : > { %v4069_v60 = vpop.eup %4068  ;;  %v2148_v62 = vpack.c.b16 %v2146_v40, %v2145_v30 }
 0x4ce   : > { %v4071_v0 = vpop.eup %4070  ;;  %v1544_v21 = vpop.xlane.xlu0 %1543  ;;  %v1667_v4 = vmul.f32 %v4069_v60, %v5530_v31 }
 0x4cf   : > { %v1298_v27 = vpop.xlane.xlu1 %1297  ;;  %v4073_v42 = vpop.eup %4072  ;;  %v1652_v47 = vmul.f32 %v4071_v0, %v5527_v43  ;;  %3541 = vmatmul.msk.bf16.vlgmr.msrb.gmra.mxu2 %vm1154_vm4, %v2148_v62 }
 0x4d0   : > { %v1523_v3 = vpop.xlane.xlu2 %1522  ;;  %v1346_v1 = vsub.f32 %v5541_v56, %v1298_v27  ;;  %v1658_v37 = vmul.f32 %v4073_v42, %v5524_v33  ;;  %v1715_v23 = vpack.c.bf16 %v1667_v4, %v1667_v4 }
 0x4d1   : > { %4074 = vrcp.f32 %v1523_v3  ;;  %v1700_v20 = vpack.c.bf16 %v1652_v47, %v1652_v47 }
 0x4d2   : > { %4076 = vrcp.f32 %v1544_v21  ;;  %v1441_v45 = vmul.f32 1.442695, %v1346_v1  ;;  %v1706_v53 = vpack.c.bf16 %v1658_v37, %v1658_v37  ;;  %v2147_v50 = vunpack.c.l.b16 %v1715_v23 }
 0x4d3   : > { %v1942_v17 = vunpack.c.l.b16 %v1700_v20 }
 0x4d4   : > { %4078 = vpow2.f32 %v1441_v45  ;;  %v2024_v43 = vunpack.c.l.b16 %v1706_v53  ;;  %v2149_v7 = vpack.c.b16 %v2147_v50, %v2147_v50 }
 0x4d5   : > { %v1944_v9 = vpack.c.b16 %v1942_v17, %v1942_v17 }
 0x4d6   : > { %v2026_v48 = vpack.c.b16 %v2024_v43, %v2024_v43  ;;  %v1574_v57 = vpop.xlane.xlu0 %1573 }
 0x4d7   : > { %v4075_v13 = vpop.eup %4074  ;;  %v1547_v29 = vpop.xlane.xlu1 %1546  ;;  %3532 = vmatmul.msk.bf16.gmra.mxu1 %vm1154_vm4, %v1944_v9 }
 0x4d8   : > { %v4077_v56 = vpop.eup %4076  ;;  %v1661_v33 = vmul.f32 %v4075_v13, %v5545_v55  ;;  %v1280_v36 = vpop.xlane.xlu2 %1279  ;;  %4080 = vrcp.f32 %v1547_v29  ;;  %3536 = vmatmul.msk.bf16.gmra.mxu3 %vm1154_vm4, %v2026_v48 }
 0x4d9   : > { %v1340_v31 = vsub.f32 %v5563_v51, %v1280_v36  ;;  %4082 = vrcp.f32 %v5677_v10  ;;  %v1668_v52 = vmul.f32 %v4077_v56, %v5549_v14 }
 0x4da   : > { %v5706_v28 = vpop.eup %4078  ;;  %v1709_v2 = vpack.c.bf16 %v1661_v33, %v1661_v33  ;;  %4084 = vrcp.f32 %v1574_v57 }
 0x4db   : > { %v1429_v59 = vmul.f32 1.442695, %v1340_v31  ;;  %v1584_v55 = vsel %vm1154_vm4, %v5706_v28, 0.0  ;;  %v1716_v6 = vpack.c.bf16 %v1668_v52, %v1668_v52 }
 0x4dc   : > { %1585 = vadd.xlane.f32.xlu2 %v1584_v55  ;;  %v2065_v44 = vunpack.c.l.b16 %v1709_v2 }
 0x4dd   : > { %4086 = vpow2.f32 %v1429_v59  ;;  %v2186_v27 = vunpack.c.l.b16 %v1716_v6 }
 0x4de   : > { %v4081_v51 = vpop.eup %4080  ;;  %v2067_v24 = vpack.c.b16 %v2065_v44, %v2065_v44  ;;  %v1550_v14 = vpop.xlane.xlu0 %1549 }
 0x4df   : > { %v1669_v10 = vmul.f32 %v4081_v51, %v5558_v32  ;;  %v1529_v63 = vpop.xlane.xlu1 %1528  ;;  %v4083_v30 = vpop.eup %4082  ;;  %3542 = vmatmul.msk.bf16.gmra.mxu2 %vm1154_vm4, %v2149_v7 }
 0x4e0   : > { %v1571_v40 = vpop.xlane.xlu2 %1570  ;;  %3538 = vmatmul.msk.bf16.gmra.mxu0 %vm1154_vm4, %v2067_v24  ;;  %4088 = vrcp.f32 %v1529_v63  ;;  %v4085_v46 = vpop.eup %4084  ;;  %v1662_v0 = vmul.f32 %v4083_v30, %v5507_v61 }
 0x4e1   : > { %v1717_v60 = vpack.c.bf16 %v1669_v10, %v1669_v10  ;;  %4090 = vrcp.f32 %v1571_v40  ;;  %v1678_v32 = vmul.f32 %v4085_v46, %v5565_v54 }
 0x4e2   : > { %4092 = vrcp.f32 %v1550_v14  ;;  %v1710_v20 = vpack.c.bf16 %v1662_v0, %v1662_v0 }
 0x4e3   : > { %v5717_v62 = vpop.eup %4086  ;;  %v2187_v42 = vunpack.c.l.b16 %v1717_v60  ;;  %v5723_v3 = vpop.f32.mrf.mxu1  ;;  %v1726_v17 = vpack.c.bf16 %v1678_v32, %v1678_v32 }
 0x4e4   : > { %v1566_v47 = vsel %vm1154_vm4, %v5717_v62, 0.0  ;;  %v2104_v23 = vunpack.c.l.b16 %v1710_v20 }
 0x4e5   : > { %v2189_v21 = vpack.c.b16 %v2187_v42, %v2186_v27  ;;  %1567 = vadd.xlane.f32.xlu0 %v1566_v47  ;;  %v2310_v48 = vunpack.c.l.b16 %v1726_v17 }
 0x4e6   : > { %v4089_v1 = vpop.eup %4088 }
 0x4e7   : > { %v4091_v37 = vpop.eup %4090  ;;  %v1663_v4 = vmul.f32 %v4089_v1, %v5577_v12  ;;  %v1553_v45 = vpop.xlane.xlu1 %1552 }
 0x4e8   : > { %v4093_v53 = vpop.eup %4092  ;;  %v1677_v61 = vmul.f32 %v4091_v37, %v5579_v25  ;;  %3543 = vmatmul.msk.bf16.vlgmr.msrb.gmra.mxu3 %vm1154_vm4, %v2189_v21  ;;  %4094 = vrcp.f32 %v1553_v45  ;;  %v1580_v45 = vpop.xlane.xlu0 %1579 }
 0x4e9   : > { %v1711_v43 = vpack.c.bf16 %v1663_v4, %v1663_v4  ;;  %v1670_v9 = vmul.f32 %v4093_v53, %v5584_v35 }
 0x4ea   : > { %v1725_v54 = vpack.c.bf16 %v1677_v61, %v1677_v61 }
 0x4eb   : > { %v2105_v13 = vunpack.c.l.b16 %v1711_v43  ;;  %v1812_v56 = vpop.f32.mrf.mxu1  ;;  %v1718_v57 = vpack.c.bf16 %v1670_v9, %v1670_v9 }
 0x4ec   : > { %v2309_v29 = vunpack.c.l.b16 %v1725_v54  ;;  %v1928_v33 = vpop.f32.mrf.mxu0 }
 0x4ed   : > { %v2107_v36 = vpack.c.b16 %v2105_v13, %v2104_v23  ;;  %v2188_v50 = vunpack.c.l.b16 %v1718_v57 }
 0x4ee   : > { %v2312_v12 = vpack.c.b16 %v2310_v48, %v2309_v29  ;;  %v4095_v2 = vpop.eup %4094 }
 0x4ef   : > { %v1532_v31 = vpop.xlane.xlu1 %1531  ;;  %3539 = vmatmul.msk.bf16.vlgmr.msrb.gmra.mxu1 %vm1154_vm4, %v2107_v36  ;;  %v1556_v25 = vpop.xlane.xlu2 %1555  ;;  %v1671_v35 = vmul.f32 %v4095_v2, %v5600_v34  ;;  %v2190_v24 = vpack.c.b16 %v2188_v50, %v2188_v50 }
 0x4f0   : > { %3549 = vmatmul.msk.bf16.vlgmr.msra.gmra.mxu2 %vm1154_vm4, %v2312_v12  ;;  %4096 = vrcp.f32 %v1532_v31 }
 0x4f1   : > { %4098 = vrcp.f32 %v1556_v25  ;;  %v1719_v7 = vpack.c.bf16 %v1671_v35, %v1671_v35 }
 0x4f3   : > { %v2227_v14 = vunpack.c.l.b16 %v1719_v7 }
 0x4f4   : > { %v1930_v52 = vpop.f32.mrf.mxu0 }
 0x4f5   : > { %v3813_v59 = vpack.i.bf16 %v1930_v52, %v1928_v33 }
 0x4f6   : > { %v4097_v55 = vpop.eup %4096 }
 0x4f7   : > { %v4099_v44 = vpop.eup %4098  ;;  %v1664_v51 = vmul.f32 %v4097_v55, %v5615_v19  ;;  %3814 = vrot.lane.b32.xlu2 %v3813_v59, %s4296_s27  ;;  %v1577_v10 = vpop.xlane.xlu2 %1576 }
 0x4f8   : > { %v1672_v6 = vmul.f32 %v4099_v44, %v5617_v15  ;;  %4100 = vrcp.f32 %v1577_v10  ;;  %3544 = vmatmul.msk.bf16.gmra.mxu3 %vm1154_vm4, %v2190_v24 }
 0x4f9   : > { %v1712_v63 = vpack.c.bf16 %v1664_v51, %v1664_v51  ;;  %4102 = vrcp.f32 %v1580_v45 }
 0x4fa   : > { %v1720_v30 = vpack.c.bf16 %v1672_v6, %v1672_v6  ;;  %v1846_v34 = vpop.f32.mrf.mxu2 }
 0x4fb   : > { %v2106_v40 = vunpack.c.l.b16 %v1712_v63 }
 0x4fc   : > { %v2228_v46 = vunpack.c.l.b16 %v1720_v30  ;;  %v5736_v60 = vpop.f32.mrf.mxu0 }
 0x4fd   : > { %v2108_v19 = vpack.c.b16 %v2106_v40, %v2106_v40 }
 0x4fe   : > { %v2230_v0 = vpack.c.b16 %v2228_v46, %v2227_v14  ;;  %v4101_v27 = vpop.eup %4100  ;;  %v1562_v2 = vpop.xlane.xlu0 %1561 }
 0x4ff   : > { %3540 = vmatmul.msk.bf16.gmra.mxu1 %vm1154_vm4, %v2108_v19  ;;  %v1679_v42 = vmul.f32 %v4101_v27, %v5628_v18  ;;  %v4103_v61 = vpop.eup %4102 }
 0x500   : > { %3545 = vmatmul.msk.bf16.vlgmr.msrb.gmra.mxu0 %vm1154_vm4, %v2230_v0  ;;  %v1680_v54 = vmul.f32 %v4103_v61, %v5604_v49 }
 0x501   : > { %v1727_v15 = vpack.c.bf16 %v1679_v42, %v1679_v42 }
 0x502   : > { %v1848_v32 = vpop.f32.mrf.mxu2  ;;  %v1728_v48 = vpack.c.bf16 %v1680_v54, %v1680_v54 }
 0x503   : > { %v3818_v47 = vpack.i.bf16 %v1848_v32, %v1846_v34  ;;  %v2311_v1 = vunpack.c.l.b16 %v1727_v15 }
 0x504   : > { %v1935_v21 = vpop.f32.mrf.mxu0  ;;  %v2350_v33 = vunpack.c.l.b16 %v1728_v48 }
 0x505   : > { %3819 = vrot.lane.b32.xlu1 %v3818_v47, %s4297_s28  ;;  %v2313_v37 = vpack.c.b16 %v2311_v1, %v2311_v1 }
 0x507   : > { %3550 = vmatmul.msk.bf16.gmra.mxu2 %vm1154_vm4, %v2313_v37 }
 0x509   : > { %v5745_v4 = vpop.f32.mrf.mxu1 }
 0x50a   : > { %v5743_v20 = vpop.f32.mrf.mxu2  ;;  %v3848_v18 = vpack.i.bf16 %v5745_v4, %v5736_v60  ;;  %v3692_v60 = vld [vmem:[%s212_s1 + $0x18] sm:$0xff]  ;;  %v3691_v4 = vld [vmem:[%s212_s1 + $0x10] sm:$0xff] }
 0x50b   : > { %2646 = vmatpush.bf16.msra.mxu0 %v3692_v60 }
 0x50f   : > { %2647 = vmatpush.bf16.msra.mxu0 %v3691_v4 }
 0x512   : > { %v1853_v53 = vpop.f32.mrf.mxu2 }
 0x514   : > { %v1583_v17 = vpop.xlane.xlu1 %1582 }
 0x515   : > { %4104 = vrcp.f32 %v1583_v17 }
 0x516   : > { %4106 = vrcp.f32 %v1562_v2 }
 0x517   : > { %v5749_v43 = vpop.f32.mrf.mxu3 }
 0x518   : > { %v3843_v23 = vpack.i.bf16 %v5749_v43, %v5743_v20 }
 0x519   : > { %v2092_v9 = vpop.f32.mrf.mxu0 }
 0x51b   : > { %v4105_v13 = vpop.eup %4104 }
 0x51c   : > { %v1681_v29 = vmul.f32 %v4105_v13, %v5662_v8  ;;  %v4107_v55 = vpop.eup %4106 }
 0x51d   : > { %v1674_v24 = vmul.f32 %v4107_v55, %v5642_v5  ;;  %v5770_v5 = vpop.f32.mrf.mxu1 }
 0x51e   : > { %v1729_v56 = vpack.c.bf16 %v1681_v29, %v1681_v29 }
 0x51f   : > { %v5757_v49 = vpop.f32.mrf.mxu3  ;;  %v1722_v6 = vpack.c.bf16 %v1674_v24, %v1674_v24 }
 0x520   : > { %v2351_v36 = vunpack.c.l.b16 %v1729_v56 }
 0x521   : > { %v2094_v12 = vpop.f32.mrf.mxu0  ;;  %v2268_v40 = vunpack.c.l.b16 %v1722_v6 }
 0x522   : > { %v2353_v57 = vpack.c.b16 %v2351_v36, %v2350_v33  ;;  %v3823_v31 = vpack.i.bf16 %v2094_v12, %v2092_v9 }
 0x524   : > { %3824 = vrot.lane.b32.xlu1 %v3823_v31, %s4298_s5  ;;  %3551 = vmatmul.msk.bf16.vlgmr.msra.gmra.mxu3 %vm1154_vm4, %v2353_v57 }
 0x527   : > { %v2010_v25 = vpop.f32.mrf.mxu2 }
 0x52f   : > { %v5759_v50 = vpop.f32.mrf.mxu3  ;;  %v2012_v35 = vpop.f32.mrf.mxu2 }
 0x530   : > { %v3878_v8 = vpack.i.bf16 %v5759_v50, %v5757_v49  ;;  %v3828_v52 = vpack.i.bf16 %v2012_v35, %v2010_v25  ;;  %v3690_v49 = vld [vmem:[%s212_s1 + $0x8] sm:$0xff] }
 0x531   : > { %2648 = vmatpush.bf16.msra.mxu0 %v3690_v49 }
 0x532   : > { %3829 = vrot.lane.b32.xlu0 %v3828_v52, %s4299_s0 }
 0x536   : > { %v1565_v59 = vpop.xlane.xlu1 %1564 }
 0x537   : > { %4108 = vrcp.f32 %v1565_v59  ;;  %v1894_v44 = vpop.f32.mrf.mxu3  ;;  %v5764_v51 = vpop.f32.mrf.mxu2 }
 0x53d   : > { %v4109_v7 = vpop.eup %4108 }
 0x53e   : > { %v1675_v10 = vmul.f32 %v4109_v7, %v5681_v38 }
 0x53f   : > { %v1559_v63 = vpop.xlane.xlu2 %1558  ;;  %v2017_v30 = vpop.f32.mrf.mxu2 }
 0x540   : > { %v1723_v34 = vpack.c.bf16 %v1675_v10, %v1675_v10  ;;  %4110 = vrcp.f32 %v1559_v63 }
 0x542   : > { %v2269_v14 = vunpack.c.l.b16 %v1723_v34 }
 0x544   : > { %v2271_v46 = vpack.c.b16 %v2269_v14, %v2268_v40 }
 0x546   : > { %v4111_v19 = vpop.eup %4110  ;;  %3547 = vmatmul.msk.bf16.vlgmr.msra.gmra.mxu1 %vm1154_vm4, %v2271_v46 }
 0x547   : > { %v1673_v0 = vmul.f32 %v4111_v19, %v5691_v58 }
 0x549   : > { %v1721_v27 = vpack.c.bf16 %v1673_v0, %v1673_v0 }
 0x54a   : > { %v2051_v42 = vpop.f32.mrf.mxu3 }
 0x54b   : > { %v2229_v15 = vunpack.c.l.b16 %v1721_v27  ;;  %v3858_v20 = vpack.i.bf16 %v2051_v42, %v5764_v51 }
 0x54d   : > { %v2231_v32 = vpack.c.b16 %v2229_v15, %v2229_v15 }
 0x54f   : > { %v1586_v47 = vpop.xlane.xlu2 %1585  ;;  %3546 = vmatmul.msk.bf16.gmra.mxu0 %vm1154_vm4, %v2231_v32 }
 0x550   : > { %4112 = vrcp.f32 %v1586_v47 }
 0x552   : > { %v5773_v38 = vpop.f32.mrf.mxu3  ;;  %v2174_v21 = vpop.f32.mrf.mxu2 }
 0x554   : > { %v5775_v1 = vpop.f32.mrf.mxu1 }
 0x555   : > { %v3883_v45 = vpack.i.bf16 %v5775_v1, %v5770_v5 }
 0x556   : > { %v4113_v37 = vpop.eup %4112 }
 0x557   : > { %v1682_v58 = vmul.f32 %v4113_v37, %v5706_v28 }
 0x558   : > { %v1568_v53 = vpop.xlane.xlu0 %1567 }
 0x559   : > { %v1730_v17 = vpack.c.bf16 %v1682_v58, %v1682_v58  ;;  %4114 = vrcp.f32 %v1568_v53 }
 0x55a   : > { %v2176_v61 = vpop.f32.mrf.mxu2 }
 0x55b   : > { %v2352_v54 = vunpack.c.l.b16 %v1730_v17  ;;  %v2056_v9 = vpop.f32.mrf.mxu3  ;;  %v3838_v13 = vpack.i.bf16 %v2176_v61, %v2174_v21  ;;  %v3815_v17 = vpop.permute.xlu2 %3814 }
 0x55c   : > { %v3893_v48 = vpack.i.bf16 %v2056_v9, %v5773_v38  ;;  %v1976_v29 = vpop.f32.mrf.mxu1 }
 0x55d   : > { %v2097_v56 = vpop.f32.mrf.mxu0  ;;  %v2354_v33 = vpack.c.b16 %v2352_v54, %v2352_v54  ;;  %3839 = vrot.lane.b32.xlu0 %v3838_v13, %s4300_s9 }
 0x55f   : > { %v4115_v36 = vpop.eup %4114  ;;  %3552 = vmatmul.msk.bf16.gmra.mxu3 %vm1154_vm4, %v2354_v33  ;;  %v3817_v33 = vunpack.i.h.bf16 %v3815_v17 }
 0x560   : > { %v1676_v28 = vmul.f32 %v4115_v36, %v5717_v62  ;;  %v3816_v36 = vunpack.i.l.bf16 %v3815_v17 }
 0x562   : > { %v1724_v12 = vpack.c.bf16 %v1676_v28, %v1676_v28  ;;  %v2179_v57 = vpop.f32.mrf.mxu2 }
 0x563   : > { %v2058_v31 = vpop.f32.mrf.mxu3 }
 0x564   : > { %v2270_v25 = vunpack.c.l.b16 %v1724_v12 }
 0x565   : > { %v2099_v2 = vpop.f32.mrf.mxu0  ;;  %3844 = vrot.lane.b32.xlu0 %v3843_v23, %s4297_s28 }
 0x566   : > { %v2272_v35 = vpack.c.b16 %v2270_v25, %v2270_v25 }
 0x568   : > { %3548 = vmatmul.msk.bf16.gmra.mxu1 %vm1154_vm4, %v2272_v35 }
 0x56a   : > { %v2181_v52 = vpop.f32.mrf.mxu2 }
 0x56b   : > { %v2215_v59 = vpop.f32.mrf.mxu3 }
 0x56c   : > { %v2133_v55 = vpop.f32.mrf.mxu1  ;;  %v3868_v27 = vpack.i.bf16 %v2215_v59, %v2179_v57 }
 0x56d   : > { %v3863_v44 = vpack.i.bf16 %v2133_v55, %v2097_v56 }
 0x56f   : > { %3864 = vrot.lane.b32.xlu0 %v3863_v44, %s4298_s5 }
 0x573   : > { %v2338_v62 = vpop.f32.mrf.mxu2  ;;  %v2217_v24 = vpop.f32.mrf.mxu3 }
 0x574   : > { %v2135_v7 = vpop.f32.mrf.mxu1 }
 0x577   : > { %v3820_v37 = vpop.permute.xlu1 %3819 }
 0x578   : > { %v3822_v54 = vunpack.i.h.bf16 %v3820_v37  ;;  %v3821_v9 = vunpack.i.l.bf16 %v3820_v37 }
 0x57b   : > { %v2340_v6 = vpop.f32.mrf.mxu2  ;;  %v2220_v10 = vpop.f32.mrf.mxu3 }
 0x57c   : > { %v3853_v63 = vpack.i.bf16 %v2340_v6, %v2338_v62  ;;  %v2138_v30 = vpop.f32.mrf.mxu1  ;;  %v3903_v34 = vpack.i.bf16 %v2220_v10, %v2217_v24 }
 0x57d   : > { %v2256_v40 = vpop.f32.mrf.mxu0  ;;  %v3898_v51 = vpack.i.bf16 %v2138_v30, %v2135_v7 }
 0x57e   : > { %3854 = vrot.lane.b32.xlu1 %v3853_v63, %s4301_s30 }
 0x583   : > { %v2222_v43 = vpop.f32.mrf.mxu3 }
 0x584   : > { %v2140_v23 = vpop.f32.mrf.mxu1 }
 0x585   : > { %v2258_v14 = vpop.f32.mrf.mxu0 }
 0x586   : > { %v3833_v46 = vpack.i.bf16 %v2258_v14, %v2256_v40  ;;  %3859 = vrot.lane.b32.xlu1 %v3858_v20, %s4299_s0 }
 0x588   : > { %3834 = vrot.lane.b32.xlu2 %v3833_v46, %s4302_s20 }
 0x58a   : > { %v2343_v19 = vpop.f32.mrf.mxu2 }
 0x590   : > { %3849 = vrot.lane.b32.xlu2 %v3848_v18, %s4296_s27 }
 0x592   : > { %v2345_v0 = vpop.f32.mrf.mxu2 }
 0x596   : > { %v3825_v1 = vpop.permute.xlu1 %3824 }
 0x597   : > { %v3827_v31 = vunpack.i.h.bf16 %v3825_v1  ;;  %v3826_v55 = vunpack.i.l.bf16 %v3825_v1 }
 0x598   : > { %3869 = vrot.lane.b32.xlu2 %v3868_v27, %s4300_s9 }
 0x5a0   : > { %3879 = vrot.lane.b32.xlu2 %v3878_v8, %s4297_s28  ;;  %v3689_v8 = vld [vmem:[%s212_s1] sm:$0xff]  ;;  %s276_s1 = scalar_lea.vmem %s6213_s13, %s4279_s25 }
 0x5a1   : > { %2649 = vmatpush.bf16.msra.mxu0 %v3689_v8 }
 0x5a4   : > { %v3830_v58 = vpop.permute.xlu0 %3829 }
 0x5a5   : > { %v3832_v29 = vunpack.i.h.bf16 %v3830_v58  ;;  %v3831_v56 = vunpack.i.l.bf16 %v3830_v58 }
 0x5a7   : > { %v2379_v42 = vpop.f32.mrf.mxu3 }
 0x5a8   : > { %3899 = vrot.lane.b32.xlu2 %v3898_v51, %s4298_s5  ;;  %v3888_v15 = vpack.i.bf16 %v2379_v42, %v2343_v19  ;;  %s223_s5 = scalar_lea.vmem %s6207_s7, %s4279_s25 }
 0x5aa   : > { %3889 = vrot.lane.b32.xlu0 %v3888_v15, %s4301_s30 }
 0x5af   : > { %v2381_v38 = vpop.f32.mrf.mxu3 }
 0x5b2   : > { %3894 = vrot.lane.b32.xlu0 %v3893_v48, %s4299_s0  ;;  %v2556_v48 = vsel %vm538_vm2, %v5619_v41, %v3821_v9 }
 0x5b3   : > { %v2563_v25 = vsel %vm2562_vm5, %v2556_v48, %v3816_v36 }
 0x5b4   : > { %v2569_v35 = vsel %vm1154_vm4, %v2563_v25, %v3831_v56 }
 0x5b5   : > { %v2576_v24 = vsel %vm2575_vm6, %v2569_v35, %v3826_v55 }
 0x5c3   : > { %v2297_v18 = vpop.f32.mrf.mxu1 }
 0x5cb   : > { %v2299_v21 = vpop.f32.mrf.mxu1 }
 0x5cc   : > { %v2261_v32 = vpop.f32.mrf.mxu0 }
 0x5cd   : > { %v3873_v50 = vpack.i.bf16 %v2297_v18, %v2261_v32 }
 0x5cf   : > { %3874 = vrot.lane.b32.xlu1 %v3873_v50, %s4302_s20  ;;  %v3840_v28 = vpop.permute.xlu0 %3839 }
 0x5d0   : > { %v3842_v52 = vunpack.i.h.bf16 %v3840_v28  ;;  %v3841_v59 = vunpack.i.l.bf16 %v3840_v28 }
 0x5d2   : > { %v2583_v10 = vsel %vm2582_vm7, %v2576_v24, %v3841_v59 }
 0x5d4   : > { %v2263_v47 = vpop.f32.mrf.mxu0 }
 0x5d7   : > { %3884 = vrot.lane.b32.xlu1 %v3883_v45, %s4296_s27  ;;  %v2557_v45 = vsel %vm538_vm2, %v5632_v26, %v3822_v54  ;;  %v3845_v46 = vpop.permute.xlu0 %3844 }
 0x5d8   : > { %v2564_v2 = vsel %vm2562_vm5, %v2557_v45, %v3817_v33  ;;  %v3847_v27 = vunpack.i.h.bf16 %v3845_v46  ;;  %v3846_v51 = vunpack.i.l.bf16 %v3845_v46 }
 0x5d9   : > { %v2570_v26 = vsel %vm1154_vm4, %v2564_v2, %v3832_v29 }
 0x5da   : > { %v2577_v7 = vsel %vm2575_vm6, %v2570_v26, %v3827_v31  ;;  %v2558_v32 = vsel %vm538_vm2, %v5644_v11, %v3846_v51  ;;  %v2559_v49 = vsel %vm538_vm2, %v5699_v22, %v3847_v27 }
 0x5db   : > { %v2584_v63 = vsel %vm2582_vm7, %v2577_v7, %v3842_v52 }
 0x5df   : > { %3904 = vrot.lane.b32.xlu1 %v3903_v34, %s4300_s9 }
 0x5e1   : > { %v3865_v42 = vpop.permute.xlu0 %3864 }
 0x5e2   : > { %v2384_v53 = vpop.f32.mrf.mxu3  ;;  %v3835_v57 = vpop.permute.xlu2 %3834  ;;  %v3867_v37 = vunpack.i.h.bf16 %v3865_v42  ;;  %v3866_v58 = vunpack.i.l.bf16 %v3865_v42 }
 0x5e3   : > { %v3913_v61 = vpack.i.bf16 %v2384_v53, %v2381_v38  ;;  %v3837_v44 = vunpack.i.h.bf16 %v3835_v57  ;;  %v3836_v62 = vunpack.i.l.bf16 %v3835_v57 }
 0x5e5   : > { %v2302_v13 = vpop.f32.mrf.mxu1  ;;  %3914 = vrot.lane.b32.xlu2 %v3913_v61, %s4301_s30  ;;  %v2590_v40 = vsel %vm2589_vm8, %v2583_v10, %v3836_v62  ;;  %v2591_v20 = vsel %vm2589_vm8, %v2584_v63, %v3837_v44  ;;  %s225_s30 = scalar_lea.vmem %s6208_s8, %s4279_s25 }
 0x5e6   : > { %v3908_v5 = vpack.i.bf16 %v2302_v13, %v2299_v21 }
 0x5e8   : > { %3909 = vrot.lane.b32.xlu0 %v3908_v5, %s4302_s20  ;;  %s5928_s20 = scalar_lea.vmem [#allocation5], %s3679_s3 }
 0x5ea   : > { %v2386_v12 = vpop.f32.mrf.mxu3  ;;  %v3850_v19 = vpop.permute.xlu2 %3849 }
 0x5eb   : > { %v3852_v15 = vunpack.i.h.bf16 %v3850_v19  ;;  %v3851_v60 = vunpack.i.l.bf16 %v3850_v19 }
 0x5ed   : > { %v2304_v41 = vpop.f32.mrf.mxu1  ;;  %v2566_v50 = vsel %vm2562_vm5, %v2559_v49, %v3852_v15  ;;  %v2565_v8 = vsel %vm2562_vm5, %v2558_v32, %v3851_v60 }
 0x5f0   : > { %v3855_v6 = vpop.permute.xlu1 %3854 }
 0x5f1   : > { %v3857_v30 = vunpack.i.h.bf16 %v3855_v6  ;;  %v3856_v34 = vunpack.i.l.bf16 %v3855_v6 }
 0x5f2   : > { %v3870_v47 = vpop.permute.xlu2 %3869 }
 0x5f3   : > { %v2597_v43 = vsel %vm2596_vm9, %v2590_v40, %v3856_v34  ;;  %v2598_v23 = vsel %vm2596_vm9, %v2591_v20, %v3857_v30  ;;  %v3872_v11 = vunpack.i.h.bf16 %v3870_v47  ;;  %v3871_v54 = vunpack.i.l.bf16 %v3870_v47 }
 0x5f4   : > { %v2603_v14 = vpack.c.bf16 %v2598_v23, %v2597_v43 }
 0x5f6   : > { %3569 = vmatmul.msk.bf16.vlgmr.msra.gmra.mxu0 %vm137_vm0, %v2603_v14 }
 0x5f8   : > { %v3860_v0 = vpop.permute.xlu1 %3859 }
 0x5f9   : > { %v3862_v4 = vunpack.i.h.bf16 %v3860_v0  ;;  %v3861_v18 = vunpack.i.l.bf16 %v3860_v0 }
 0x5fa   : > { %v3880_v28 = vpop.permute.xlu2 %3879 }
 0x5fb   : > { %v2571_v38 = vsel %vm1154_vm4, %v2565_v8, %v3861_v18  ;;  %v2572_v21 = vsel %vm1154_vm4, %v2566_v50, %v3862_v4  ;;  %v3882_v31 = vunpack.i.h.bf16 %v3880_v28  ;;  %v3881_v25 = vunpack.i.l.bf16 %v3880_v28  ;;  %v3918_v18 = vld [vmem:[%s221_s23] ss:$0 sm:$0xff]  ;;  %v6317_v50 = vld [vmem:[#allocation16_spill] sm:$0xff]  ;;  %s278_s23 = scalar_lea.vmem %s6214_s14, %s4279_s25 }
 0x5fc   : > { %v2578_v53 = vsel %vm2575_vm6, %v2571_v38, %v3866_v58  ;;  %v2579_v17 = vsel %vm2575_vm6, %v2572_v21, %v3867_v37  ;;  %v6318_v37 = vld [vmem:[#allocation15_spill] sm:$0xff] }
 0x5fd   : > { %v2585_v45 = vsel %vm2582_vm7, %v2578_v53, %v3871_v54  ;;  %v2586_v48 = vsel %vm2582_vm7, %v2579_v17, %v3872_v11  ;;  %v2561_v59 = vsel %vm538_vm2, %v5723_v3, %v3882_v31  ;;  %v2560_v41 = vsel %vm538_vm2, %v5712_v39, %v3881_v25  ;;  %v6319_v11 = vld [vmem:[#allocation14_spill] sm:$0xff] }
 0x602   : > { %v3900_v2 = vpop.permute.xlu2 %3899 }
 0x603   : > { %v3902_v34 = vunpack.i.h.bf16 %v3900_v2  ;;  %v3901_v40 = vunpack.i.l.bf16 %v3900_v2 }
 0x61c   : > { %v3890_v61 = vpop.permute.xlu0 %3889 }
 0x61d   : > { %v3892_v5 = vunpack.i.h.bf16 %v3890_v61  ;;  %v3891_v1 = vunpack.i.l.bf16 %v3890_v61 }
 0x624   : > { %v3895_v52 = vpop.permute.xlu0 %3894 }
 0x625   : > { %v3897_v24 = vunpack.i.h.bf16 %v3895_v52  ;;  %v3896_v7 = vunpack.i.l.bf16 %v3895_v52  ;;  %v6322_v52 = vld [vmem:[#allocation11_spill] sm:$0xff] }
 0x63f   : > { %v3915_v20 = vpop.permute.xlu2 %3914 }
 0x640   : > { %v3917_v46 = vunpack.i.h.bf16 %v3915_v20  ;;  %v3916_v19 = vunpack.i.l.bf16 %v3915_v20 }
 0x641   : > { %v3875_v9 = vpop.permute.xlu1 %3874 }
 0x642   : > { %v3877_v22 = vunpack.i.h.bf16 %v3875_v9  ;;  %v3876_v13 = vunpack.i.l.bf16 %v3875_v9 }
 0x644   : > { %v2593_v29 = vsel %vm2589_vm8, %v2586_v48, %v3877_v22  ;;  %v2592_v56 = vsel %vm2589_vm8, %v2585_v45, %v3876_v13  ;;  %v4303_v45 = vmov 64.0  }
 0x645   : > { %v2599_v33 = vsel %vm2596_vm9, %v2592_v56, %v3891_v1  ;;  %v2600_v36 = vsel %vm2596_vm9, %v2593_v29, %v3892_v5  ;;  %v6320_v5 = vld [vmem:[#allocation13_spill] sm:$0xff]  ;;  %4116 = vrcp.f32 %v4303_v45 }
 0x646   : > { %v2604_v12 = vpack.c.bf16 %v2600_v36, %v2599_v33 }
 0x648   : > { %3570 = vmatmul.msk.bf16.gmra.mxu0 %vm137_vm0, %v2604_v12  ;;  %v6321_v12 = vld [vmem:[#allocation12_spill] sm:$0xff] }
 0x649   : > { %v3885_v57 = vpop.permute.xlu1 %3884 }
 0x64a   : > { %v3887_v35 = vunpack.i.h.bf16 %v3885_v57  ;;  %v3886_v26 = vunpack.i.l.bf16 %v3885_v57 }
 0x64b   : > { %v4117_v29 = vpop.eup %4116 }
 0x64c   : > { %v2568_v55 = vsel %vm2562_vm5, %v2561_v59, %v3887_v35  ;;  %v2567_v44 = vsel %vm2562_vm5, %v2560_v41, %v3886_v26  ;;  %v2691_v56 = vmul.f32 64.0, %v4117_v29  ;;  %vm2695_vm10 = vweird.f32 %v4117_v29 }
 0x64d   : > { %v2574_v6 = vsel %vm1154_vm4, %v2568_v55, %v3897_v24  ;;  %v2573_v10 = vsel %vm1154_vm4, %v2567_v44, %v3896_v7 }
 0x64e   : > { %v2580_v39 = vsel %vm2575_vm6, %v2573_v10, %v3901_v40  ;;  %v2581_v43 = vsel %vm2575_vm6, %v2574_v6, %v3902_v34  ;;  %v2692_v36 = vsub.f32 1.0, %v2691_v56 }
 0x650   : > { %v2693_v31 = vmul.f32 %v4117_v29, %v2692_v36  ;;  %v3574_v36 = vld [vmem:[%s5928_s20] sm:$0xf] }
 0x651   : > { %v3905_v62 = vpop.permute.xlu1 %3904 }
 0x652   : > { %v3907_v63 = vunpack.i.h.bf16 %v3905_v62  ;;  %v3906_v30 = vunpack.i.l.bf16 %v3905_v62  ;;  %v2694_v35 = vadd.f32 %v4117_v29, %v2693_v31 }
 0x654   : > { %v2587_v0 = vsel %vm2582_vm7, %v2580_v39, %v3906_v30  ;;  %v2588_v27 = vsel %vm2582_vm7, %v2581_v43, %v3907_v63  ;;  %v5894_v41 = vsel %vm2695_vm10, %v4117_v29, %v2694_v35 }
 0x65a   : > { %v3910_v3 = vpop.permute.xlu0 %3909 }
 0x65b   : > { %v3912_v23 = vunpack.i.h.bf16 %v3910_v3  ;;  %v3911_v14 = vunpack.i.l.bf16 %v3910_v3 }
 0x65d   : > { %v2595_v51 = vsel %vm2589_vm8, %v2588_v27, %v3912_v23  ;;  %v2594_v42 = vsel %vm2589_vm8, %v2587_v0, %v3911_v14 }
 0x65e   : > { %v2601_v15 = vsel %vm2596_vm9, %v2594_v42, %v3916_v19  ;;  %v2602_v60 = vsel %vm2596_vm9, %v2595_v51, %v3917_v46 }
 0x65f   : > { %v2605_v4 = vpack.c.bf16 %v2602_v60, %v2601_v15 }
 0x661   : > { %3571 = vmatmul.msk.bf16.gmra.mxu0 %vm137_vm0, %v2605_v4  ;;  %v3598_v4 = vld [vmem:[%s5928_s20 + $0x30] sm:$0xf] }
 0x673   : > { %v2651_v32 = vpop.f32.mrf.mxu0 }
 0x674   : > { %v2652_v49 = vadd.f32 %v3918_v18, %v2651_v32  ;;  %v3700_v32 = vld [vmem:[%s5928_s20 + $0x34] sm:$0xf] }
 0x676   : > { %v2666_v8 = vadd.f32 %v6317_v50, %v2652_v49 }
 0x678   : > { %v2672_v47 = vsel %vm137_vm0, %v2666_v8, 0.0 }
 0x679   : > { %2673 = vadd.xlane.f32.xlu1 %v2672_v47 }
 0x67b   : > { %v2653_v38 = vpop.f32.mrf.mxu0 }
 0x67c   : > { %v2654_v21 = vadd.f32 %v3918_v18, %v2653_v38 }
 0x67e   : > { %v2667_v58 = vadd.f32 %v6318_v37, %v2654_v21  ;;  %v3590_v37 = vld [vmem:[%s5928_s20 + $0x20] sm:$0xf] }
 0x680   : > { %v2675_v53 = vsel %vm137_vm0, %v2667_v58, 0.0 }
 0x681   : > { %2676 = vadd.xlane.f32.xlu0 %v2675_v53  ;;  %v3698_v53 = vld [vmem:[%s5928_s20 + $0x24] sm:$0xf] }
 0x6c5   : > { %v2656_v17 = vpop.f32.mrf.mxu0 }
 0x6c6   : > { %v2657_v61 = vadd.f32 %v3918_v18, %v2656_v17 }
 0x6c8   : > { %v2668_v54 = vadd.f32 %v6319_v11, %v2657_v61  ;;  %v3592_v11 = vld [vmem:[%s5928_s20 + $0x28] sm:$0xf0] }
 0x6ca   : > { %v2678_v9 = vsel %vm137_vm0, %v2668_v54, 0.0 }
 0x6cb   : > { %2679 = vadd.xlane.f32.xlu2 %v2678_v9 }
 0x6cd   : > { %v2658_v22 = vpop.f32.mrf.mxu0 }
 0x6ce   : > { %v2659_v13 = vadd.f32 %v3918_v18, %v2658_v22  ;;  %v3582_v22 = vld [vmem:[%s5928_s20 + $0x10] sm:$0xf] }
 0x6d0   : > { %v2669_v1 = vadd.f32 %v6320_v5, %v2659_v13  ;;  %v3697_v13 = vld [vmem:[%s5928_s20 + $0x14] sm:$0xf0]  ;;  %v3696_v5 = vld [vmem:[%s5928_s20 + $0x14] sm:$0xf] }
 0x6d1   : > { %v3583_v45 = vor.u32 %v3697_v13, %v3582_v22 }
 0x6d2   : > { %v2681_v48 = vsel %vm137_vm0, %v2669_v1, 0.0 }
 0x6d3   : > { %2682 = vadd.xlane.f32.xlu1 %v2681_v48  ;;  %v3584_v48 = vld [vmem:[%s5928_s20 + $0x18] sm:$0xf0] }
 0x6d4   : > { %v3587_v56 = vor.u32 %v3696_v5, %v3584_v48 }
 0x6de   : > { %v2661_v33 = vpop.f32.mrf.mxu0 }
 0x6df   : > { %v2662_v28 = vadd.f32 %v3918_v18, %v2661_v33 }
 0x6e1   : > { %v2670_v57 = vadd.f32 %v6321_v12, %v2662_v28  ;;  %v3695_v28 = vld [vmem:[%s5928_s20 + $0x4] sm:$0xf0]  ;;  %v3694_v12 = vld [vmem:[%s5928_s20 + $0x4] sm:$0xf] }
 0x6e2   : > { %v3575_v31 = vor.u32 %v3695_v28, %v3574_v36  ;;  %v3718_v28 = vld [vmem:[%s5991_s26 + $0x78] sm:$0xff] }
 0x6e3   : > { %v2684_v25 = vsel %vm137_vm0, %v2670_v57, 0.0  ;;  %3075 = vmatpush.bf16.msrb.mxu0 %v3718_v28 }
 0x6e4   : > { %2685 = vadd.xlane.f32.xlu0 %v2684_v25  ;;  %v3576_v25 = vld [vmem:[%s5928_s20 + $0x8] sm:$0xf0] }
 0x6e6   : > { %v2663_v2 = vpop.f32.mrf.mxu0 }
 0x6e7   : > { %v2664_v26 = vadd.f32 %v3918_v18, %v2663_v2  ;;  %v3701_v18 = vld [vmem:[%s5928_s20 + $0x34] sm:$0xf0]  ;;  %v3579_v2 = vor.u32 %v3694_v12, %v3576_v25  ;;  %v3709_v25 = vld [vmem:[%s5991_s26 + $0x30] sm:$0xff] }
 0x6e8   : > { %v3599_v50 = vor.u32 %v3701_v18, %v3598_v4 }
 0x6e9   : > { %v2671_v59 = vadd.f32 %v6322_v52, %v2664_v26 }
 0x6ea   : > { %2890 = vmatpush.bf16.msrb.mxu1 %v3599_v50 }
 0x6eb   : > { %v2687_v55 = vsel %vm137_vm0, %v2671_v59, 0.0 }
 0x6ec   : > { %v2674_v44 = vpop.xlane.xlu1 %2673  ;;  %2688 = vadd.xlane.f32.xlu2 %v2687_v55 }
 0x6ed   : > { %v2697_v62 = vmul.f32 %v5894_v41, %v2674_v44 }
 0x6ef   : > { %v5898_v24 = vsub.f32 %v2666_v8, %v2697_v62  ;;  %v3600_v8 = vld [vmem:[%s5928_s20 + $0x38] sm:$0xf0] }
 0x6f0   : > { %v3603_v38 = vor.u32 %v3700_v32, %v3600_v8 }
 0x6f1   : > { %v2709_v7 = vmul.f32 %v5898_v24, %v5898_v24 }
 0x6f2   : > { %2914 = vmatpush.bf16.msrb.mxu2 %v3603_v38 }
 0x6f3   : > { %v2715_v6 = vsel %vm137_vm0, %v2709_v7, 0.0 }
 0x6f4   : > { %2716 = vadd.xlane.f32.xlu1 %v2715_v6  ;;  %v2677_v10 = vpop.xlane.xlu0 %2676 }
 0x6f5   : > { %v2698_v63 = vmul.f32 %v5894_v41, %v2677_v10 }
 0x6f7   : > { %v5904_v30 = vsub.f32 %v2667_v58, %v2698_v63  ;;  %v3699_v58 = vld [vmem:[%s5928_s20 + $0x24] sm:$0xf0] }
 0x6f8   : > { %v3591_v61 = vor.u32 %v3699_v58, %v3590_v37 }
 0x6f9   : > { %v2710_v34 = vmul.f32 %v5904_v30, %v5904_v30 }
 0x6fa   : > { %2891 = vmatpush.bf16.msrb.mxu1 %v3591_v61 }
 0x6fb   : > { %v2718_v40 = vsel %vm137_vm0, %v2710_v34, 0.0 }
 0x6fc   : > { %2719 = vadd.xlane.f32.xlu0 %v2718_v40 }
 0x6fe   : > { %2892 = vmatpush.bf16.msrb.mxu1 %v3583_v45 }
 0x702   : > { %2893 = vmatpush.bf16.msrb.mxu1 %v3575_v31 }
 0x73e   : > { %v2680_v20 = vpop.xlane.xlu2 %2679 }
 0x73f   : > { %v2699_v3 = vmul.f32 %v5894_v41, %v2680_v20 }
 0x741   : > { %v5910_v39 = vsub.f32 %v2668_v54, %v2699_v3  ;;  %v3595_v54 = vor.u32 %v3698_v53, %v3592_v11 }
 0x743   : > { %v2711_v43 = vmul.f32 %v5910_v39, %v5910_v39  ;;  %2915 = vmatpush.bf16.msrb.mxu2 %v3595_v54 }
 0x745   : > { %v2721_v23 = vsel %vm137_vm0, %v2711_v43, 0.0  ;;  %v5960_v43 = vld [vmem:[%s223_s5] ss:$0 sm:$0xff]  ;;  %s237_s5 = scalar_lea.vmem %s6210_s10, %s3445_s29 }
 0x746   : > { %v2683_v14 = vpop.xlane.xlu1 %2682  ;;  %2722 = vadd.xlane.f32.xlu2 %v2721_v23 }
 0x747   : > { %v2700_v46 = vmul.f32 %v5894_v41, %v2683_v14  ;;  %2916 = vmatpush.bf16.msrb.mxu2 %v3587_v56 }
 0x749   : > { %v5916_v19 = vsub.f32 %v2669_v1, %v2700_v46 }
 0x74b   : > { %v2712_v0 = vmul.f32 %v5916_v19, %v5916_v19  ;;  %2917 = vmatpush.bf16.msrb.mxu2 %v3579_v2  ;;  %v3717_v2 = vld [vmem:[%s5991_s26 + $0x70] sm:$0xff] }
 0x74c   : > { %3076 = vmatpush.bf16.msrb.mxu0 %v3717_v2 }
 0x74d   : > { %v2724_v27 = vsel %vm137_vm0, %v2712_v0, 0.0  ;;  %v5968_v0 = vld [vmem:[%s225_s30] ss:$0 sm:$0xff]  ;;  %s274_s30 = scalar_lea.vmem %s6212_s12, %s4279_s25  ;;  %s189_s25 = sadd.s32 1, %s4279_s25  }
 0x74e   : > { %2725 = vadd.xlane.f32.xlu1 %v2724_v27  ;;  %p186_p0 = scmp.ge.s32.totalorder %s189_s25, 6  }
 0x74f   :  { %s3369_s27 = sshll.u32 (%p186_p0), %s6219_s19, 4  ;;  %s4306_s28 = smov (%p186_p0), 1   ;;  %s3370_s27 = int_to_ptr.hbm [resolvable:$true] %s3369_s27 }
 0x757   : > { %v2686_v51 = vpop.xlane.xlu0 %2685 }
 0x758   : > { %v2701_v42 = vmul.f32 %v5894_v41, %v2686_v51 }
 0x75a   : > { %v5922_v15 = vsub.f32 %v2670_v57, %v2701_v42 }
 0x75c   : > { %v2713_v60 = vmul.f32 %v5922_v15, %v5922_v15 }
 0x75e   : > { %v2727_v49 = vsel %vm137_vm0, %v2713_v60, 0.0 }
 0x75f   : > { %v2689_v47 = vpop.xlane.xlu2 %2688  ;;  %2728 = vadd.xlane.f32.xlu0 %v2727_v49 }
 0x760   : > { %v2702_v21 = vmul.f32 %v5894_v41, %v2689_v47 }
 0x762   : > { %v5939_v17 = vsub.f32 %v2671_v59, %v2702_v21 }
 0x764   : > { %v2714_v9 = vmul.f32 %v5939_v17, %v5939_v17 }
 0x766   : > { %v2730_v1 = vsel %vm137_vm0, %v2714_v9, 0.0 }
 0x767   : > { %v2717_v29 = vpop.xlane.xlu1 %2716  ;;  %2731 = vadd.xlane.f32.xlu2 %v2730_v1 }
 0x768   : > { %v2733_v33 = vmul.f32 %v2717_v29, %v5894_v41 }
 0x76a   : > { %v2739_v57 = vadd.f32 1e-05, %v2733_v33 }
 0x76c   : > { %4118 = vrsqrt.f32 %v2739_v57  ;;  %vm2751_vm12 = vweird.f32 %v2739_v57 }
 0x76f   : > { %v2720_v35 = vpop.xlane.xlu0 %2719 }
 0x770   : > { %v2734_v26 = vmul.f32 %v2720_v35, %v5894_v41 }
 0x772   : > { %v4119_v52 = vpop.eup %4118  ;;  %v2740_v59 = vadd.f32 1e-05, %v2734_v26 }
 0x773   : > { %v2746_v55 = vmul.f32 %v4119_v52, %v2739_v57  ;;  %vm2752_vm11 = vweird.f32 %v4119_v52 }
 0x774   : > { %4120 = vrsqrt.f32 %v2740_v59  ;;  %vm2753_vm13 = vmor %vm2751_vm12, %vm2752_vm11  ;;  %vm2761_vm15 = vweird.f32 %v2740_v59 }
 0x775   : > { %v2747_v44 = vmul.f32 %v4119_v52, %v2746_v55 }
 0x777   : > { %v2748_v62 = vmul.f32 0.5, %v2747_v44  ;;  %v3708_v44 = vld [vmem:[%s5991_s26 + $0x28] sm:$0xff] }
 0x779   : > { %v2749_v7 = vsub.f32 1.5, %v2748_v62  ;;  %v3716_v62 = vld [vmem:[%s5991_s26 + $0x68] sm:$0xff] }
 0x77a   : > { %v4121_v6 = vpop.eup %4120  ;;  %3077 = vmatpush.bf16.msrb.mxu0 %v3716_v62 }
 0x77b   : > { %v2750_v10 = vmul.f32 %v4119_v52, %v2749_v7  ;;  %v2756_v63 = vmul.f32 %v4121_v6, %v2740_v59  ;;  %vm2762_vm14 = vweird.f32 %v4121_v6 }
 0x77c   : > { %vm2763_vm1 = vmor %vm2761_vm15, %vm2762_vm14 }
 0x77d   : > { %v2757_v34 = vmul.f32 %v4121_v6, %v2756_v63  ;;  %v2754_v40 = vsel %vm2753_vm13, %v4119_v52, %v2750_v10  ;;  %v3707_v10 = vld [vmem:[%s5991_s26 + $0x20] sm:$0xff] }
 0x77e   : > { %v2805_v23 = vmul.f32 %v2754_v40, %v5898_v24 }
 0x77f   : > { %v2758_v20 = vmul.f32 0.5, %v2757_v34 }
 0x780   : > { %v2814_v27 = vmul.f32 %v5960_v43, %v2805_v23 }
 0x781   : > { %v2759_v3 = vsub.f32 1.5, %v2758_v20 }
 0x782   : > { %v5974_v60 = vadd.f32 %v5968_v0, %v2814_v27 }
 0x783   : > { %v2760_v14 = vmul.f32 %v4121_v6, %v2759_v3 }
 0x785   : > { %v2764_v46 = vsel %vm2763_vm1, %v4121_v6, %v2760_v14 }
 0x786   : > { %v2806_v51 = vmul.f32 %v2764_v46, %v5904_v30  ;;  %v3706_v46 = vld [vmem:[%s5991_s26 + $0x18] sm:$0xff] }
 0x788   : > { %v2815_v42 = vmul.f32 %v5960_v43, %v2806_v51  ;;  %v3715_v51 = vld [vmem:[%s5991_s26 + $0x60] sm:$0xff] }
 0x789   : > { %3078 = vmatpush.bf16.msrb.mxu0 %v3715_v51 }
 0x78a   : > { %v5977_v24 = vadd.f32 %v5968_v0, %v2815_v42 }
 0x78c   : > { %v2829_v4 = vpack.c.bf16 %v5977_v24, %v5974_v60 }
 0x78e   : > { %3604 = vmatmul.msk.bf16.vlgmr.msrb.gmra.mxu1 %vm137_vm0, %v2829_v4  ;;  %3607 = vmatmul.msk.bf16.vlgmr.msrb.gmra.mxu2 %vm137_vm0, %v2829_v4 }
 0x7b9   : > { %v2723_v18 = vpop.xlane.xlu2 %2722 }
 0x7ba   : > { %v2735_v32 = vmul.f32 %v2723_v18, %v5894_v41  ;;  %v3705_v18 = vld [vmem:[%s5991_s26 + $0x10] sm:$0xff] }
 0x7bc   : > { %v2741_v49 = vadd.f32 1e-05, %v2735_v32 }
 0x7be   : > { %4122 = vrsqrt.f32 %v2741_v49  ;;  %vm2771_vm3 = vweird.f32 %v2741_v49 }
 0x7c1   : > { %v2726_v30 = vpop.xlane.xlu1 %2725 }
 0x7c2   : > { %v2736_v50 = vmul.f32 %v2726_v30, %v5894_v41 }
 0x7c4   : > { %v4123_v8 = vpop.eup %4122  ;;  %v2742_v47 = vadd.f32 1e-05, %v2736_v50 }
 0x7c5   : > { %v2766_v38 = vmul.f32 %v4123_v8, %v2741_v49  ;;  %vm2772_vm2 = vweird.f32 %v4123_v8  ;;  %v3714_v49 = vld [vmem:[%s5991_s26 + $0x58] sm:$0xff] }
 0x7c6   : > { %4124 = vrsqrt.f32 %v2742_v47  ;;  %vm2773_vm4 = vmor %vm2771_vm3, %vm2772_vm2  ;;  %vm2781_vm6 = vweird.f32 %v2742_v47  ;;  %3079 = vmatpush.bf16.msrb.mxu0 %v3714_v49 }
 0x7c7   : > { %v2767_v21 = vmul.f32 %v4123_v8, %v2766_v38 }
 0x7c9   : > { %v2768_v37 = vmul.f32 0.5, %v2767_v21 }
 0x7cb   : > { %v2769_v58 = vsub.f32 1.5, %v2768_v37  ;;  %v3703_v37 = vld [vmem:[%s5991_s26] sm:$0xff] }
 0x7cc   : > { %v4125_v53 = vpop.eup %4124 }
 0x7cd   : > { %v2770_v61 = vmul.f32 %v4123_v8, %v2769_v58  ;;  %v2776_v11 = vmul.f32 %v4125_v53, %v2742_v47  ;;  %vm2782_vm5 = vweird.f32 %v4125_v53  ;;  %v3713_v47 = vld [vmem:[%s5991_s26 + $0x50] sm:$0xff]  ;;  %v3712_v58 = vld [vmem:[%s5991_s26 + $0x48] sm:$0xff] }
 0x7ce   : > { %vm2783_vm7 = vmor %vm2781_vm6, %vm2782_vm5  ;;  %3080 = vmatpush.bf16.msrb.mxu0 %v3713_v47 }
 0x7cf   : > { %v2777_v54 = vmul.f32 %v4125_v53, %v2776_v11  ;;  %v2774_v9 = vsel %vm2773_vm4, %v4123_v8, %v2770_v61  ;;  %v3704_v8 = vld [vmem:[%s5991_s26 + $0x8] sm:$0xff] }
 0x7d0   : > { %v2807_v45 = vmul.f32 %v2774_v9, %v5910_v39  ;;  %v3710_v39 = vld [vmem:[%s5991_s26 + $0x38] sm:$0xff] }
 0x7d1   : > { %v2778_v22 = vmul.f32 0.5, %v2777_v54  ;;  %3051 = vmatpush.bf16.msrb.mxu3 %v3710_v39 }
 0x7d2   : > { %v2729_v13 = vpop.xlane.xlu0 %2728  ;;  %v2816_v36 = vmul.f32 %v5960_v43, %v2807_v45  ;;  %3081 = vmatpush.bf16.msrb.mxu0 %v3712_v58 }
 0x7d3   : > { %v2737_v5 = vmul.f32 %v2729_v13, %v5894_v41  ;;  %v2779_v1 = vsub.f32 1.5, %v2778_v22 }
 0x7d5   : > { %v2743_v48 = vadd.f32 1e-05, %v2737_v5  ;;  %v2780_v29 = vmul.f32 %v4125_v53, %v2779_v1  ;;  %3052 = vmatpush.bf16.msrb.mxu3 %v3709_v25 }
 0x7d7   : > { %4126 = vrsqrt.f32 %v2743_v48  ;;  %v2784_v56 = vsel %vm2783_vm7, %v4125_v53, %v2780_v29  ;;  %vm2791_vm9 = vweird.f32 %v2743_v48 }
 0x7d8   : > { %v2808_v33 = vmul.f32 %v2784_v56, %v5916_v19  ;;  %v6002_v19 = vadd.f32 %v5968_v0, %v2816_v36 }
 0x7d9   : > { %3053 = vmatpush.bf16.msrb.mxu3 %v3708_v44 }
 0x7da   : > { %v2732_v12 = vpop.xlane.xlu2 %2731  ;;  %v2817_v31 = vmul.f32 %v5960_v43, %v2808_v33 }
 0x7db   : > { %v2738_v57 = vmul.f32 %v2732_v12, %v5894_v41 }
 0x7dc   : > { %v6005_v52 = vadd.f32 %v5968_v0, %v2817_v31 }
 0x7dd   : > { %v4127_v35 = vpop.eup %4126  ;;  %v2744_v26 = vadd.f32 1e-05, %v2738_v57  ;;  %3054 = vmatpush.bf16.msrb.mxu3 %v3707_v10 }
 0x7de   : > { %v2786_v59 = vmul.f32 %v4127_v35, %v2743_v48  ;;  %v2830_v55 = vpack.c.bf16 %v6005_v52, %v6002_v19  ;;  %vm2792_vm8 = vweird.f32 %v4127_v35 }
 0x7df   : > { %4128 = vrsqrt.f32 %v2744_v26  ;;  %vm2793_vm10 = vmor %vm2791_vm9, %vm2792_vm8  ;;  %vm2801_vm12 = vweird.f32 %v2744_v26 }
 0x7e0   : > { %v2787_v7 = vmul.f32 %v4127_v35, %v2786_v59  ;;  %3605 = vmatmul.msk.bf16.gmra.mxu1 %vm137_vm0, %v2830_v55  ;;  %3608 = vmatmul.msk.bf16.gmra.mxu2 %vm137_vm0, %v2830_v55 }
 0x7e1   : > { %3055 = vmatpush.bf16.msrb.mxu3 %v3706_v46 }
 0x7e2   : > { %v2788_v6 = vmul.f32 0.5, %v2787_v7 }
 0x7e4   : > { %v2789_v63 = vsub.f32 1.5, %v2788_v6 }
 0x7e5   : > { %v4129_v34 = vpop.eup %4128  ;;  %3056 = vmatpush.bf16.msrb.mxu3 %v3705_v18 }
 0x7e6   : > { %v2790_v40 = vmul.f32 %v4127_v35, %v2789_v63  ;;  %v2796_v20 = vmul.f32 %v4129_v34, %v2744_v26  ;;  %vm2802_vm11 = vweird.f32 %v4129_v34 }
 0x7e7   : > { %vm2803_vm13 = vmor %vm2801_vm12, %vm2802_vm11 }
 0x7e8   : > { %v2797_v3 = vmul.f32 %v4129_v34, %v2796_v20  ;;  %v2794_v23 = vsel %vm2793_vm10, %v4127_v35, %v2790_v40 }
 0x7e9   : > { %v2809_v42 = vmul.f32 %v2794_v23, %v5922_v15  ;;  %3057 = vmatpush.bf16.msrb.mxu3 %v3704_v8 }
 0x7ea   : > { %v2798_v14 = vmul.f32 0.5, %v2797_v3 }
 0x7eb   : > { %v2818_v50 = vmul.f32 %v5960_v43, %v2809_v42 }
 0x7ec   : > { %v2799_v27 = vsub.f32 1.5, %v2798_v14 }
 0x7ed   : > { %v6025_v38 = vadd.f32 %v5968_v0, %v2818_v50  ;;  %3058 = vmatpush.bf16.msrb.mxu3 %v3703_v37 }
 0x7ee   : > { %v2800_v4 = vmul.f32 %v4129_v34, %v2799_v27 }
 0x7f0   : > { %v2804_v32 = vsel %vm2803_vm13, %v4129_v34, %v2800_v4 }
 0x7f1   : > { %v2810_v30 = vmul.f32 %v2804_v32, %v5939_v17  ;;  %v3921_v32 = vld [vmem:[%s274_s30] ss:$0 sm:$0xff] }
 0x7f3   : > { %v2819_v15 = vmul.f32 %v5960_v43, %v2810_v30  ;;  %v3711_v43 = vld [vmem:[%s5991_s26 + $0x40] sm:$0xff] }
 0x7f4   : > { %3082 = vmatpush.bf16.msrb.mxu0 %v3711_v43 }
 0x7f5   : > { %v6028_v21 = vadd.f32 %v5968_v0, %v2819_v15  ;;  %v238_v0 = vld [vmem:[%s237_s5] sm:$0x3] }
 0x7f6   : > { %v2833_v61 = vperm.slane %v238_v0, 0  ;;  %v2834_v22 = vperm.slane %v238_v0, 1 }
 0x7f7   : > { %v2831_v17 = vpack.c.bf16 %v6028_v21, %v6025_v38 }
 0x7f9   : > { %3606 = vmatmul.msk.bf16.gmra.mxu1 %vm137_vm0, %v2831_v17  ;;  %3609 = vmatmul.msk.bf16.gmra.mxu2 %vm137_vm0, %v2831_v17 }
 0x80b   : > { %v2895_v53 = vpop.f32.mrf.mxu1 }
 0x80c   : > { %v2896_v54 = vadd.f32 %v2895_v53, %v2833_v61 }
 0x80e   : > { %v2934_v5 = vmax.f32 %v2896_v54, 0.0 }
 0x811   : > { %v2919_v11 = vpop.f32.mrf.mxu2 }
 0x812   : > { %v2920_v45 = vadd.f32 %v2919_v11, %v2834_v22 }
 0x813   : > { %v2897_v9 = vpop.f32.mrf.mxu1 }
 0x814   : > { %v2898_v13 = vadd.f32 %v2897_v9, %v2833_v61  ;;  %v2935_v33 = vmax.f32 %v2920_v45, 0.0 }
 0x816   : > { %v2936_v1 = vmax.f32 %v2898_v13, 0.0 }
 0x818   : > { %v2946_v48 = vpack.c.bf16 %v2936_v1, %v2934_v5 }
 0x819   : > { %v2921_v29 = vpop.f32.mrf.mxu2 }
 0x81a   : > { %v2922_v56 = vadd.f32 %v2921_v29, %v2834_v22  ;;  %3059 = vmatmul.bf16.vlgmr.msrb.gmra.mxu3 %v2946_v48 }
 0x81c   : > { %v2937_v36 = vmax.f32 %v2922_v56, 0.0 }
 0x81e   : > { %v2947_v39 = vpack.c.bf16 %v2937_v36, %v2935_v33 }
 0x820   : > { %3083 = vmatmul.bf16.vlgmr.msrb.gmra.mxu0 %v2947_v39 }
 0x85d   : > { %v2900_v28 = vpop.f32.mrf.mxu1 }
 0x85e   : > { %v2901_v57 = vadd.f32 %v2900_v28, %v2833_v61 }
 0x860   : > { %v2938_v2 = vmax.f32 %v2901_v57, 0.0 }
 0x863   : > { %v2924_v12 = vpop.f32.mrf.mxu2 }
 0x864   : > { %v2925_v26 = vadd.f32 %v2924_v12, %v2834_v22 }
 0x865   : > { %v2902_v31 = vpop.f32.mrf.mxu1 }
 0x866   : > { %v2903_v25 = vadd.f32 %v2902_v31, %v2833_v61  ;;  %v2939_v62 = vmax.f32 %v2925_v26, 0.0 }
 0x868   : > { %v2940_v35 = vmax.f32 %v2903_v25, 0.0 }
 0x86a   : > { %v2948_v59 = vpack.c.bf16 %v2940_v35, %v2938_v2 }
 0x86b   : > { %v2926_v55 = vpop.f32.mrf.mxu2 }
 0x86c   : > { %v2927_v44 = vadd.f32 %v2926_v55, %v2834_v22  ;;  %3064 = vmatmul.bf16.gmra.mxu3 %v2948_v59 }
 0x86e   : > { %v2941_v7 = vmax.f32 %v2927_v44, 0.0 }
 0x870   : > { %v2949_v6 = vpack.c.bf16 %v2941_v7, %v2939_v62 }
 0x872   : > { %3088 = vmatmul.bf16.gmra.mxu0 %v2949_v6 }
 0x876   : > { %v2905_v10 = vpop.f32.mrf.mxu1 }
 0x877   : > { %v2906_v34 = vadd.f32 %v2905_v10, %v2833_v61 }
 0x879   : > { %v2942_v3 = vmax.f32 %v2906_v34, 0.0 }
 0x87c   : > { %v2929_v63 = vpop.f32.mrf.mxu2 }
 0x87d   : > { %v2930_v14 = vadd.f32 %v2929_v63, %v2834_v22 }
 0x87e   : > { %v2907_v40 = vpop.f32.mrf.mxu1 }
 0x87f   : > { %v2908_v20 = vadd.f32 %v2907_v40, %v2833_v61  ;;  %v2943_v42 = vmax.f32 %v2930_v14, 0.0 }
 0x881   : > { %v2944_v23 = vmax.f32 %v2908_v20, 0.0 }
 0x883   : > { %v2950_v46 = vpack.c.bf16 %v2944_v23, %v2942_v3 }
 0x884   : > { %v2931_v27 = vpop.f32.mrf.mxu2 }
 0x885   : > { %v2932_v51 = vadd.f32 %v2931_v27, %v2834_v22  ;;  %3069 = vmatmul.bf16.gmra.mxu3 %v2950_v46 }
 0x887   : > { %v2945_v4 = vmax.f32 %v2932_v51, 0.0 }
 0x889   : > { %v2951_v18 = vpack.c.bf16 %v2945_v4, %v2943_v42 }
 0x88b   : > { %3093 = vmatmul.bf16.gmra.mxu0 %v2951_v18 }
 0x89d   : > { %v3060_v49 = vpop.f32.mrf.mxu3  ;;  %v3084_v30 = vpop.f32.mrf.mxu0 }
 0x89e   : > { %v3061_v50 = vadd.f32 %v3921_v32, %v3060_v49 }
 0x8a0   : > { %v3085_v8 = vadd.f32 %v3084_v30, %v3061_v50 }
 0x8a2   : > { %v3099_v15 = vadd.f32 %v3085_v8, %v5974_v60 }
 0x8a4   : > { %v3105_v47 = vsel %vm137_vm0, %v3099_v15, 0.0 }
 0x8a5   : > { %v3062_v37 = vpop.f32.mrf.mxu3  ;;  %3106 = vadd.xlane.f32.xlu1 %v3105_v47  ;;  %v3086_v58 = vpop.f32.mrf.mxu0 }
 0x8a6   : > { %v3063_v17 = vadd.f32 %v3921_v32, %v3062_v37 }
 0x8a8   : > { %v3087_v43 = vadd.f32 %v3086_v58, %v3063_v17 }
 0x8aa   : > { %v3100_v0 = vadd.f32 %v3087_v43, %v5977_v24 }
 0x8ac   : > { %v3108_v53 = vsel %vm137_vm0, %v3100_v0, 0.0 }
 0x8ad   : > { %3109 = vadd.xlane.f32.xlu0 %v3108_v53 }
 0x8ef   : > { %v3065_v61 = vpop.f32.mrf.mxu3  ;;  %v3089_v11 = vpop.f32.mrf.mxu0 }
 0x8f0   : > { %v3066_v54 = vadd.f32 %v3921_v32, %v3065_v61 }
 0x8f2   : > { %v3090_v9 = vadd.f32 %v3089_v11, %v3066_v54 }
 0x8f4   : > { %v3101_v22 = vadd.f32 %v3090_v9, %v6002_v19 }
 0x8f6   : > { %v3111_v60 = vsel %vm137_vm0, %v3101_v22, 0.0 }
 0x8f7   : > { %v3067_v13 = vpop.f32.mrf.mxu3  ;;  %3112 = vadd.xlane.f32.xlu2 %v3111_v60  ;;  %v3091_v1 = vpop.f32.mrf.mxu0 }
 0x8f8   : > { %v3068_v5 = vadd.f32 %v3921_v32, %v3067_v13  ;;  %v6106_v13 = vld [vmem:[%s276_s1] ss:$0 sm:$0xff] }
 0x8fa   : > { %v3092_v45 = vadd.f32 %v3091_v1, %v3068_v5 }
 0x8fc   : > { %v3102_v24 = vadd.f32 %v3092_v45, %v6005_v52  ;;  %v6113_v45 = vld [vmem:[%s278_s23] ss:$0 sm:$0xff]  ;;  %s4304_s23 = smov (%p186_p0), [#allocation7]  }
 0x8fe   : > { %v3114_v48 = vsel %vm137_vm0, %v3102_v24, 0.0 }
 0x8ff   : > { %3115 = vadd.xlane.f32.xlu1 %v3114_v48 }
 0x908   : > { %v3070_v29 = vpop.f32.mrf.mxu3  ;;  %v3094_v56 = vpop.f32.mrf.mxu0 }
 0x909   : > { %v3071_v33 = vadd.f32 %v3921_v32, %v3070_v29 }
 0x90b   : > { %v3095_v36 = vadd.f32 %v3094_v56, %v3071_v33 }
 0x90d   : > { %v3103_v19 = vadd.f32 %v3095_v36, %v6025_v38 }
 0x90f   : > { %v3117_v39 = vsel %vm137_vm0, %v3103_v19, 0.0 }
 0x910   : > { %v3072_v28 = vpop.f32.mrf.mxu3  ;;  %3118 = vadd.xlane.f32.xlu0 %v3117_v39  ;;  %v3096_v57 = vpop.f32.mrf.mxu0 }
 0x911   : > { %v3073_v12 = vadd.f32 %v3921_v32, %v3072_v28 }
 0x913   : > { %v3097_v31 = vadd.f32 %v3096_v57, %v3073_v12 }
 0x915   : > { %v3104_v52 = vadd.f32 %v3097_v31, %v6028_v21 }
 0x917   : > { %v3120_v25 = vsel %vm137_vm0, %v3104_v52, 0.0 }
 0x918   : > { %3121 = vadd.xlane.f32.xlu2 %v3120_v25  ;;  %v3107_v38 = vpop.xlane.xlu1 %3106 }
 0x919   : > { %v3123_v2 = vmul.f32 %v3107_v38, %v5894_v41 }
 0x91b   : > { %v3129_v35 = vsub.f32 %v3099_v15, %v3123_v2 }
 0x91d   : > { %v3135_v26 = vmul.f32 %v3129_v35, %v3129_v35 }
 0x91f   : > { %v3141_v59 = vsel %vm137_vm0, %v3135_v26, 0.0 }
 0x920   : > { %v3110_v55 = vpop.xlane.xlu0 %3109  ;;  %3142 = vadd.xlane.f32.xlu1 %v3141_v59 }
 0x921   : > { %v3124_v44 = vmul.f32 %v3110_v55, %v5894_v41 }
 0x923   : > { %v3130_v62 = vsub.f32 %v3100_v0, %v3124_v44 }
 0x925   : > { %v3136_v7 = vmul.f32 %v3130_v62, %v3130_v62 }
 0x927   : > { %v3144_v6 = vsel %vm137_vm0, %v3136_v7, 0.0 }
 0x928   : > { %3145 = vadd.xlane.f32.xlu0 %v3144_v6 }
 0x96a   : > { %v3113_v21 = vpop.xlane.xlu2 %3112 }
 0x96b   : > { %v3125_v10 = vmul.f32 %v3113_v21, %v5894_v41 }
 0x96d   : > { %v6076_v63 = vsub.f32 %v3101_v22, %v3125_v10 }
 0x96f   : > { %v3137_v34 = vmul.f32 %v6076_v63, %v6076_v63 }
 0x971   : > { %v3147_v40 = vsel %vm137_vm0, %v3137_v34, 0.0 }
 0x972   : > { %3148 = vadd.xlane.f32.xlu2 %v3147_v40  ;;  %v3116_v20 = vpop.xlane.xlu1 %3115 }
 0x973   : > { %v3126_v3 = vmul.f32 %v3116_v20, %v5894_v41 }
 0x975   : > { %v6082_v23 = vsub.f32 %v3102_v24, %v3126_v3 }
 0x977   : > { %v3138_v14 = vmul.f32 %v6082_v23, %v6082_v23 }
 0x979   : > { %v3150_v46 = vsel %vm137_vm0, %v3138_v14, 0.0 }
 0x97a   : > { %3151 = vadd.xlane.f32.xlu1 %v3150_v46 }
 0x983   : > { %v3119_v27 = vpop.xlane.xlu0 %3118 }
 0x984   : > { %v3127_v51 = vmul.f32 %v3119_v27, %v5894_v41 }
 0x986   : > { %v6088_v42 = vsub.f32 %v3103_v19, %v3127_v51 }
 0x988   : > { %v3139_v4 = vmul.f32 %v6088_v42, %v6088_v42 }
 0x98a   : > { %v3153_v18 = vsel %vm137_vm0, %v3139_v4, 0.0 }
 0x98b   : > { %v3122_v32 = vpop.xlane.xlu2 %3121  ;;  %3154 = vadd.xlane.f32.xlu0 %v3153_v18 }
 0x98c   : > { %v3128_v49 = vmul.f32 %v3122_v32, %v5894_v41 }
 0x98e   : > { %v6094_v30 = vsub.f32 %v3104_v52, %v3128_v49 }
 0x990   : > { %v3140_v50 = vmul.f32 %v6094_v30, %v6094_v30 }
 0x992   : > { %v3156_v8 = vsel %vm137_vm0, %v3140_v50, 0.0 }
 0x993   : > { %3157 = vadd.xlane.f32.xlu2 %v3156_v8  ;;  %v3143_v15 = vpop.xlane.xlu1 %3142 }
 0x994   : > { %v3159_v47 = vmul.f32 %v3143_v15, %v5894_v41 }
 0x996   : > { %v3165_v37 = vadd.f32 1e-05, %v3159_v47 }
 0x998   : > { %4130 = vrsqrt.f32 %v3165_v37  ;;  %vm3177_vm15 = vweird.f32 %v3165_v37 }
 0x99b   : > { %v3146_v17 = vpop.xlane.xlu0 %3145 }
 0x99c   : > { %v3160_v58 = vmul.f32 %v3146_v17, %v5894_v41 }
 0x99e   : > { %v4131_v43 = vpop.eup %4130  ;;  %v3166_v0 = vadd.f32 1e-05, %v3160_v58 }
 0x99f   : > { %v3172_v53 = vmul.f32 %v4131_v43, %v3165_v37  ;;  %vm3178_vm14 = vweird.f32 %v4131_v43 }
 0x9a0   : > { %4132 = vrsqrt.f32 %v3166_v0  ;;  %vm3179_vm1 = vmor %vm3177_vm15, %vm3178_vm14  ;;  %vm3187_vm3 = vweird.f32 %v3166_v0 }
 0x9a1   : > { %v3173_v61 = vmul.f32 %v4131_v43, %v3172_v53 }
 0x9a3   : > { %v3174_v11 = vmul.f32 0.5, %v3173_v61 }
 0x9a5   : > { %v3175_v54 = vsub.f32 1.5, %v3174_v11 }
 0x9a6   : > { %v4133_v9 = vpop.eup %4132 }
 0x9a7   : > { %v3176_v22 = vmul.f32 %v4131_v43, %v3175_v54  ;;  %v3182_v60 = vmul.f32 %v4133_v9, %v3166_v0  ;;  %vm3188_vm2 = vweird.f32 %v4133_v9 }
 0x9a8   : > { %vm3189_vm4 = vmor %vm3187_vm3, %vm3188_vm2  ;;  %vm3260_vm2 = vcmask (%p186_p0), 1041409   ;;  %vm3263_vm3 = vcmask (%p186_p0), 517120  }
 0x9a9   : > { %v3180_v5 = vsel %vm3179_vm1, %v4131_v43, %v3176_v22  ;;  %v3183_v1 = vmul.f32 %v4133_v9, %v3182_v60 }
 0x9aa   : > { %v3231_v24 = vmul.f32 %v3180_v5, %v3129_v35 }
 0x9ab   : > { %v3184_v48 = vmul.f32 0.5, %v3183_v1 }
 0x9ac   : > { %v3240_v29 = vmul.f32 %v6106_v13, %v3231_v24 }
 0x9ad   : > { %v3185_v56 = vsub.f32 1.5, %v3184_v48 }
 0x9ae   : > { %v6117_v21 = vadd.f32 %v6113_v45, %v3240_v29  }
 0x9af   : > { %v3186_v36 = vmul.f32 %v4133_v9, %v3185_v56 }
 0x9b0   : > { %v6323_v33 = vmov %v6117_v21 }
 0x9b1   : > { %v3190_v19 = vsel %vm3189_vm4, %v4133_v9, %v3186_v36 }
 0x9b2   : > { %v3232_v39 = vmul.f32 %v3190_v19, %v3130_v62 }
 0x9b4   : > { %v3241_v28 = vmul.f32 %v6106_v13, %v3232_v39 }
 0x9b6   : > { %v6121_v28 = vadd.f32 %v6113_v45, %v3241_v28  }
 0x9b7   :  { %v3323_v28 = vld [vmem:[%s6217_s17 + $0x20] sm:$0xff] (%p186_p0) }
 0x9e5   : > { %v3149_v12 = vpop.xlane.xlu2 %3148 }
 0x9e6   : > { %v3161_v57 = vmul.f32 %v3149_v12, %v5894_v41 }
 0x9e8   : > { %v3167_v31 = vadd.f32 1e-05, %v3161_v57 }
 0x9ea   : > { %4134 = vrsqrt.f32 %v3167_v31  ;;  %vm3197_vm6 = vweird.f32 %v3167_v31 }
 0x9ed   : > { %v3152_v52 = vpop.xlane.xlu1 %3151 }
 0x9ee   : > { %v3162_v25 = vmul.f32 %v3152_v52, %v5894_v41 }
 0x9f0   : > { %v4135_v38 = vpop.eup %4134  ;;  %v3168_v2 = vadd.f32 1e-05, %v3162_v25 }
 0x9f1   : > { %v3192_v35 = vmul.f32 %v4135_v38, %v3167_v31  ;;  %vm3198_vm5 = vweird.f32 %v4135_v38 }
 0x9f2   : > { %4136 = vrsqrt.f32 %v3168_v2  ;;  %vm3199_vm7 = vmor %vm3197_vm6, %vm3198_vm5  ;;  %vm3207_vm9 = vweird.f32 %v3168_v2 }
 0x9f3   : > { %v3193_v26 = vmul.f32 %v4135_v38, %v3192_v35 }
 0x9f5   : > { %v3194_v59 = vmul.f32 0.5, %v3193_v26 }
 0x9f7   : > { %v3195_v55 = vsub.f32 1.5, %v3194_v59 }
 0x9f8   : > { %v4137_v44 = vpop.eup %4136 }
 0x9f9   : > { %v3196_v62 = vmul.f32 %v4135_v38, %v3195_v55  ;;  %v3202_v7 = vmul.f32 %v4137_v44, %v3168_v2  ;;  %vm3208_vm8 = vweird.f32 %v4137_v44  ;;  %v3319_v2 = vld [vmem:[%s6217_s17] sm:$0xff] (%p186_p0) }
 0x9fa   : > { %vm3209_vm10 = vmor %vm3207_vm9, %vm3208_vm8 }
 0x9fb   : > { %v3200_v6 = vsel %vm3199_vm7, %v4135_v38, %v3196_v62  ;;  %v3203_v21 = vmul.f32 %v4137_v44, %v3202_v7  ;;  %v3320_v38 = vld [vmem:[%s6217_s17 + $0x8] sm:$0xff] (%p186_p0)  ;;  %vm3360_vm7 = vcmask (%p186_p0), 73728  }
 0x9fc   : > { %v3233_v10 = vmul.f32 %v3200_v6, %v6076_v63 }
 0x9fd   : > { %v3204_v34 = vmul.f32 0.5, %v3203_v21  ;;  %v6325_v21 = vmov %v6323_v33 }
 0x9fe   : > { %v3155_v40 = vpop.xlane.xlu0 %3154  ;;  %v3242_v20 = vmul.f32 %v6106_v13, %v3233_v10 }
 0x9ff   : > { %v3163_v3 = vmul.f32 %v3155_v40, %v5894_v41  ;;  %v3205_v14 = vsub.f32 1.5, %v3204_v34 }
 0xa00   : > { %v3251_v22 = vadd.f32 %v6113_v45, %v3242_v20   ;;  %v4142_v20 = vld [vmem:[%s6215_s15] ss:$0 sm:$0xff] (%p186_p0)  ;;  %s3367_s15 = sshll.u32 (%p186_p0), %s4304_s23, 4  ;;  %s3368_s15 = int_to_ptr.vmem [resolvable:$true] %s3367_s15 }
 0xa01   : > { %v3169_v46 = vadd.f32 1e-05, %v3163_v3  ;;  %v3206_v27 = vmul.f32 %v4137_v44, %v3205_v14  ;;  %v3326_v22 = vld [vmem:[%s6217_s17 + $0x38] sm:$0xff] (%p186_p0) }
 0xa02   :  { %3345 = vmatpush.msra.mxu0 (%p186_p0), %v3326_v22 }
 0xa03   : > { %4138 = vrsqrt.f32 %v3169_v46  ;;  %v3210_v51 = vsel %vm3209_vm10, %v4137_v44, %v3206_v27  ;;  %vm3217_vm12 = vweird.f32 %v3169_v46 }
 0xa04   : > { %v3234_v4 = vmul.f32 %v3210_v51, %v6082_v23 }
 0xa06   : > { %v3158_v18 = vpop.xlane.xlu2 %3157  ;;  %v3243_v63 = vmul.f32 %v6106_v13, %v3234_v4 }
 0xa07   : > { %v3164_v32 = vmul.f32 %v3158_v18, %v5894_v41 }
 0xa08   : > { %v3252_v50 = vadd.f32 %v6113_v45, %v3243_v63   ;;  %v4144_v63 = vld [vmem:[%s6218_s18] ss:$0 sm:$0xff] (%p186_p0) }
 0xa09   : > { %v4139_v49 = vpop.eup %4138  ;;  %v3170_v8 = vadd.f32 1e-05, %v3164_v32 }
 0xa0a   : > { %v3212_v15 = vmul.f32 %v4139_v49, %v3169_v46  ;;  %vm3218_vm11 = vweird.f32 %v4139_v49  ;;  %v6324_v29 = vmov %v3252_v50  ;;  %v4143_v46 = vld [vmem:[%s6216_s16] ss:$0 sm:$0xff] (%p186_p0)  ;;  %s4305_s16 = smov (%p186_p0), 16  }
 0xa0b   : > { %4140 = vrsqrt.f32 %v3170_v8  ;;  %vm3219_vm13 = vmor %vm3217_vm12, %vm3218_vm11  ;;  %vm3227_vm15 = vweird.f32 %v3170_v8  ;;  %v3325_v29 = vld [vmem:[%s6217_s17 + $0x30] sm:$0xff] (%p186_p0) }
 0xa0c   : > { %v3213_v47 = vmul.f32 %v4139_v49, %v3212_v15  ;;  %3346 = vmatpush.msra.mxu0 (%p186_p0), %v3325_v29 }
 0xa0e   : > { %v3214_v37 = vmul.f32 0.5, %v3213_v47 }
 0xa10   : > { %v3215_v17 = vsub.f32 1.5, %v3214_v37 }
 0xa11   : > { %v4141_v58 = vpop.eup %4140 }
 0xa12   : > { %v3216_v43 = vmul.f32 %v4139_v49, %v3215_v17  ;;  %v3222_v0 = vmul.f32 %v4141_v58, %v3170_v8  ;;  %vm3228_vm14 = vweird.f32 %v4141_v58 }
 0xa13   : > { %vm3229_vm1 = vmor %vm3227_vm15, %vm3228_vm14 }
 0xa14   : > { %v3220_v23 = vsel %vm3219_vm13, %v4139_v49, %v3216_v43  ;;  %v3223_v53 = vmul.f32 %v4141_v58, %v3222_v0 }
 0xa15   : > { %v3235_v61 = vmul.f32 %v3220_v23, %v6088_v42  ;;  %v3259_v42 = vrot.slane (%p186_p0), %v3252_v50, 7 }
 0xa16   : > { %v3224_v11 = vmul.f32 0.5, %v3223_v53 }
 0xa17   : > { %v3244_v54 = vmul.f32 %v6106_v13, %v3235_v61 }
 0xa18   : > { %v3225_v9 = vsub.f32 1.5, %v3224_v11 }
 0xa19   : > { %v3253_v25 = vadd.f32 %v6113_v45, %v3244_v54  }
 0xa1a   : > { %v3226_v60 = vmul.f32 %v4141_v58, %v3225_v9  ;;  %v3321_v25 = vld [vmem:[%s6217_s17 + $0x10] sm:$0xff] (%p186_p0) }
 0xa1c   : > { %v3230_v5 = vsel %vm3229_vm1, %v4141_v58, %v3226_v60 }
 0xa1d   : > { %v3236_v1 = vmul.f32 %v3230_v5, %v6094_v30  ;;  %188 = sbr.rel (!%p186_p0) target bundleno = 181 (0xb5), region = 123  ;;  %v3261_v30 = vsel (%p186_p0), %vm3260_vm2, %v3259_v42, %v6323_v33 }
 0xa1f   : > { %v3245_v24 = vmul.f32 %v6106_v13, %v3236_v1  ;;  %v3264_v13 = vsel (%p186_p0), %vm3263_vm3, %v3261_v30, 0.0 }
 0xa20   :  { %3265 = vadd.xlane.f32.xlu0 (%p186_p0), %v3264_v13 }
 0xa21   : > { %v3254_v31 = vadd.f32 %v6113_v45, %v3245_v24  }
 0xa22   :  { %v3322_v31 = vld [vmem:[%s6217_s17 + $0x18] sm:$0xff] }
 0xa93   :  { %v3266_v45 = vpop.xlane.xlu0 %3265 }
 0xa94   :  { %v3274_v48 = vmul.f32 %v3266_v45, %v5894_v41 }
 0xa96   :  { %v3276_v56 = vrot.slane %v3274_v48, 1  ;;  %v3279_v36 = vsub.f32 %v6323_v33, %v3274_v48  ;;  %v3324_v33 = vld [vmem:[%s6217_s17 + $0x28] sm:$0xff] }
 0xa97   :  { %3347 = vmatpush.msra.mxu0 %v3324_v33 }
 0xa98   :  { %v3280_v19 = vsub.f32 %v3252_v50, %v3276_v56  ;;  %v3281_v12 = vmul.f32 %v3279_v36, %v3279_v36 }
 0xa99   :  { %3348 = vmatpush.msra.mxu0 %v3323_v28 }
 0xa9a   :  { %v3282_v39 = vmul.f32 %v3280_v19, %v3280_v19 }
 0xa9b   :  { %3349 = vmatpush.msra.mxu0 %v3322_v31 }
 0xa9c   :  { %v3285_v57 = vrot.slane %v3282_v39, 7 }
 0xa9d   :  { %3350 = vmatpush.msra.mxu0 %v3321_v25 }
 0xa9e   :  { %v3286_v52 = vsel %vm3260_vm2, %v3285_v57, %v3281_v12 }
 0xa9f   :  { %v3288_v16 = vsel %vm3263_vm3, %v3286_v52, 0.0  ;;  %3351 = vmatpush.msra.mxu0 %v3320_v38 }
 0xaa0   :  { %3289 = vadd.xlane.f32.xlu0 %v3288_v16 }
 0xaa1   :  { %3352 = vmatpush.msra.mxu0 %v3319_v2 }
 0xb13   :  { %v3290_v35 = vpop.xlane.xlu0 %3289 }
 0xb14   :  { %v3291_v26 = vmul.f32 %v3290_v35, %v5894_v41 }
 0xb16   :  { %v3292_v59 = vadd.f32 1e-05, %v3291_v26 }
 0xb18   :  { %4145 = vrsqrt.f32 %v3292_v59  ;;  %vm3299_vm5 = vweird.f32 %v3292_v59 }
 0xb1e   :  { %v4146_v55 = vpop.eup %4145 }
 0xb1f   :  { %v3294_v44 = vmul.f32 %v4146_v55, %v3292_v59  ;;  %vm3300_vm4 = vweird.f32 %v4146_v55 }
 0xb20   :  { %vm3301_vm6 = vmor %vm3299_vm5, %vm3300_vm4 }
 0xb21   :  { %v3295_v62 = vmul.f32 %v4146_v55, %v3294_v44 }
 0xb23   :  { %v3296_v7 = vmul.f32 0.5, %v3295_v62 }
 0xb25   :  { %v3297_v6 = vsub.f32 1.5, %v3296_v7 }
 0xb27   :  { %v3298_v21 = vmul.f32 %v4146_v55, %v3297_v6 }
 0xb29   :  { %v3302_v10 = vsel %vm3301_vm6, %v4146_v55, %v3298_v21 }
 0xb2a   :  { %v3304_v34 = vrot.slane %v3302_v10, 1  ;;  %v3307_v40 = vmul.f32 %v3302_v10, %v3279_v36 }
 0xb2c   :  { %v3308_v41 = vmul.f32 %v3304_v34, %v3280_v19  ;;  %v3312_v3 = vmul.f32 %v4142_v20, %v3307_v40 }
 0xb2e   :  { %v3313_v14 = vmul.f32 %v4142_v20, %v3308_v41  ;;  %v3317_v51 = vadd.f32 %v4143_v46, %v3312_v3 }
 0xb30   :  { %v3318_v27 = vadd.f32 %v4143_v46, %v3313_v14 }
 0xb32   :  { %v3333_v4 = vrot.slane %v3318_v27, 7 }
 0xb34   :  { %v3334_v18 = vsel %vm3260_vm2, %v3333_v4, %v3317_v51 }
 0xb35   :  { %3674 = vmatmul.msk.f32.vlgmr.msra.gmra.mxu0 %vm137_vm0, %v3334_v18 }
 0xbb2   :  { %v3354_v32 = vpop.f32.mrf.mxu0 }
 0xbb3   :  { %v3355_v49 = vadd.f32 %v4144_v63, %v3354_v32 }
 0xbb5   :  { %v3358_v50 = vrot.slane %v3355_v49, 1  ;;  %3361 = vst.msk [vmem:[#allocation7] sm:$0x1] %vm3360_vm7, %v3355_v49 }
 0xbb7   :  { %3362 = vst.msk [vmem:[#allocation7 + $0x1] sm:$0x1] %vm3360_vm7, %v3358_v50 }
 0xbb8   :  { %3375 = dma.vmem_to_hbm [thread:$0]  %s3368_s15, 32, %s3370_s27, [#allocation4], %s4305_s16, %s4305_s16, %s4306_s28  }
 0xbb9   :  { %4251 = dma.done.wait [#allocation4], 32  }
 0xbba   :  { %4252 = vsyncadd [#allocation4], 4294967264 }
 0xbbb   :  { %3380 = vsyncpa [#allocation3], 1 }
 0xbbc   :  { %3381 = vsyncpa [#allocation6], 1 }
 0xbbd   :  { %3382 = vsyncpa [#allocation4], 1 }

</bundles_post_ra>
